<compile_context>
chip_gen: v5e
topology: v5e:2x2
jax: 0.10.0
libtpu: 0.0.40
codegen_flags: <defaults>
</compile_context>

<pallas_src>
import functools
import math

import jax
import jax.numpy as jnp
from jax.experimental import pallas as pl
from jax.experimental.pallas import tpu as pltpu

LN_EPS = 1e-5  # torch nn.LayerNorm default


# ------------------------------ kernel helpers -------------------------------

def _layer_norm(v, eps=LN_EPS):
    mu = jnp.mean(v, axis=-1, keepdims=True)
    var = jnp.mean((v - mu) ** 2, axis=-1, keepdims=True)
    return (v - mu) * jax.lax.rsqrt(var + eps)


# ------------------------------- fused kernel --------------------------------

def _fused_forward_kernel(diff_ref, aenc_ref,
                          w2a_ref, w2b_ref, w3_ref,
                          wqkv_ref, wo_ref, wfc_ref, wproj_ref, wdec_ref,
                          o_ref, *, nb_layers, num_heads, head_dim, seq_len):
    f32 = jnp.float32
    bf16 = jnp.bfloat16
    a_dim = num_heads * head_dim
    n = aenc_ref.shape[0]

    # ---- block-diagonal additive mask, built once in-kernel (VPU only) ------
    # batch_id(i) = floor((i + 0.5) / seq); the +0.5 gives a large margin so
    # f32 rounding of 1/seq can never flip a block boundary (no vector integer
    # division needed).
    inv_seq = 1.0 / float(seq_len)
    row_f = jax.lax.broadcasted_iota(jnp.int32, (n, n), 0).astype(f32)
    col_f = jax.lax.broadcasted_iota(jnp.int32, (n, n), 1).astype(f32)
    row_b = jnp.floor((row_f + 0.5) * inv_seq)
    col_b = jnp.floor((col_f + 0.5) * inv_seq)
    bias = jnp.where(row_b == col_b, 0.0, -1e30).astype(f32)       # (N, N)

    # ----------------------------- ActionEncoder -----------------------------
    # linear_1(actions) + command/pos embeddings arrive pre-combined (aenc);
    # linear_2(concat([diff, a], -1)) == diff @ W2a + a @ W2b.
    h = (jnp.dot(diff_ref[...].astype(bf16), w2a_ref[...],
                 preferred_element_type=f32)
         + jnp.dot(aenc_ref[...].astype(bf16), w2b_ref[...],
                   preferred_element_type=f32))
    h = h * jax.nn.sigmoid(h)                                      # SiLU, f32
    x = jnp.dot(h.astype(bf16), w3_ref[...], preferred_element_type=f32)  # (N,D)

    # --------------------------- Transformer blocks --------------------------
    # TODO(synk): switch to lax.fori_loop over the stacked weight refs if
    #             nb_layers grows beyond ~3 (vreg live-range / compile time).
    for l in range(nb_layers):
        # --- pre-LN self-attention ---
        xn = _layer_norm(x)
        # q columns of wqkv are pre-scaled by attn_scale / head_dim at pack time
        qkv = jnp.dot(xn.astype(bf16), wqkv_ref[l],
                      preferred_element_type=f32)                  # (N, 3*a_dim)
        wo_l = wo_ref[l]                                           # (a_dim, D) bf16
        att = jnp.zeros_like(x)                                    # (N, D) f32
        for hd in range(num_heads):                                # static head slices
            lo = hd * head_dim
            q_h = qkv[:, lo:lo + head_dim]
            k_h = qkv[:, a_dim + lo:a_dim + lo + head_dim]
            v_h = qkv[:, 2 * a_dim + lo:2 * a_dim + lo + head_dim]
            s_h = jax.lax.dot_general(q_h, k_h, (((1,), (1,)), ((), ())),
                                      preferred_element_type=f32)  # (N, N)
            s_h = s_h + bias                                       # batch-local attn
            s_h = s_h - jnp.max(s_h, axis=-1, keepdims=True)
            p = jnp.exp(s_h)
            p = p * pl.reciprocal(jnp.sum(p, axis=-1, keepdims=True), approx=True)
            y_h = jnp.dot(p, v_h, preferred_element_type=f32)      # (N, dh)
            # per-head output projection + accumulation (no lane concat)
            att = att + jnp.dot(y_h.astype(bf16), wo_l[lo:lo + head_dim, :],
                                preferred_element_type=f32)
        x = x + att

        # --- pre-LN MLP ---
        xn2 = _layer_norm(x)
        hm = jnp.dot(xn2.astype(bf16), wfc_ref[l], preferred_element_type=f32)
        # tanh GELU -> transcendental on the EUP slot (deviates slightly from
        # torch's exact erf GELU; within the 5e-2 tolerance, see __main__).
        hm = jax.nn.gelu(hm, approximate=True)
        x = x + jnp.dot(hm.astype(bf16), wproj_ref[l], preferred_element_type=f32)

    # --------------------------- ln_f + MuReadout -----------------------------
    xn = _layer_norm(x)
    # output_scale is folded into wdec at pack time; padded decoder columns are
    # zero and are sliced off in the wrapper (lane-dense (N, 128) store).
    o_ref[...] = jnp.dot(xn.astype(bf16), wdec_ref[...],
                         preferred_element_type=f32)


def fused_forward_call(diff, aenc, kp, *, nb_layers, num_heads, head_dim,
                       seq_len, out_pad):
    n = diff.shape[0]
    kernel = functools.partial(
        _fused_forward_kernel, nb_layers=nb_layers, num_heads=num_heads,
        head_dim=head_dim, seq_len=seq_len)
    # Gridless call: every operand is a full-array VMEM block; weights +
    # activations total < 1 MB, far under the scoped-VMEM limit on all chips.
    return pl.pallas_call(
        kernel,
        out_shape=jax.ShapeDtypeStruct((n, out_pad), jnp.float32),
    )(diff, aenc,
      kp["w2a"], kp["w2b"], kp["w3"],
      kp["wqkv"], kp["wo"], kp["wfc"], kp["wproj"], kp["wdec"])


# -------------------------------- parameters ----------------------------------

def init_params(key, cfg):
    d = cfg["embedding_dim"]
    a = cfg["attention_dim"]
    std = cfg["init_std"]
    nb_layers = cfg["nb_layers"]
    keys = jax.random.split(key, 8 + nb_layers)

    def nrm(k, shape, s=std):
        return jax.random.normal(k, shape, jnp.float32) * s

    encoder = {
        "w1": nrm(keys[0], (cfg["action_dim"], d)),
        "w2a": nrm(keys[1], (d, d)),   # linear_2 cols acting on diffusion emb
        "w2b": nrm(keys[2], (d, d)),   # linear_2 cols acting on action emb
        "w3": nrm(keys[3], (d, d)),
        "command_embedding": nrm(keys[4], (cfg["number_high_level_command"], d)),
        "action_positional_embedding": nrm(keys[5], (cfg["action_horizon"], d)),
    }
    depth_std = std * (2 * nb_layers) ** (-0.5)  # GPT-2 residual-proj scaling
    layers = []
    for li in range(nb_layers):
        lk = jax.random.split(keys[8 + li], 4)
        layers.append({
            "wqkv": nrm(lk[0], (d, 3 * a)),
            "wo": nrm(lk[1], (a, d), depth_std),
            "wfc": nrm(lk[2], (d, cfg["mlp_dim_mult"] * d)),
            "wproj": nrm(lk[3], (cfg["mlp_dim_mult"] * d, d), depth_std),
        })
    # Reference zero-inits MuReadout; use a small random init for a non-trivial demo.
    decoder = nrm(keys[6], (d, cfg["action_dim"]))
    return {"encoder": encoder, "layers": layers, "decoder": decoder}


def pack_params(params, cfg):
    """Stack layer weights, fold the sdpa scale into W_qkv's q columns, fold
    output_scale into the readout, pad the readout to 128 lanes, and cast
    matmul weights to bf16 (f32 accumulation)."""
    d = cfg["embedding_dim"]
    a_dim = cfg["attention_dim"]
    action_dim = cfg["action_dim"]
    scale = cfg["attn_scale"] / cfg["dim_heads"]
    enc = params["encoder"]
    bf = jnp.bfloat16

    wqkv = jnp.stack([lp["wqkv"] for lp in params["layers"]])      # (L, d, 3a)
    wqkv = wqkv.at[:, :, :a_dim].multiply(scale)                   # fold q scale
    wo = jnp.stack([lp["wo"] for lp in params["layers"]])          # (L, a, d)
    wfc = jnp.stack([lp["wfc"] for lp in params["layers"]])        # (L, d, m*d)
    wproj = jnp.stack([lp["wproj"] for lp in params["layers"]])    # (L, m*d, d)

    out_pad = max(128, ((action_dim + 127) // 128) * 128)
    wdec = jnp.zeros((d, out_pad), jnp.float32).at[:, :action_dim].set(
        params["decoder"] * cfg["output_scale"])                   # fold output_scale

    return {
        "w1": enc["w1"].astype(jnp.float32),        # folded into wrapper add_emb
        "w2a": enc["w2a"].astype(bf),
        "w2b": enc["w2b"].astype(bf),
        "w3": enc["w3"].astype(bf),
        "wqkv": wqkv.astype(bf),
        "wo": wo.astype(bf),
        "wfc": wfc.astype(bf),
        "wproj": wproj.astype(bf),
        "wdec": wdec.astype(bf),
        "command_embedding": enc["command_embedding"],
        "action_positional_embedding": enc["action_positional_embedding"],
    }


# ------------------------------- model forward --------------------------------

def sinusoidal_pos_emb(t, dim, max_period):
    half = dim // 2
    c = math.log(max_period) / (half - 1)
    freqs = jnp.exp(jnp.arange(half, dtype=jnp.float32) * -c)
    emb = t[:, None] * freqs[None, :]
    return jnp.concatenate([jnp.sin(emb), jnp.cos(emb)], axis=-1)


def mup_action_expert_forward(packed, noisy_actions, high_level_command, t, cfg):
    bs, ctx, horizon, action_dim = noisy_actions.shape
    d = cfg["embedding_dim"]

    # glue (plain JAX): embedding gathers, sinusoidal diffusion-step embedding,
    # and the tiny K=action_dim linear_1 matmul folded into the add_emb
    # assembly (fuses into the existing XLA elementwise op; drops two kernel
    # operands and their DMAs).
    command_emb = packed["command_embedding"][high_level_command]          # (B,T,D)
    pos_emb = packed["action_positional_embedding"]                        # (H,D)
    aenc = (noisy_actions @ packed["w1"]                                   # linear_1
            + command_emb[:, :, None, :] + pos_emb[None, None, :, :])      # (B,T,H,D)

    diff = sinusoidal_pos_emb(t.reshape(-1), d, cfg["max_period"])         # (B*T,D)
    diff = jnp.broadcast_to(diff.reshape(bs, ctx, 1, d), (bs, ctx, horizon, d))

    seq = ctx * horizon
    n = bs * seq
    num_heads = cfg["attention_dim"] // cfg["dim_heads"]
    out_pad = max(128, ((action_dim + 127) // 128) * 128)
    out = fused_forward_call(
        diff.reshape(n, d).astype(jnp.float32),
        aenc.reshape(n, d).astype(jnp.float32),
        packed,
        nb_layers=cfg["nb_layers"], num_heads=num_heads,
        head_dim=cfg["dim_heads"], seq_len=seq, out_pad=out_pad)
    return out[:, :action_dim].reshape(bs, ctx, horizon, action_dim)


# ------------------------------ pure-JAX reference -----------------------------

def reference_forward(params, noisy_actions, high_level_command, t, cfg):
    bs, ctx, horizon, action_dim = noisy_actions.shape
    d = cfg["embedding_dim"]
    enc = params["encoder"]
    command_emb = enc["command_embedding"][high_level_command]
    add_emb = (command_emb[:, :, None, :]
               + enc["action_positional_embedding"][None, None, :, :])
    diff = sinusoidal_pos_emb(t.reshape(-1), d, cfg["max_period"])
    diff = jnp.broadcast_to(diff.reshape(bs, ctx, 1, d), (bs, ctx, horizon, d))

    a = noisy_actions @ enc["w1"] + add_emb
    h = diff @ enc["w2a"] + a @ enc["w2b"]
    h = h * jax.nn.sigmoid(h)
    x = (h @ enc["w3"]).reshape(bs, ctx * horizon, d)

    nh = cfg["attention_dim"] // cfg["dim_heads"]
    dh = cfg["dim_heads"]
    a_dim = nh * dh

    def ln(v):
        mu = v.mean(-1, keepdims=True)
        var = ((v - mu) ** 2).mean(-1, keepdims=True)
        return (v - mu) * jax.lax.rsqrt(var + LN_EPS)

    for lp in params["layers"]:
        xn = ln(x)
        qkv = xn @ lp["wqkv"]
        q = qkv[..., :a_dim].reshape(bs, -1, nh, dh)
        k = qkv[..., a_dim:2 * a_dim].reshape(bs, -1, nh, dh)
        v = qkv[..., 2 * a_dim:].reshape(bs, -1, nh, dh)
        sc = jnp.einsum("bqhd,bkhd->bhqk", q, k) * (cfg["attn_scale"] / dh)
        p = jax.nn.softmax(sc, axis=-1)
        y = jnp.einsum("bhqk,bkhd->bqhd", p, v).reshape(bs, -1, a_dim)
        x = x + y @ lp["wo"]
        # torch nn.GELU() default = exact erf GELU
        x = x + jax.nn.gelu(ln(x) @ lp["wfc"], approximate=False) @ lp["wproj"]

    out = cfg["output_scale"] * (ln(x) @ params["decoder"])
    return out.reshape(bs, ctx, horizon, action_dim)


# ----------------------------------- main -------------------------------------

if __name__ == "__main__":
    cfg = dict(
        embedding_dim=128, attention_dim=128, dim_heads=64, nb_layers=2,
        mlp_dim_mult=4, action_dim=2, action_horizon=6,
        number_high_level_command=3, max_period=10000.0,
        init_std=0.02, attn_scale=1.0, output_scale=1.0,
    )
    bs, ctx = 2, 2

    key = jax.random.PRNGKey(0)
    kp, ka, kc, kt = jax.random.split(key, 4)
    params = init_params(kp, cfg)
    packed = pack_params(params, cfg)

    noisy_actions = jax.random.normal(
        ka, (bs, ctx, cfg["action_horizon"], cfg["action_dim"]), jnp.float32)
    high_level_command = jax.random.randint(
        kc, (bs, ctx), 0, cfg["number_high_level_command"])
    t = jax.random.uniform(kt, (bs, ctx), jnp.float32, 0.0, 1000.0)

    out = mup_action_expert_forward(packed, noisy_actions, high_level_command, t, cfg)
    out = jax.block_until_ready(out)

    ref = reference_forward(params, noisy_actions, high_level_command, t, cfg)
    assert out.shape == (bs, ctx, cfg["action_horizon"], cfg["action_dim"])
    abs_err = float(jnp.max(jnp.abs(out - ref)))
    rel_err = float(jnp.linalg.norm((out - ref).ravel())
                    / (jnp.linalg.norm(ref.ravel()) + 1e-12))
    assert abs_err < 5e-2 and rel_err < 5e-2, (abs_err, rel_err)

    print("KERNEL_OK")
</pallas_src>

<mosaic_0001>
module attributes {stable_mosaic.version = 11 : i64} {
  func.func @_fused_forward_kernel(%arg0: memref<24x128xf32, #tpu.memory_space<vmem>>, %arg1: memref<24x128xf32, #tpu.memory_space<vmem>>, %arg2: memref<128x128xbf16, #tpu.memory_space<vmem>>, %arg3: memref<128x128xbf16, #tpu.memory_space<vmem>>, %arg4: memref<128x128xbf16, #tpu.memory_space<vmem>>, %arg5: memref<2x128x384xbf16, #tpu.memory_space<vmem>>, %arg6: memref<2x128x128xbf16, #tpu.memory_space<vmem>>, %arg7: memref<2x128x512xbf16, #tpu.memory_space<vmem>>, %arg8: memref<2x512x128xbf16, #tpu.memory_space<vmem>>, %arg9: memref<128x128xbf16, #tpu.memory_space<vmem>>, %arg10: memref<24x128xf32, #tpu.memory_space<vmem>>) attributes {dimension_semantics = [], scalar_prefetch = 0 : i64, scratch_operands = 0 : i64, tpu.core_type = #tpu.core_type<tc>} {
    %0 = tpu.iota {dimensions = array<i32: 0>} : vector<24x24xi32>
    %1 = arith.sitofp %0 : vector<24x24xi32> to vector<24x24xf32>
    %2 = tpu.iota {dimensions = array<i32: 1>} : vector<24x24xi32>
    %3 = arith.sitofp %2 : vector<24x24xi32> to vector<24x24xf32>
    %cst = arith.constant 5.000000e-01 : f32
    %4 = vector.broadcast %cst : f32 to vector<24x24xf32>
    %5 = arith.addf %1, %4 : vector<24x24xf32>
    %cst_0 = arith.constant 0.0833333358 : f32
    %6 = vector.broadcast %cst_0 : f32 to vector<24x24xf32>
    %7 = arith.mulf %5, %6 : vector<24x24xf32>
    %8 = math.floor %7 : vector<24x24xf32>
    %cst_1 = arith.constant 5.000000e-01 : f32
    %9 = vector.broadcast %cst_1 : f32 to vector<24x24xf32>
    %10 = arith.addf %3, %9 : vector<24x24xf32>
    %cst_2 = arith.constant 0.0833333358 : f32
    %11 = vector.broadcast %cst_2 : f32 to vector<24x24xf32>
    %12 = arith.mulf %10, %11 : vector<24x24xf32>
    %13 = math.floor %12 : vector<24x24xf32>
    %14 = arith.cmpf oeq, %8, %13 : vector<24x24xf32>
    %cst_3 = arith.constant 0.000000e+00 : f32
    %cst_4 = arith.constant -1.000000e+30 : f32
    %15 = vector.broadcast %cst_3 : f32 to vector<24x24xf32>
    %16 = vector.broadcast %cst_4 : f32 to vector<24x24xf32>
    %17 = arith.select %14, %15, %16 : vector<24x24xi1>, vector<24x24xf32>
    %c0 = arith.constant 0 : index
    %c0_5 = arith.constant 0 : index
    %18 = vector.load %arg0[%c0, %c0_5] : memref<24x128xf32, #tpu.memory_space<vmem>>, vector<24x128xf32>
    %19 = arith.truncf %18 : vector<24x128xf32> to vector<24x128xbf16>
    %c0_6 = arith.constant 0 : index
    %c0_7 = arith.constant 0 : index
    %20 = vector.load %arg2[%c0_6, %c0_7] : memref<128x128xbf16, #tpu.memory_space<vmem>>, vector<128x128xbf16>
    %cst_8 = arith.constant dense<0.000000e+00> : vector<24x128xf32>
    %21 = tpu.matmul %19, %20, %cst_8 {dimension_numbers = #tpu.dot_dimension_numbers<[1], [0], [0], [1], [0, 0, 1, 1], [], []>} : vector<24x128xbf16>, vector<128x128xbf16>, vector<24x128xf32> -> vector<24x128xf32>
    %c0_9 = arith.constant 0 : index
    %c0_10 = arith.constant 0 : index
    %22 = vector.load %arg1[%c0_9, %c0_10] : memref<24x128xf32, #tpu.memory_space<vmem>>, vector<24x128xf32>
    %23 = arith.truncf %22 : vector<24x128xf32> to vector<24x128xbf16>
    %c0_11 = arith.constant 0 : index
    %c0_12 = arith.constant 0 : index
    %24 = vector.load %arg3[%c0_11, %c0_12] : memref<128x128xbf16, #tpu.memory_space<vmem>>, vector<128x128xbf16>
    %cst_13 = arith.constant dense<0.000000e+00> : vector<24x128xf32>
    %25 = tpu.matmul %23, %24, %cst_13 {dimension_numbers = #tpu.dot_dimension_numbers<[1], [0], [0], [1], [0, 0, 1, 1], [], []>} : vector<24x128xbf16>, vector<128x128xbf16>, vector<24x128xf32> -> vector<24x128xf32>
    %26 = arith.addf %21, %25 : vector<24x128xf32>
    %27 = arith.negf %26 : vector<24x128xf32>
    %28 = math.exp %27 : vector<24x128xf32>
    %cst_14 = arith.constant 1.000000e+00 : f32
    %29 = vector.broadcast %cst_14 : f32 to vector<24x128xf32>
    %30 = arith.addf %29, %28 : vector<24x128xf32>
    %31 = arith.divf %29, %30 : vector<24x128xf32>
    %32 = arith.mulf %26, %31 : vector<24x128xf32>
    %33 = arith.truncf %32 : vector<24x128xf32> to vector<24x128xbf16>
    %c0_15 = arith.constant 0 : index
    %c0_16 = arith.constant 0 : index
    %34 = vector.load %arg4[%c0_15, %c0_16] : memref<128x128xbf16, #tpu.memory_space<vmem>>, vector<128x128xbf16>
    %cst_17 = arith.constant dense<0.000000e+00> : vector<24x128xf32>
    %35 = tpu.matmul %33, %34, %cst_17 {dimension_numbers = #tpu.dot_dimension_numbers<[1], [0], [0], [1], [0, 0, 1, 1], [], []>} : vector<24x128xbf16>, vector<128x128xbf16>, vector<24x128xf32> -> vector<24x128xf32>
    %cst_18 = arith.constant dense<0.000000e+00> : vector<24xf32>
    %36 = vector.multi_reduction <add>, %35, %cst_18 [1] : vector<24x128xf32> to vector<24xf32>
    %37 = vector.shape_cast %36 : vector<24xf32> to vector<24x1xf32>
    %cst_19 = arith.constant 1.280000e+02 : f32
    %38 = vector.broadcast %cst_19 : f32 to vector<24x1xf32>
    %39 = arith.divf %37, %38 : vector<24x1xf32>
    %40 = vector.broadcast %39 : vector<24x1xf32> to vector<24x128xf32>
    %41 = arith.subf %35, %40 : vector<24x128xf32>
    %42 = arith.mulf %41, %41 : vector<24x128xf32>
    %cst_20 = arith.constant dense<0.000000e+00> : vector<24xf32>
    %43 = vector.multi_reduction <add>, %42, %cst_20 [1] : vector<24x128xf32> to vector<24xf32>
    %44 = vector.shape_cast %43 : vector<24xf32> to vector<24x1xf32>
    %cst_21 = arith.constant 1.280000e+02 : f32
    %45 = vector.broadcast %cst_21 : f32 to vector<24x1xf32>
    %46 = arith.divf %44, %45 : vector<24x1xf32>
    %47 = vector.broadcast %39 : vector<24x1xf32> to vector<24x128xf32>
    %48 = arith.subf %35, %47 : vector<24x128xf32>
    %cst_22 = arith.constant 9.99999974E-6 : f32
    %49 = vector.broadcast %cst_22 : f32 to vector<24x1xf32>
    %50 = arith.addf %46, %49 : vector<24x1xf32>
    %51 = math.rsqrt %50 : vector<24x1xf32>
    %52 = vector.broadcast %51 : vector<24x1xf32> to vector<24x128xf32>
    %53 = arith.mulf %48, %52 : vector<24x128xf32>
    %54 = arith.truncf %53 : vector<24x128xf32> to vector<24x128xbf16>
    %c0_23 = arith.constant 0 : index
    %c0_24 = arith.constant 0 : index
    %c0_25 = arith.constant 0 : index
    %55 = vector.load %arg5[%c0_23, %c0_24, %c0_25] : memref<2x128x384xbf16, #tpu.memory_space<vmem>>, vector<1x128x384xbf16>
    %56 = vector.shape_cast %55 : vector<1x128x384xbf16> to vector<128x384xbf16>
    %cst_26 = arith.constant dense<0.000000e+00> : vector<24x384xf32>
    %57 = tpu.matmul %54, %56, %cst_26 {dimension_numbers = #tpu.dot_dimension_numbers<[1], [0], [0], [1], [0, 0, 1, 1], [], []>} : vector<24x128xbf16>, vector<128x384xbf16>, vector<24x384xf32> -> vector<24x384xf32>
    %c0_27 = arith.constant 0 : index
    %c0_28 = arith.constant 0 : index
    %c0_29 = arith.constant 0 : index
    %58 = vector.load %arg6[%c0_27, %c0_28, %c0_29] : memref<2x128x128xbf16, #tpu.memory_space<vmem>>, vector<1x128x128xbf16>
    %59 = vector.shape_cast %58 : vector<1x128x128xbf16> to vector<128x128xbf16>
    %cst_30 = arith.constant 0.000000e+00 : f32
    %60 = vector.broadcast %cst_30 : f32 to vector<24x128xf32>
    %61 = vector.extract_strided_slice %57 {offsets = [0, 0], sizes = [24, 64], strides = [1, 1]} : vector<24x384xf32> to vector<24x64xf32>
    %62 = vector.extract_strided_slice %57 {offsets = [0, 128], sizes = [24, 64], strides = [1, 1]} : vector<24x384xf32> to vector<24x64xf32>
    %63 = vector.extract_strided_slice %57 {offsets = [0, 256], sizes = [24, 64], strides = [1, 1]} : vector<24x384xf32> to vector<24x64xf32>
    %cst_31 = arith.constant dense<0.000000e+00> : vector<24x24xf32>
    %64 = tpu.matmul %61, %62, %cst_31 {dimension_numbers = #tpu.dot_dimension_numbers<[1], [1], [0], [0], [0, 0, 1, 0], [], []>} : vector<24x64xf32>, vector<24x64xf32>, vector<24x24xf32> -> vector<24x24xf32>
    %65 = arith.addf %64, %17 : vector<24x24xf32>
    %cst_32 = arith.constant dense<0xFF800000> : vector<24xf32>
    %66 = vector.multi_reduction <maximumf>, %65, %cst_32 [1] : vector<24x24xf32> to vector<24xf32>
    %67 = vector.shape_cast %66 : vector<24xf32> to vector<24x1xf32>
    %68 = vector.broadcast %67 : vector<24x1xf32> to vector<24x24xf32>
    %69 = arith.subf %65, %68 : vector<24x24xf32>
    %70 = math.exp %69 : vector<24x24xf32>
    %cst_33 = arith.constant dense<0.000000e+00> : vector<24xf32>
    %71 = vector.multi_reduction <add>, %70, %cst_33 [1] : vector<24x24xf32> to vector<24xf32>
    %72 = vector.shape_cast %71 : vector<24xf32> to vector<24x1xf32>
    %73 = tpu.reciprocal %72 {approx = true} : vector<24x1xf32> -> vector<24x1xf32>
    %74 = vector.broadcast %73 : vector<24x1xf32> to vector<24x24xf32>
    %75 = arith.mulf %70, %74 : vector<24x24xf32>
    %cst_34 = arith.constant dense<0.000000e+00> : vector<24x64xf32>
    %76 = tpu.matmul %75, %63, %cst_34 {dimension_numbers = #tpu.dot_dimension_numbers<[1], [0], [0], [1], [0, 0, 1, 1], [], []>} : vector<24x24xf32>, vector<24x64xf32>, vector<24x64xf32> -> vector<24x64xf32>
    %77 = arith.truncf %76 : vector<24x64xf32> to vector<24x64xbf16>
    %78 = vector.extract_strided_slice %59 {offsets = [0, 0], sizes = [64, 128], strides = [1, 1]} : vector<128x128xbf16> to vector<64x128xbf16>
    %cst_35 = arith.constant dense<0.000000e+00> : vector<24x128xf32>
    %79 = tpu.matmul %77, %78, %cst_35 {dimension_numbers = #tpu.dot_dimension_numbers<[1], [0], [0], [1], [0, 0, 1, 1], [], []>} : vector<24x64xbf16>, vector<64x128xbf16>, vector<24x128xf32> -> vector<24x128xf32>
    %80 = arith.addf %60, %79 : vector<24x128xf32>
    %81 = vector.extract_strided_slice %57 {offsets = [0, 64], sizes = [24, 64], strides = [1, 1]} : vector<24x384xf32> to vector<24x64xf32>
    %82 = vector.extract_strided_slice %57 {offsets = [0, 192], sizes = [24, 64], strides = [1, 1]} : vector<24x384xf32> to vector<24x64xf32>
    %83 = vector.extract_strided_slice %57 {offsets = [0, 320], sizes = [24, 64], strides = [1, 1]} : vector<24x384xf32> to vector<24x64xf32>
    %cst_36 = arith.constant dense<0.000000e+00> : vector<24x24xf32>
    %84 = tpu.matmul %81, %82, %cst_36 {dimension_numbers = #tpu.dot_dimension_numbers<[1], [1], [0], [0], [0, 0, 1, 0], [], []>} : vector<24x64xf32>, vector<24x64xf32>, vector<24x24xf32> -> vector<24x24xf32>
    %85 = arith.addf %84, %17 : vector<24x24xf32>
    %cst_37 = arith.constant dense<0xFF800000> : vector<24xf32>
    %86 = vector.multi_reduction <maximumf>, %85, %cst_37 [1] : vector<24x24xf32> to vector<24xf32>
    %87 = vector.shape_cast %86 : vector<24xf32> to vector<24x1xf32>
    %88 = vector.broadcast %87 : vector<24x1xf32> to vector<24x24xf32>
    %89 = arith.subf %85, %88 : vector<24x24xf32>
    %90 = math.exp %89 : vector<24x24xf32>
    %cst_38 = arith.constant dense<0.000000e+00> : vector<24xf32>
    %91 = vector.multi_reduction <add>, %90, %cst_38 [1] : vector<24x24xf32> to vector<24xf32>
    %92 = vector.shape_cast %91 : vector<24xf32> to vector<24x1xf32>
    %93 = tpu.reciprocal %92 {approx = true} : vector<24x1xf32> -> vector<24x1xf32>
    %94 = vector.broadcast %93 : vector<24x1xf32> to vector<24x24xf32>
    %95 = arith.mulf %90, %94 : vector<24x24xf32>
    %cst_39 = arith.constant dense<0.000000e+00> : vector<24x64xf32>
    %96 = tpu.matmul %95, %83, %cst_39 {dimension_numbers = #tpu.dot_dimension_numbers<[1], [0], [0], [1], [0, 0, 1, 1], [], []>} : vector<24x24xf32>, vector<24x64xf32>, vector<24x64xf32> -> vector<24x64xf32>
    %97 = arith.truncf %96 : vector<24x64xf32> to vector<24x64xbf16>
    %98 = vector.extract_strided_slice %59 {offsets = [64, 0], sizes = [64, 128], strides = [1, 1]} : vector<128x128xbf16> to vector<64x128xbf16>
    %cst_40 = arith.constant dense<0.000000e+00> : vector<24x128xf32>
    %99 = tpu.matmul %97, %98, %cst_40 {dimension_numbers = #tpu.dot_dimension_numbers<[1], [0], [0], [1], [0, 0, 1, 1], [], []>} : vector<24x64xbf16>, vector<64x128xbf16>, vector<24x128xf32> -> vector<24x128xf32>
    %100 = arith.addf %80, %99 : vector<24x128xf32>
    %101 = arith.addf %35, %100 : vector<24x128xf32>
    %cst_41 = arith.constant dense<0.000000e+00> : vector<24xf32>
    %102 = vector.multi_reduction <add>, %101, %cst_41 [1] : vector<24x128xf32> to vector<24xf32>
    %103 = vector.shape_cast %102 : vector<24xf32> to vector<24x1xf32>
    %cst_42 = arith.constant 1.280000e+02 : f32
    %104 = vector.broadcast %cst_42 : f32 to vector<24x1xf32>
    %105 = arith.divf %103, %104 : vector<24x1xf32>
    %106 = vector.broadcast %105 : vector<24x1xf32> to vector<24x128xf32>
    %107 = arith.subf %101, %106 : vector<24x128xf32>
    %108 = arith.mulf %107, %107 : vector<24x128xf32>
    %cst_43 = arith.constant dense<0.000000e+00> : vector<24xf32>
    %109 = vector.multi_reduction <add>, %108, %cst_43 [1] : vector<24x128xf32> to vector<24xf32>
    %110 = vector.shape_cast %109 : vector<24xf32> to vector<24x1xf32>
    %cst_44 = arith.constant 1.280000e+02 : f32
    %111 = vector.broadcast %cst_44 : f32 to vector<24x1xf32>
    %112 = arith.divf %110, %111 : vector<24x1xf32>
    %113 = vector.broadcast %105 : vector<24x1xf32> to vector<24x128xf32>
    %114 = arith.subf %101, %113 : vector<24x128xf32>
    %cst_45 = arith.constant 9.99999974E-6 : f32
    %115 = vector.broadcast %cst_45 : f32 to vector<24x1xf32>
    %116 = arith.addf %112, %115 : vector<24x1xf32>
    %117 = math.rsqrt %116 : vector<24x1xf32>
    %118 = vector.broadcast %117 : vector<24x1xf32> to vector<24x128xf32>
    %119 = arith.mulf %114, %118 : vector<24x128xf32>
    %120 = arith.truncf %119 : vector<24x128xf32> to vector<24x128xbf16>
    %c0_46 = arith.constant 0 : index
    %c0_47 = arith.constant 0 : index
    %c0_48 = arith.constant 0 : index
    %121 = vector.load %arg7[%c0_46, %c0_47, %c0_48] : memref<2x128x512xbf16, #tpu.memory_space<vmem>>, vector<1x128x512xbf16>
    %122 = vector.shape_cast %121 : vector<1x128x512xbf16> to vector<128x512xbf16>
    %cst_49 = arith.constant dense<0.000000e+00> : vector<24x512xf32>
    %123 = tpu.matmul %120, %122, %cst_49 {dimension_numbers = #tpu.dot_dimension_numbers<[1], [0], [0], [1], [0, 0, 1, 1], [], []>} : vector<24x128xbf16>, vector<128x512xbf16>, vector<24x512xf32> -> vector<24x512xf32>
    %124 = arith.mulf %123, %123 : vector<24x512xf32>
    %125 = arith.mulf %123, %124 : vector<24x512xf32>
    %cst_50 = arith.constant 4.471500e-02 : f32
    %126 = vector.broadcast %cst_50 : f32 to vector<24x512xf32>
    %127 = arith.mulf %126, %125 : vector<24x512xf32>
    %128 = arith.addf %123, %127 : vector<24x512xf32>
    %cst_51 = arith.constant 0.797884583 : f32
    %129 = vector.broadcast %cst_51 : f32 to vector<24x512xf32>
    %130 = arith.mulf %129, %128 : vector<24x512xf32>
    %131 = math.tanh %130 : vector<24x512xf32>
    %cst_52 = arith.constant 1.000000e+00 : f32
    %132 = vector.broadcast %cst_52 : f32 to vector<24x512xf32>
    %133 = arith.addf %132, %131 : vector<24x512xf32>
    %cst_53 = arith.constant 5.000000e-01 : f32
    %134 = vector.broadcast %cst_53 : f32 to vector<24x512xf32>
    %135 = arith.mulf %134, %133 : vector<24x512xf32>
    %136 = arith.mulf %123, %135 : vector<24x512xf32>
    %137 = arith.truncf %136 : vector<24x512xf32> to vector<24x512xbf16>
    %c0_54 = arith.constant 0 : index
    %c0_55 = arith.constant 0 : index
    %c0_56 = arith.constant 0 : index
    %138 = vector.load %arg8[%c0_54, %c0_55, %c0_56] : memref<2x512x128xbf16, #tpu.memory_space<vmem>>, vector<1x512x128xbf16>
    %139 = vector.shape_cast %138 : vector<1x512x128xbf16> to vector<512x128xbf16>
    %cst_57 = arith.constant dense<0.000000e+00> : vector<24x128xf32>
    %140 = tpu.matmul %137, %139, %cst_57 {dimension_numbers = #tpu.dot_dimension_numbers<[1], [0], [0], [1], [0, 0, 1, 1], [], []>} : vector<24x512xbf16>, vector<512x128xbf16>, vector<24x128xf32> -> vector<24x128xf32>
    %141 = arith.addf %101, %140 : vector<24x128xf32>
    %cst_58 = arith.constant dense<0.000000e+00> : vector<24xf32>
    %142 = vector.multi_reduction <add>, %141, %cst_58 [1] : vector<24x128xf32> to vector<24xf32>
    %143 = vector.shape_cast %142 : vector<24xf32> to vector<24x1xf32>
    %cst_59 = arith.constant 1.280000e+02 : f32
    %144 = vector.broadcast %cst_59 : f32 to vector<24x1xf32>
    %145 = arith.divf %143, %144 : vector<24x1xf32>
    %146 = vector.broadcast %145 : vector<24x1xf32> to vector<24x128xf32>
    %147 = arith.subf %141, %146 : vector<24x128xf32>
    %148 = arith.mulf %147, %147 : vector<24x128xf32>
    %cst_60 = arith.constant dense<0.000000e+00> : vector<24xf32>
    %149 = vector.multi_reduction <add>, %148, %cst_60 [1] : vector<24x128xf32> to vector<24xf32>
    %150 = vector.shape_cast %149 : vector<24xf32> to vector<24x1xf32>
    %cst_61 = arith.constant 1.280000e+02 : f32
    %151 = vector.broadcast %cst_61 : f32 to vector<24x1xf32>
    %152 = arith.divf %150, %151 : vector<24x1xf32>
    %153 = vector.broadcast %145 : vector<24x1xf32> to vector<24x128xf32>
    %154 = arith.subf %141, %153 : vector<24x128xf32>
    %cst_62 = arith.constant 9.99999974E-6 : f32
    %155 = vector.broadcast %cst_62 : f32 to vector<24x1xf32>
    %156 = arith.addf %152, %155 : vector<24x1xf32>
    %157 = math.rsqrt %156 : vector<24x1xf32>
    %158 = vector.broadcast %157 : vector<24x1xf32> to vector<24x128xf32>
    %159 = arith.mulf %154, %158 : vector<24x128xf32>
    %160 = arith.truncf %159 : vector<24x128xf32> to vector<24x128xbf16>
    %c1 = arith.constant 1 : index
    %c0_63 = arith.constant 0 : index
    %c0_64 = arith.constant 0 : index
    %161 = vector.load %arg5[%c1, %c0_63, %c0_64] : memref<2x128x384xbf16, #tpu.memory_space<vmem>>, vector<1x128x384xbf16>
    %162 = vector.shape_cast %161 : vector<1x128x384xbf16> to vector<128x384xbf16>
    %cst_65 = arith.constant dense<0.000000e+00> : vector<24x384xf32>
    %163 = tpu.matmul %160, %162, %cst_65 {dimension_numbers = #tpu.dot_dimension_numbers<[1], [0], [0], [1], [0, 0, 1, 1], [], []>} : vector<24x128xbf16>, vector<128x384xbf16>, vector<24x384xf32> -> vector<24x384xf32>
    %c1_66 = arith.constant 1 : index
    %c0_67 = arith.constant 0 : index
    %c0_68 = arith.constant 0 : index
    %164 = vector.load %arg6[%c1_66, %c0_67, %c0_68] : memref<2x128x128xbf16, #tpu.memory_space<vmem>>, vector<1x128x128xbf16>
    %165 = vector.shape_cast %164 : vector<1x128x128xbf16> to vector<128x128xbf16>
    %cst_69 = arith.constant 0.000000e+00 : f32
    %166 = vector.broadcast %cst_69 : f32 to vector<24x128xf32>
    %167 = vector.extract_strided_slice %163 {offsets = [0, 0], sizes = [24, 64], strides = [1, 1]} : vector<24x384xf32> to vector<24x64xf32>
    %168 = vector.extract_strided_slice %163 {offsets = [0, 128], sizes = [24, 64], strides = [1, 1]} : vector<24x384xf32> to vector<24x64xf32>
    %169 = vector.extract_strided_slice %163 {offsets = [0, 256], sizes = [24, 64], strides = [1, 1]} : vector<24x384xf32> to vector<24x64xf32>
    %cst_70 = arith.constant dense<0.000000e+00> : vector<24x24xf32>
    %170 = tpu.matmul %167, %168, %cst_70 {dimension_numbers = #tpu.dot_dimension_numbers<[1], [1], [0], [0], [0, 0, 1, 0], [], []>} : vector<24x64xf32>, vector<24x64xf32>, vector<24x24xf32> -> vector<24x24xf32>
    %171 = arith.addf %170, %17 : vector<24x24xf32>
    %cst_71 = arith.constant dense<0xFF800000> : vector<24xf32>
    %172 = vector.multi_reduction <maximumf>, %171, %cst_71 [1] : vector<24x24xf32> to vector<24xf32>
    %173 = vector.shape_cast %172 : vector<24xf32> to vector<24x1xf32>
    %174 = vector.broadcast %173 : vector<24x1xf32> to vector<24x24xf32>
    %175 = arith.subf %171, %174 : vector<24x24xf32>
    %176 = math.exp %175 : vector<24x24xf32>
    %cst_72 = arith.constant dense<0.000000e+00> : vector<24xf32>
    %177 = vector.multi_reduction <add>, %176, %cst_72 [1] : vector<24x24xf32> to vector<24xf32>
    %178 = vector.shape_cast %177 : vector<24xf32> to vector<24x1xf32>
    %179 = tpu.reciprocal %178 {approx = true} : vector<24x1xf32> -> vector<24x1xf32>
    %180 = vector.broadcast %179 : vector<24x1xf32> to vector<24x24xf32>
    %181 = arith.mulf %176, %180 : vector<24x24xf32>
    %cst_73 = arith.constant dense<0.000000e+00> : vector<24x64xf32>
    %182 = tpu.matmul %181, %169, %cst_73 {dimension_numbers = #tpu.dot_dimension_numbers<[1], [0], [0], [1], [0, 0, 1, 1], [], []>} : vector<24x24xf32>, vector<24x64xf32>, vector<24x64xf32> -> vector<24x64xf32>
    %183 = arith.truncf %182 : vector<24x64xf32> to vector<24x64xbf16>
    %184 = vector.extract_strided_slice %165 {offsets = [0, 0], sizes = [64, 128], strides = [1, 1]} : vector<128x128xbf16> to vector<64x128xbf16>
    %cst_74 = arith.constant dense<0.000000e+00> : vector<24x128xf32>
    %185 = tpu.matmul %183, %184, %cst_74 {dimension_numbers = #tpu.dot_dimension_numbers<[1], [0], [0], [1], [0, 0, 1, 1], [], []>} : vector<24x64xbf16>, vector<64x128xbf16>, vector<24x128xf32> -> vector<24x128xf32>
    %186 = arith.addf %166, %185 : vector<24x128xf32>
    %187 = vector.extract_strided_slice %163 {offsets = [0, 64], sizes = [24, 64], strides = [1, 1]} : vector<24x384xf32> to vector<24x64xf32>
    %188 = vector.extract_strided_slice %163 {offsets = [0, 192], sizes = [24, 64], strides = [1, 1]} : vector<24x384xf32> to vector<24x64xf32>
    %189 = vector.extract_strided_slice %163 {offsets = [0, 320], sizes = [24, 64], strides = [1, 1]} : vector<24x384xf32> to vector<24x64xf32>
    %cst_75 = arith.constant dense<0.000000e+00> : vector<24x24xf32>
    %190 = tpu.matmul %187, %188, %cst_75 {dimension_numbers = #tpu.dot_dimension_numbers<[1], [1], [0], [0], [0, 0, 1, 0], [], []>} : vector<24x64xf32>, vector<24x64xf32>, vector<24x24xf32> -> vector<24x24xf32>
    %191 = arith.addf %190, %17 : vector<24x24xf32>
    %cst_76 = arith.constant dense<0xFF800000> : vector<24xf32>
    %192 = vector.multi_reduction <maximumf>, %191, %cst_76 [1] : vector<24x24xf32> to vector<24xf32>
    %193 = vector.shape_cast %192 : vector<24xf32> to vector<24x1xf32>
    %194 = vector.broadcast %193 : vector<24x1xf32> to vector<24x24xf32>
    %195 = arith.subf %191, %194 : vector<24x24xf32>
    %196 = math.exp %195 : vector<24x24xf32>
    %cst_77 = arith.constant dense<0.000000e+00> : vector<24xf32>
    %197 = vector.multi_reduction <add>, %196, %cst_77 [1] : vector<24x24xf32> to vector<24xf32>
    %198 = vector.shape_cast %197 : vector<24xf32> to vector<24x1xf32>
    %199 = tpu.reciprocal %198 {approx = true} : vector<24x1xf32> -> vector<24x1xf32>
    %200 = vector.broadcast %199 : vector<24x1xf32> to vector<24x24xf32>
    %201 = arith.mulf %196, %200 : vector<24x24xf32>
    %cst_78 = arith.constant dense<0.000000e+00> : vector<24x64xf32>
    %202 = tpu.matmul %201, %189, %cst_78 {dimension_numbers = #tpu.dot_dimension_numbers<[1], [0], [0], [1], [0, 0, 1, 1], [], []>} : vector<24x24xf32>, vector<24x64xf32>, vector<24x64xf32> -> vector<24x64xf32>
    %203 = arith.truncf %202 : vector<24x64xf32> to vector<24x64xbf16>
    %204 = vector.extract_strided_slice %165 {offsets = [64, 0], sizes = [64, 128], strides = [1, 1]} : vector<128x128xbf16> to vector<64x128xbf16>
    %cst_79 = arith.constant dense<0.000000e+00> : vector<24x128xf32>
    %205 = tpu.matmul %203, %204, %cst_79 {dimension_numbers = #tpu.dot_dimension_numbers<[1], [0], [0], [1], [0, 0, 1, 1], [], []>} : vector<24x64xbf16>, vector<64x128xbf16>, vector<24x128xf32> -> vector<24x128xf32>
    %206 = arith.addf %186, %205 : vector<24x128xf32>
    %207 = arith.addf %141, %206 : vector<24x128xf32>
    %cst_80 = arith.constant dense<0.000000e+00> : vector<24xf32>
    %208 = vector.multi_reduction <add>, %207, %cst_80 [1] : vector<24x128xf32> to vector<24xf32>
    %209 = vector.shape_cast %208 : vector<24xf32> to vector<24x1xf32>
    %cst_81 = arith.constant 1.280000e+02 : f32
    %210 = vector.broadcast %cst_81 : f32 to vector<24x1xf32>
    %211 = arith.divf %209, %210 : vector<24x1xf32>
    %212 = vector.broadcast %211 : vector<24x1xf32> to vector<24x128xf32>
    %213 = arith.subf %207, %212 : vector<24x128xf32>
    %214 = arith.mulf %213, %213 : vector<24x128xf32>
    %cst_82 = arith.constant dense<0.000000e+00> : vector<24xf32>
    %215 = vector.multi_reduction <add>, %214, %cst_82 [1] : vector<24x128xf32> to vector<24xf32>
    %216 = vector.shape_cast %215 : vector<24xf32> to vector<24x1xf32>
    %cst_83 = arith.constant 1.280000e+02 : f32
    %217 = vector.broadcast %cst_83 : f32 to vector<24x1xf32>
    %218 = arith.divf %216, %217 : vector<24x1xf32>
    %219 = vector.broadcast %211 : vector<24x1xf32> to vector<24x128xf32>
    %220 = arith.subf %207, %219 : vector<24x128xf32>
    %cst_84 = arith.constant 9.99999974E-6 : f32
    %221 = vector.broadcast %cst_84 : f32 to vector<24x1xf32>
    %222 = arith.addf %218, %221 : vector<24x1xf32>
    %223 = math.rsqrt %222 : vector<24x1xf32>
    %224 = vector.broadcast %223 : vector<24x1xf32> to vector<24x128xf32>
    %225 = arith.mulf %220, %224 : vector<24x128xf32>
    %226 = arith.truncf %225 : vector<24x128xf32> to vector<24x128xbf16>
    %c1_85 = arith.constant 1 : index
    %c0_86 = arith.constant 0 : index
    %c0_87 = arith.constant 0 : index
    %227 = vector.load %arg7[%c1_85, %c0_86, %c0_87] : memref<2x128x512xbf16, #tpu.memory_space<vmem>>, vector<1x128x512xbf16>
    %228 = vector.shape_cast %227 : vector<1x128x512xbf16> to vector<128x512xbf16>
    %cst_88 = arith.constant dense<0.000000e+00> : vector<24x512xf32>
    %229 = tpu.matmul %226, %228, %cst_88 {dimension_numbers = #tpu.dot_dimension_numbers<[1], [0], [0], [1], [0, 0, 1, 1], [], []>} : vector<24x128xbf16>, vector<128x512xbf16>, vector<24x512xf32> -> vector<24x512xf32>
    %230 = arith.mulf %229, %229 : vector<24x512xf32>
    %231 = arith.mulf %229, %230 : vector<24x512xf32>
    %cst_89 = arith.constant 4.471500e-02 : f32
    %232 = vector.broadcast %cst_89 : f32 to vector<24x512xf32>
    %233 = arith.mulf %232, %231 : vector<24x512xf32>
    %234 = arith.addf %229, %233 : vector<24x512xf32>
    %cst_90 = arith.constant 0.797884583 : f32
    %235 = vector.broadcast %cst_90 : f32 to vector<24x512xf32>
    %236 = arith.mulf %235, %234 : vector<24x512xf32>
    %237 = math.tanh %236 : vector<24x512xf32>
    %cst_91 = arith.constant 1.000000e+00 : f32
    %238 = vector.broadcast %cst_91 : f32 to vector<24x512xf32>
    %239 = arith.addf %238, %237 : vector<24x512xf32>
    %cst_92 = arith.constant 5.000000e-01 : f32
    %240 = vector.broadcast %cst_92 : f32 to vector<24x512xf32>
    %241 = arith.mulf %240, %239 : vector<24x512xf32>
    %242 = arith.mulf %229, %241 : vector<24x512xf32>
    %243 = arith.truncf %242 : vector<24x512xf32> to vector<24x512xbf16>
    %c1_93 = arith.constant 1 : index
    %c0_94 = arith.constant 0 : index
    %c0_95 = arith.constant 0 : index
    %244 = vector.load %arg8[%c1_93, %c0_94, %c0_95] : memref<2x512x128xbf16, #tpu.memory_space<vmem>>, vector<1x512x128xbf16>
    %245 = vector.shape_cast %244 : vector<1x512x128xbf16> to vector<512x128xbf16>
    %cst_96 = arith.constant dense<0.000000e+00> : vector<24x128xf32>
    %246 = tpu.matmul %243, %245, %cst_96 {dimension_numbers = #tpu.dot_dimension_numbers<[1], [0], [0], [1], [0, 0, 1, 1], [], []>} : vector<24x512xbf16>, vector<512x128xbf16>, vector<24x128xf32> -> vector<24x128xf32>
    %247 = arith.addf %207, %246 : vector<24x128xf32>
    %cst_97 = arith.constant dense<0.000000e+00> : vector<24xf32>
    %248 = vector.multi_reduction <add>, %247, %cst_97 [1] : vector<24x128xf32> to vector<24xf32>
    %249 = vector.shape_cast %248 : vector<24xf32> to vector<24x1xf32>
    %cst_98 = arith.constant 1.280000e+02 : f32
    %250 = vector.broadcast %cst_98 : f32 to vector<24x1xf32>
    %251 = arith.divf %249, %250 : vector<24x1xf32>
    %252 = vector.broadcast %251 : vector<24x1xf32> to vector<24x128xf32>
    %253 = arith.subf %247, %252 : vector<24x128xf32>
    %254 = arith.mulf %253, %253 : vector<24x128xf32>
    %cst_99 = arith.constant dense<0.000000e+00> : vector<24xf32>
    %255 = vector.multi_reduction <add>, %254, %cst_99 [1] : vector<24x128xf32> to vector<24xf32>
    %256 = vector.shape_cast %255 : vector<24xf32> to vector<24x1xf32>
    %cst_100 = arith.constant 1.280000e+02 : f32
    %257 = vector.broadcast %cst_100 : f32 to vector<24x1xf32>
    %258 = arith.divf %256, %257 : vector<24x1xf32>
    %259 = vector.broadcast %251 : vector<24x1xf32> to vector<24x128xf32>
    %260 = arith.subf %247, %259 : vector<24x128xf32>
    %cst_101 = arith.constant 9.99999974E-6 : f32
    %261 = vector.broadcast %cst_101 : f32 to vector<24x1xf32>
    %262 = arith.addf %258, %261 : vector<24x1xf32>
    %263 = math.rsqrt %262 : vector<24x1xf32>
    %264 = vector.broadcast %263 : vector<24x1xf32> to vector<24x128xf32>
    %265 = arith.mulf %260, %264 : vector<24x128xf32>
    %266 = arith.truncf %265 : vector<24x128xf32> to vector<24x128xbf16>
    %c0_102 = arith.constant 0 : index
    %c0_103 = arith.constant 0 : index
    %267 = vector.load %arg9[%c0_102, %c0_103] : memref<128x128xbf16, #tpu.memory_space<vmem>>, vector<128x128xbf16>
    %cst_104 = arith.constant dense<0.000000e+00> : vector<24x128xf32>
    %268 = tpu.matmul %266, %267, %cst_104 {dimension_numbers = #tpu.dot_dimension_numbers<[1], [0], [0], [1], [0, 0, 1, 1], [], []>} : vector<24x128xbf16>, vector<128x128xbf16>, vector<24x128xf32> -> vector<24x128xf32>
    %c0_105 = arith.constant 0 : index
    %c0_106 = arith.constant 0 : index
    %269 = vector.load %arg10[%c0_105, %c0_106] : memref<24x128xf32, #tpu.memory_space<vmem>>, vector<24x128xf32>
    tpu.vector_store %arg10[%c0_105, %c0_106], %268 {strides = array<i32>} : memref<24x128xf32, #tpu.memory_space<vmem>>, vector<24x128xf32>,
    return
  }
}

</mosaic_0001>

<bundles_post_ra>
// kernel: tpu_custom_call.1
= control target key start
LH: loop header
LB: loop body
LE: loop exit
PB: predicated region body
PF: predicated region fallthrough
CT: control target
= control target key end

     0   :  { %15 = vsyncpa [#allocation3], 0  ;;  %s5764_s0 = inlined_call_operand.hbm [shape: f32[24,128], index: 0, kind: input, shape index: {}]   ;;  %s5765_s1 = inlined_call_operand.hbm [shape: f32[24,128], index: 1, kind: input, shape index: {}]   ;;  %s5766_s2 = inlined_call_operand.hbm [shape: bf16[128,128], index: 2, kind: input, shape index: {}]   ;;  %s5767_s3 = inlined_call_operand.hbm [shape: bf16[128,128], index: 3, kind: input, shape index: {}]   ;;  %s5768_s4 = inlined_call_operand.hbm [shape: bf16[128,128], index: 4, kind: input, shape index: {}]   ;;  %s5769_s5 = inlined_call_operand.hbm [shape: bf16[2,128,384], index: 5, kind: input, shape index: {}]   ;;  %s5770_s6 = inlined_call_operand.hbm [shape: bf16[2,128,128], index: 6, kind: input, shape index: {}]   ;;  %s5771_s7 = inlined_call_operand.hbm [shape: bf16[2,128,512], index: 7, kind: input, shape index: {}]   ;;  %s5772_s8 = inlined_call_operand.hbm [shape: bf16[2,512,128], index: 8, kind: input, shape index: {}]   ;;  %s5773_s9 = inlined_call_operand.hbm [shape: bf16[128,128], index: 9, kind: input, shape index: {}]   ;;  %s5774_s10 = inlined_call_operand.hbm [shape: f32[24,128], index: 10, kind: output, shape index: {}]  }
   0x1   :  { %16 = vsyncpa [#allocation6], 0 }
   0x2   :  { %17 = vsyncpa [#allocation9], 0 }
   0x3   :  { %18 = vsyncpa [#allocation12], 0 }
   0x4   :  { %19 = vsyncpa [#allocation15], 0 }
   0x5   :  { %20 = vsyncpa [#allocation18], 0 }
   0x6   :  { %21 = vsyncpa [#allocation4], 0  ;;  %s39_s15 = sshll.u32 %s5765_s1, 4  ;;  %s5167_s16 = smov [#allocation5]   ;;  %s40_s15 = int_to_ptr.hbm [resolvable:$true] %s39_s15 }
   0x7   :  { %s41_s17 = sshll.u32 %s5167_s16, 4  ;;  %s5168_s18 = smov 128   ;;  %s42_s17 = int_to_ptr.vmem [resolvable:$true] %s41_s17 }
   0x8   :  { %s5169_s19 = smov 8   ;;  %s65_s22 = sshll.u32 %s5767_s3, 4  ;;  %s66_s22 = int_to_ptr.hbm [resolvable:$true] %s65_s22 }
   0x9   :  { %47 = dma.hbm_to_vmem [thread:$0]  %s40_s15, 384, %s42_s17, [#allocation6], %s5168_s18, %s5168_s18, %s5169_s19  }
   0xa   :  { %s5170_s23 = smov [#allocation8]   ;;  %s91_s1 = sshll.u32 %s5769_s5, 4  ;;  %s92_s1 = int_to_ptr.hbm [resolvable:$true] %s91_s1 }
   0xb   :  { %s67_s24 = sshll.u32 %s5170_s23, 4  ;;  %s5171_s27 = smov 64   ;;  %s68_s24 = int_to_ptr.vmem [resolvable:$true] %s67_s24 }
   0xc   :  { %s5172_s28 = smov 4   ;;  %s5173_s29 = smov [#allocation11]  }
   0xd   :  { %73 = dma.hbm_to_vmem [thread:$0]  %s66_s22, 1024, %s68_s24, [#allocation9], %s5171_s27, %s5171_s27, %s5172_s28  }
   0xe   :  { %s93_s30 = sshll.u32 %s5173_s29, 4  ;;  %s117_s12 = sshll.u32 %s5771_s7, 4  ;;  %s94_s30 = int_to_ptr.vmem [resolvable:$true] %s93_s30  ;;  %s118_s12 = int_to_ptr.hbm [resolvable:$true] %s117_s12 }
   0xf   :  { %s5174_s13 = smov 192   ;;  %s5175_s14 = smov 12  }
  0x10   :  { %99 = dma.hbm_to_vmem [thread:$0]  %s92_s1, 6144, %s94_s30, [#allocation12], %s5174_s13, %s5174_s13, %s5175_s14  }
  0x11   :  { %s5176_s5 = smov [#allocation14]   ;;  %s5177_s16 = smov 256  }
  0x12   :  { %s119_s15 = sshll.u32 %s5176_s5, 4  ;;  %s5178_s17 = smov 16   ;;  %s120_s15 = int_to_ptr.vmem [resolvable:$true] %s119_s15 }
  0x13   :  { %125 = dma.hbm_to_vmem [thread:$0]  %s118_s12, 8192, %s120_s15, [#allocation15], %s5177_s16, %s5177_s16, %s5178_s17  }
  0x14   :  { %s26_s22 = sshll.u32 %s5764_s0, 4  ;;  %s5179_s23 = smov [#allocation2]   ;;  %s27_s22 = int_to_ptr.hbm [resolvable:$true] %s26_s22 }
  0x15   :  { %s28_s24 = sshll.u32 %s5179_s23, 4  ;;  %s52_s26 = sshll.u32 %s5766_s2, 4  ;;  %s29_s24 = int_to_ptr.vmem [resolvable:$true] %s28_s24  ;;  %s53_s26 = int_to_ptr.hbm [resolvable:$true] %s52_s26 }
  0x16   :  { %34 = dma.hbm_to_vmem [thread:$0]  %s27_s22, 384, %s29_s24, [#allocation3], %s5168_s18, %s5168_s18, %s5169_s19  }
  0x17   :  { %s5180_s1 = smov [#allocation7]   ;;  %s78_s3 = sshll.u32 %s5768_s4, 4  ;;  %s79_s3 = int_to_ptr.hbm [resolvable:$true] %s78_s3 }
  0x18   :  { %s54_s29 = sshll.u32 %s5180_s1, 4  ;;  %s104_s2 = sshll.u32 %s5770_s6, 4  ;;  %s55_s29 = int_to_ptr.vmem [resolvable:$true] %s54_s29  ;;  %s105_s2 = int_to_ptr.hbm [resolvable:$true] %s104_s2 }
  0x19   :  { %60 = dma.hbm_to_vmem [thread:$0]  %s53_s26, 1024, %s55_s29, [#allocation6], %s5171_s27, %s5171_s27, %s5172_s28  }
  0x1a   :  { %s5181_s13 = smov [#allocation10]   ;;  %s5182_s5 = smov [#allocation13]  }
  0x1b   :  { %s80_s14 = sshll.u32 %s5181_s13, 4  ;;  %s106_s4 = sshll.u32 %s5182_s5, 4  ;;  %s81_s14 = int_to_ptr.vmem [resolvable:$true] %s80_s14  ;;  %s107_s4 = int_to_ptr.vmem [resolvable:$true] %s106_s4 }
  0x1c   :  { %86 = dma.hbm_to_vmem [thread:$0]  %s79_s3, 1024, %s81_s14, [#allocation9], %s5171_s27, %s5171_s27, %s5172_s28  }
  0x1d   :  { %s130_s17 = sshll.u32 %s5772_s8, 4  ;;  %s143_s21 = sshll.u32 %s5773_s9, 4  ;;  %s131_s17 = int_to_ptr.hbm [resolvable:$true] %s130_s17  ;;  %s144_s21 = int_to_ptr.hbm [resolvable:$true] %s143_s21 }
  0x1e   :  { %112 = dma.hbm_to_vmem [thread:$0]  %s105_s2, 2048, %s107_s4, [#allocation12], %s5171_s27, %s5171_s27, %s5172_s28  }
  0x1f   :  { %s5183_s22 = smov [#allocation16]   ;;  %s5184_s24 = smov [#allocation17]  }
  0x20   :  { %s132_s23 = sshll.u32 %s5183_s22, 4  ;;  %s145_s8 = sshll.u32 %s5184_s24, 4  ;;  %s133_s23 = int_to_ptr.vmem [resolvable:$true] %s132_s23  ;;  %s146_s8 = int_to_ptr.vmem [resolvable:$true] %s145_s8 }
  0x21   :  { %138 = dma.hbm_to_vmem [thread:$0]  %s131_s17, 8192, %s133_s23, [#allocation15], %s5171_s27, %s5171_s27, %s5172_s28  }
  0x22   :  { %151 = dma.hbm_to_vmem [thread:$0]  %s144_s21, 1024, %s146_s8, [#allocation18], %s5171_s27, %s5171_s27, %s5172_s28  }
  0x23   :  { %5153 = dma.done.wait [#allocation3], 384  }
  0x24   :  { %5154 = vsyncadd [#allocation3], 4294966912 }
  0x25   :  { %5155 = dma.done.wait [#allocation6], 1408  }
  0x26   :  { %5156 = vsyncadd [#allocation6], 4294965888 }
  0x27   :  { %5157 = dma.done.wait [#allocation9], 2048  }
  0x28   :  { %5158 = vsyncadd [#allocation9], 4294965248 }
  0x29   :  { %5159 = dma.done.wait [#allocation12], 8192  }
  0x2a   :  { %5160 = vsyncadd [#allocation12], 4294959104 }
  0x2b   :  { %5161 = dma.done.wait [#allocation15], 16384  }
  0x2c   :  { %5162 = vsyncadd [#allocation15], 4294950912 }
  0x2d   :  { %5163 = dma.done.wait [#allocation18], 1024  }
  0x2e   :  { %5164 = vsyncadd [#allocation18], 4294966272  ;;  %v4501_v0 = vld [vmem:[#allocation8 + $0x38] sm:$0xff]  ;;  %v4500_v2 = vld [vmem:[#allocation8 + $0x30] sm:$0xff]  ;;  %s5187_s9 = smov [#allocation19]   ;;  %s3525_s7 = sshll.u32 %s5774_s10, 4  ;;  %s3526_s7 = int_to_ptr.hbm [resolvable:$true] %s3525_s7 }
  0x2f   :  { %v4493_v1 = vld [vmem:[#allocation7 + $0x38] sm:$0xff]  ;;  %311 = vmatpush.bf16.msra.mxu0 %v4501_v0  ;;  %v4492_v3 = vld [vmem:[#allocation7 + $0x30] sm:$0xff]  ;;  %v4499_v4 = vld [vmem:[#allocation8 + $0x28] sm:$0xff] }
  0x30   :  { %377 = vmatpush.bf16.msra.mxu1 %v4493_v1  ;;  %v4491_v5 = vld [vmem:[#allocation7 + $0x28] sm:$0xff]  ;;  %v4498_v6 = vld [vmem:[#allocation8 + $0x20] sm:$0xff]  ;;  %v4497_v8 = vld [vmem:[#allocation8 + $0x18] sm:$0xff] }
  0x31   :  { %v4490_v7 = vld [vmem:[#allocation7 + $0x20] sm:$0xff]  ;;  %v4489_v9 = vld [vmem:[#allocation7 + $0x18] sm:$0xff]  ;;  %v4496_v10 = vld [vmem:[#allocation8 + $0x10] sm:$0xff] }
  0x32   :  { %v4488_v11 = vld [vmem:[#allocation7 + $0x10] sm:$0xff]  ;;  %v4495_v12 = vld [vmem:[#allocation8 + $0x8] sm:$0xff]  ;;  %v4494_v14 = vld [vmem:[#allocation8] sm:$0xff] }
  0x33   :  { %312 = vmatpush.bf16.msra.mxu0 %v4500_v2  ;;  %v4487_v13 = vld [vmem:[#allocation7 + $0x8] sm:$0xff]  ;;  %v4486_v15 = vld [vmem:[#allocation7] sm:$0xff]  ;;  %v243_v17 = vld [vmem:[#allocation5 + $0x8] sm:$0xff] }
  0x34   :  { %378 = vmatpush.bf16.msra.mxu1 %v4492_v3  ;;  %v242_v16 = vld [vmem:[#allocation5] sm:$0xff]  ;;  %v221_v18 = vld [vmem:[#allocation2] sm:$0xff]  ;;  %v222_v19 = vld [vmem:[#allocation2 + $0x8] sm:$0xff] }
  0x35   :  { %v245_v20 = vpack.c.bf16 %v243_v17, %v242_v16  ;;  %v224_v21 = vpack.c.bf16 %v222_v19, %v221_v18  ;;  %v244_v22 = vld [vmem:[#allocation5 + $0x10] sm:$0xff]  ;;  %v223_v23 = vld [vmem:[#allocation2 + $0x10] sm:$0xff]  ;;  %v4508_v27 = vld [vmem:[#allocation10 + $0x30] sm:$0xff] }
  0x36   :  { %v246_v24 = vpack.c.bf16 %v244_v22, %v244_v22  ;;  %v225_v25 = vpack.c.bf16 %v223_v23, %v223_v23  ;;  %v4509_v26 = vld [vmem:[#allocation10 + $0x38] sm:$0xff]  ;;  %v4507_v28 = vld [vmem:[#allocation10 + $0x28] sm:$0xff]  ;;  %v4506_v29 = vld [vmem:[#allocation10 + $0x20] sm:$0xff] }
  0x37   :  { %313 = vmatpush.bf16.msra.mxu0 %v4499_v4  ;;  %521 = vmatpush.bf16.msra.mxu2 %v4509_v26  ;;  %v4505_v30 = vld [vmem:[#allocation10 + $0x18] sm:$0xff]  ;;  %v4504_v31 = vld [vmem:[#allocation10 + $0x10] sm:$0xff]  ;;  %v4503_v34 = vld [vmem:[#allocation10 + $0x8] sm:$0xff] }
  0x38   :  { %379 = vmatpush.bf16.msra.mxu1 %v4491_v5  ;;  %v4502_v37 = vld [vmem:[#allocation10] sm:$0xff] }
  0x3b   :  { %314 = vmatpush.bf16.msra.mxu0 %v4498_v6  ;;  %522 = vmatpush.bf16.msra.mxu2 %v4508_v27 }
  0x3c   :  { %380 = vmatpush.bf16.msra.mxu1 %v4490_v7 }
  0x3f   :  { %315 = vmatpush.bf16.msra.mxu0 %v4497_v8  ;;  %523 = vmatpush.bf16.msra.mxu2 %v4507_v28 }
  0x40   :  { %381 = vmatpush.bf16.msra.mxu1 %v4489_v9 }
  0x43   :  { %316 = vmatpush.bf16.msra.mxu0 %v4496_v10  ;;  %524 = vmatpush.bf16.msra.mxu2 %v4506_v29  ;;  %v5185_v29 = vmov 128.0  }
  0x44   :  { %382 = vmatpush.bf16.msra.mxu1 %v4488_v11 }
  0x47   :  { %317 = vmatpush.bf16.msra.mxu0 %v4495_v12  ;;  %525 = vmatpush.bf16.msra.mxu2 %v4505_v30 }
  0x48   :  { %383 = vmatpush.bf16.msra.mxu1 %v4487_v13 }
  0x4b   :  { %318 = vmatpush.bf16.msra.mxu0 %v4494_v14  ;;  %526 = vmatpush.bf16.msra.mxu2 %v4504_v31 }
  0x4c   :  { %384 = vmatpush.bf16.msra.mxu1 %v4486_v15 }
  0x4e   :  { %319 = vmatmul.bf16.vlgmr.msra.gmra.mxu0 %v245_v20 }
  0x4f   :  { %385 = vmatmul.bf16.vlgmr.msra.gmra.mxu1 %v224_v21  ;;  %527 = vmatpush.bf16.msra.mxu2 %v4503_v34 }
  0x53   :  { %528 = vmatpush.bf16.msra.mxu2 %v4502_v37 }
  0x5e   :  { %324 = vmatmul.bf16.gmra.mxu0 %v246_v24 }
  0x5f   :  { %390 = vmatmul.bf16.gmra.mxu1 %v225_v25 }
  0xcb   :  { %v320_v32 = vpop.f32.mrf.mxu0 }
  0xcc   :  { %v386_v33 = vpop.f32.mrf.mxu1 }
  0xcd   :  { %v387_v35 = vadd.f32 %v386_v33, %v320_v32 }
  0xcf   :  { %v3607_v36 = vmul.f32 -1.442695, %v387_v35 }
  0xd1   :  { %4749 = vpow2.f32 %v3607_v36 }
  0xd3   :  { %v322_v38 = vpop.f32.mrf.mxu0 }
  0xd4   :  { %v388_v39 = vpop.f32.mrf.mxu1 }
  0xd5   :  { %v389_v40 = vadd.f32 %v388_v39, %v322_v38 }
  0xd7   :  { %v4750_v41 = vpop.eup %4749  ;;  %v3608_v42 = vmul.f32 -1.442695, %v389_v40 }
  0xd8   :  { %v404_v43 = vadd.f32 1.0, %v4750_v41 }
  0xd9   :  { %4751 = vpow2.f32 %v3608_v42 }
  0xda   :  { %4753 = vrcp.f32 %v404_v43  ;;  %v418_v61 = vand.u32 2147483648, %v404_v43  ;;  %vm412_vm1 = vweird.f32 %v404_v43  ;;  %v416_v62 = vand.u32 2147483647, %v404_v43 }
  0xdb   :  { %v325_v44 = vpop.f32.mrf.mxu0 }
  0xdc   :  { %v391_v45 = vpop.f32.mrf.mxu1  ;;  %v419_v4 = vor.u32 1.1754944e-38, %v418_v61  ;;  %vm417_vm4 = vcmp.eq.f32.partialorder %v416_v62, 8.507059e+37  ;;  %v3718_v61 = vld [vmem:[#allocation11 + $0x9c] sm:$0xf0]  ;;  %v3724_v62 = vld [vmem:[#allocation11 + $0x98] sm:$0xf] }
  0xdd   :  { %v392_v46 = vadd.f32 %v391_v45, %v325_v44 }
  0xdf   :  { %v4752_v47 = vpop.eup %4751  ;;  %v3609_v48 = vmul.f32 -1.442695, %v392_v46 }
  0xe0   :  { %v4754_v49 = vpop.eup %4753  ;;  %v405_v50 = vadd.f32 1.0, %v4752_v47 }
  0xe1   :  { %4755 = vpow2.f32 %v3609_v48  ;;  %v408_v51 = vmul.f32 %v4754_v49, %v404_v43  ;;  %vm413_vm0 = vweird.f32 %v4754_v49  ;;  %v3728_v48 = vld [vmem:[#allocation11 + $0xa8] sm:$0xf] }
  0xe2   :  { %4757 = vrcp.f32 %v405_v50  ;;  %vm414_vm2 = vmor %vm412_vm1, %vm413_vm0  ;;  %v433_v0 = vand.u32 2147483648, %v405_v50  ;;  %v431_v3 = vand.u32 2147483647, %v405_v50  ;;  %vm427_vm5 = vweird.f32 %v405_v50 }
  0xe3   :  { %v409_v52 = vsub.f32 1.0, %v408_v51  ;;  %v327_v53 = vpop.f32.mrf.mxu0 }
  0xe4   :  { %v393_v54 = vpop.f32.mrf.mxu1  ;;  %v434_v8 = vor.u32 1.1754944e-38, %v433_v0  ;;  %vm432_vm7 = vcmp.eq.f32.partialorder %v431_v3, 8.507059e+37  ;;  %v3736_v53 = vld [vmem:[#allocation11 + $0xb0] sm:$0xf]  ;;  %v4526_v3 = vld [vmem:[#allocation11 + $0x80] sm:$0xf0] }
  0xe5   :  { %v410_v55 = vmul.f32 %v4754_v49, %v409_v52  ;;  %v3730_v52 = vld [vmem:[#allocation11 + $0xb4] sm:$0xf0]  ;;  %v4533_v54 = vld [vmem:[#allocation11 + $0xb8] sm:$0xf0] }
  0xe7   :  { %v4756_v56 = vpop.eup %4755  ;;  %v411_v59 = vadd.f32 %v4754_v49, %v410_v55 }
  0xe8   :  { %v4758_v57 = vpop.eup %4757  ;;  %v406_v58 = vadd.f32 1.0, %v4756_v56  ;;  %v3737_v56 = vor.u32 %v4533_v54, %v3736_v53  ;;  %v3644_v54 = vld [vmem:[#allocation11] sm:$0xf] }
  0xe9   :  { %v423_v60 = vmul.f32 %v4758_v57, %v405_v50  ;;  %v415_v1 = vsel %vm414_vm2, %v4754_v49, %v411_v59  ;;  %vm428_vm3 = vweird.f32 %v4758_v57  ;;  %v4532_v49 = vld [vmem:[#allocation11 + $0xb0] sm:$0xf0]  ;;  %v4531_v50 = vld [vmem:[#allocation11 + $0xac] sm:$0xf] }
  0xea   :  { %4759 = vrcp.f32 %v406_v58  ;;  %v420_v7 = vsel %vm417_vm4, %v419_v4, %v415_v1  ;;  %vm429_vm6 = vmor %vm427_vm5, %vm428_vm3  ;;  %vm442_vm8 = vweird.f32 %v406_v58  ;;  %v448_v17 = vand.u32 2147483648, %v406_v58  ;;  %804 = vmatpush.bf16.msrb.mxu1 %v3737_v56  ;;  %v4528_v59 = vld [vmem:[#allocation11 + $0x94] sm:$0xf]  ;;  %v4525_v4 = vld [vmem:[#allocation11 + $0x7c] sm:$0xf] }
  0xeb   :  { %v424_v63 = vsub.f32 1.0, %v423_v60  ;;  %v452_v12 = vmul.f32 %v420_v7, %v387_v35  ;;  %v446_v19 = vand.u32 2147483647, %v406_v58  ;;  %4761 = vrcp.f32 %v5185_v29  ;;  %v3712_v7 = vld [vmem:[#allocation11 + $0x80] sm:$0xf] }
  0xec   :  { %v449_v20 = vor.u32 1.1754944e-38, %v448_v17  ;;  %v3729_v51 = vor.u32 %v4532_v49, %v3728_v48  ;;  %v3733_v55 = vor.u32 %v4531_v50, %v3730_v52  ;;  %v3721_v0 = vor.u32 %v4528_v59, %v3718_v61  ;;  %v4524_v17 = vld [vmem:[#allocation11 + $0x70] sm:$0xf0]  ;;  %v4521_v29 = vld [vmem:[#allocation11 + $0x58] sm:$0xf0] }
  0xed   :  { %v425_v2 = vmul.f32 %v4758_v57, %v424_v63  ;;  %vm447_vm11 = vcmp.eq.f32.partialorder %v446_v19, 8.507059e+37  ;;  %v4530_v63 = vld [vmem:[#allocation11 + $0xa0] sm:$0xf0]  ;;  %v3658_v49 = vld [vmem:[#allocation11 + $0x24] sm:$0xf0] }
  0xee   :  { %768 = vmatpush.bf16.msra.mxu3 %v3729_v51  ;;  %786 = vmatpush.bf16.msrb.mxu0 %v3733_v55  ;;  %v3725_v1 = vor.u32 %v4530_v63, %v3724_v62  ;;  %v3664_v50 = vld [vmem:[#allocation11 + $0x20] sm:$0xf]  ;;  %v4515_v51 = vld [vmem:[#allocation11 + $0x28] sm:$0xf0]  ;;  %v4510_v56 = vld [vmem:[#allocation11 + $0x4] sm:$0xf] }
  0xef   :  { %v426_v5 = vadd.f32 %v4758_v57, %v425_v2  ;;  %v3704_v2 = vld [vmem:[#allocation11 + $0x78] sm:$0xf]  ;;  %v3665_v53 = vor.u32 %v4515_v51, %v3664_v50  ;;  %v4511_v55 = vld [vmem:[#allocation11 + $0x8] sm:$0xf0]  ;;  %v3652_v59 = vld [vmem:[#allocation11 + $0x8] sm:$0xf]  ;;  %v193_v50 = vlaneseq }
  0xf0   :  { %v4760_v6 = vpop.eup %4759  ;;  %805 = vmatpush.bf16.msrb.mxu1 %v3725_v1 }
  0xf1   :  { %v430_v9 = vsel %vm429_vm6, %v4758_v57, %v426_v5  ;;  %v438_v10 = vmul.f32 %v4760_v6, %v406_v58  ;;  %vm443_vm9 = vweird.f32 %v4760_v6  ;;  %v4762_v30 = vpop.eup %4761  ;;  %v3716_v57 = vld [vmem:[#allocation11 + $0x90] sm:$0xf]  ;;  %v4529_v58 = vld [vmem:[#allocation11 + $0x98] sm:$0xf0]  ;;  %v3705_v5 = vor.u32 %v4526_v3, %v3704_v2 }
  0xf2   :  { %v435_v11 = vsel %vm432_vm7, %v434_v8, %v430_v9  ;;  %vm444_vm10 = vmor %vm442_vm8, %vm443_vm9  ;;  %v546_v31 = vmul.f32 128.0, %v4762_v30  ;;  %vm550_vm12 = vweird.f32 %v4762_v30  ;;  %v3717_v60 = vor.u32 %v4529_v58, %v3716_v57  ;;  %787 = vmatpush.bf16.msrb.mxu0 %v3721_v0  ;;  %v4527_v8 = vld [vmem:[#allocation11 + $0x88] sm:$0xf0]  ;;  %v3646_v58 = vld [vmem:[#allocation11 + $0xc] sm:$0xf0] }
  0xf3   :  { %v453_v13 = vmul.f32 %v435_v11, %v389_v40  ;;  %v439_v14 = vsub.f32 1.0, %v438_v10  ;;  %v3713_v10 = vor.u32 %v4527_v8, %v3712_v7  ;;  %v3692_v11 = vld [vmem:[#allocation11 + $0x60] sm:$0xf]  ;;  %v3645_v57 = vor.u32 %v4511_v55, %v3644_v54 }
  0xf4   :  { %v547_v32 = vsub.f32 1.0, %v546_v31  ;;  %769 = vmatpush.bf16.msra.mxu3 %v3717_v60  ;;  %v4512_v60 = vld [vmem:[#allocation11 + $0x10] sm:$0xf0]  ;;  %v3649_v61 = vor.u32 %v4510_v56, %v3646_v58  ;;  %vm838_vm6 = vcmask 523264   ;;  %vm883_vm8 = vcmask 195584  }
  0xf5   :  { %v455_v15 = vpack.c.bf16 %v453_v13, %v452_v12  ;;  %v440_v16 = vmul.f32 %v4760_v6, %v439_v14  ;;  %806 = vmatpush.bf16.msrb.mxu1 %v3713_v10  ;;  %v4523_v12 = vld [vmem:[#allocation11 + $0x68] sm:$0xf0]  ;;  %v4522_v13 = vld [vmem:[#allocation11 + $0x64] sm:$0xf]  ;;  %v3653_v62 = vor.u32 %v4512_v60, %v3652_v59 }
  0xf6   :  { %v548_v33 = vmul.f32 %v4762_v30, %v547_v32  ;;  %v3693_v14 = vor.u32 %v4523_v12, %v3692_v11  ;;  %v3668_v32 = vld [vmem:[#allocation11 + $0x30] sm:$0xf] }
  0xf7   :  { %529 = vmatmul.bf16.vlgmr.msra.gmra.mxu2 %v455_v15  ;;  %v441_v18 = vadd.f32 %v4760_v6, %v440_v16  ;;  %v3694_v15 = vld [vmem:[#allocation11 + $0x6c] sm:$0xf0]  ;;  %v3700_v16 = vld [vmem:[#allocation11 + $0x68] sm:$0xf] }
  0xf8   :  { %v549_v34 = vadd.f32 %v4762_v30, %v548_v33  ;;  %770 = vmatpush.bf16.msra.mxu3 %v3705_v5  ;;  %v3701_v19 = vor.u32 %v4524_v17, %v3700_v16  ;;  %v4517_v33 = vld [vmem:[#allocation11 + $0x38] sm:$0xf0] }
  0xf9   :  { %v445_v21 = vsel %vm444_vm10, %v4760_v6, %v441_v18  ;;  %v3706_v6 = vld [vmem:[#allocation11 + $0x84] sm:$0xf0]  ;;  %v3697_v18 = vor.u32 %v4522_v13, %v3694_v15 }
  0xfa   :  { %v450_v22 = vsel %vm447_vm11, %v449_v20, %v445_v21  ;;  %v5306_v35 = vsel %vm550_vm12, %v4762_v30, %v549_v34  ;;  %v3709_v9 = vor.u32 %v4525_v4, %v3706_v6  ;;  %807 = vmatpush.bf16.msrb.mxu1 %v3701_v19  ;;  %v3680_v20 = vld [vmem:[#allocation11 + $0x48] sm:$0xf]  ;;  %v4520_v21 = vld [vmem:[#allocation11 + $0x50] sm:$0xf0] }
  0xfb   :  { %v454_v23 = vmul.f32 %v450_v22, %v392_v46  ;;  %v4519_v22 = vld [vmem:[#allocation11 + $0x4c] sm:$0xf]  ;;  %v4516_v34 = vld [vmem:[#allocation11 + $0x34] sm:$0xf] }
  0xfc   :  { %788 = vmatpush.bf16.msrb.mxu0 %v3709_v9  ;;  %771 = vmatpush.bf16.msra.mxu3 %v3693_v14 }
  0xfd   :  { %v456_v24 = vpack.c.bf16 %v454_v23, %v454_v23  ;;  %v3681_v23 = vor.u32 %v4520_v21, %v3680_v20 }
 0x100   :  { %789 = vmatpush.bf16.msrb.mxu0 %v3697_v18  ;;  %772 = vmatpush.bf16.msra.mxu3 %v3681_v23 }
 0x107   :  { %534 = vmatmul.bf16.gmra.mxu2 %v456_v24  ;;  %v3682_v24 = vld [vmem:[#allocation11 + $0x54] sm:$0xf0] }
 0x108   :  { %v3685_v30 = vor.u32 %v4519_v22, %v3682_v24 }
 0x10a   :  { %790 = vmatpush.bf16.msrb.mxu0 %v3685_v30 }
 0x17a   :  { %v5297_v25 = vpop.f32.mrf.mxu2 }
 0x17b   :  { %539 = vadd.xlane.f32.xlu0 %v5297_v25 }
 0x182   :  { %v5300_v26 = vpop.f32.mrf.mxu2 }
 0x183   :  { %541 = vadd.xlane.f32.xlu0 %v5300_v26 }
 0x18a   :  { %v5303_v27 = vpop.f32.mrf.mxu2 }
 0x18b   :  { %543 = vadd.xlane.f32.xlu1 %v5303_v27 }
 0x192   :  { %v537_v28 = vpop.f32.mrf.mxu2 }
 0x193   :  { %v3688_v28 = vld [vmem:[#allocation11 + $0x50] sm:$0xf] }
 0x194   :  { %v3689_v31 = vor.u32 %v4521_v29, %v3688_v28 }
 0x196   :  { %808 = vmatpush.bf16.msrb.mxu1 %v3689_v31 }
 0x1ee   :  { %v540_v36 = vpop.xlane.xlu0 %539 }
 0x1ef   :  { %v552_v37 = vmul.f32 %v5306_v35, %v540_v36  ;;  %v3669_v36 = vor.u32 %v4517_v33, %v3668_v32 }
 0x1f1   :  { %v5310_v38 = vsub.f32 %v5297_v25, %v552_v37  ;;  %v3670_v37 = vld [vmem:[#allocation11 + $0x3c] sm:$0xf0]  ;;  %773 = vmatpush.bf16.msra.mxu3 %v3669_v36 }
 0x1f3   :  { %v558_v39 = vmul.f32 %v5310_v38, %v5310_v38 }
 0x1f5   :  { %561 = vadd.xlane.f32.xlu1 %v558_v39  ;;  %v3676_v39 = vld [vmem:[#allocation11 + $0x38] sm:$0xf] }
 0x1f6   :  { %v542_v40 = vpop.xlane.xlu0 %541 }
 0x1f7   :  { %v553_v41 = vmul.f32 %v5306_v35, %v542_v40  ;;  %v4518_v40 = vld [vmem:[#allocation11 + $0x40] sm:$0xf0] }
 0x1f9   :  { %v5316_v42 = vsub.f32 %v5300_v26, %v553_v41  ;;  %v3673_v41 = vor.u32 %v4516_v34, %v3670_v37 }
 0x1fb   :  { %v559_v43 = vmul.f32 %v5316_v42, %v5316_v42  ;;  %791 = vmatpush.bf16.msrb.mxu0 %v3673_v41 }
 0x1fd   :  { %563 = vadd.xlane.f32.xlu2 %v559_v43  ;;  %v3677_v43 = vor.u32 %v4518_v40, %v3676_v39 }
 0x1fe   :  { %v544_v44 = vpop.xlane.xlu1 %543 }
 0x1ff   :  { %v554_v45 = vmul.f32 %v5306_v35, %v544_v44  ;;  %809 = vmatpush.bf16.msrb.mxu1 %v3677_v43  ;;  %v3656_v44 = vld [vmem:[#allocation11 + $0x18] sm:$0xf] }
 0x201   :  { %v5322_v46 = vsub.f32 %v5303_v27, %v554_v45  ;;  %v4514_v45 = vld [vmem:[#allocation11 + $0x20] sm:$0xf0] }
 0x202   :  { %v3657_v48 = vor.u32 %v4514_v45, %v3656_v44 }
 0x203   :  { %v560_v47 = vmul.f32 %v5322_v46, %v5322_v46  ;;  %810 = vmatpush.bf16.msrb.mxu1 %v3665_v53  ;;  %v201_v53 = vand.u32 127, %v193_v50 }
 0x204   :  { %774 = vmatpush.bf16.msra.mxu3 %v3657_v48 }
 0x205   :  { %565 = vadd.xlane.f32.xlu2 %v560_v47  ;;  %v4513_v47 = vld [vmem:[#allocation11 + $0x1c] sm:$0xf]  ;;  %v202_v56 = vcvt.s32.f32 %v201_v53 }
 0x206   :  { %v3661_v52 = vor.u32 %v4513_v47, %v3658_v49 }
 0x207   :  { %811 = vmatpush.bf16.msrb.mxu1 %v3653_v62  ;;  %v212_v60 = vadd.f32 0.5, %v202_v56 }
 0x208   :  { %792 = vmatpush.bf16.msrb.mxu0 %v3661_v52  ;;  %775 = vmatpush.bf16.msra.mxu3 %v3645_v57  ;;  %v194_v52 = vshrl.u32 %v193_v50, 7 }
 0x20a   :  { %v197_v55 = vcvt.s32.f32 %v194_v52 }
 0x20c   :  { %793 = vmatpush.bf16.msrb.mxu0 %v3649_v61  ;;  %v203_v59 = vadd.f32 0.5, %v197_v55  ;;  %v195_v61 = vadd.s32 8, %v194_v52 }
 0x20e   :  { %v206_v62 = vmul.f32 0.083333336, %v203_v59 }
 0x268   :  { %v562_v63 = vpop.xlane.xlu1 %561 }
 0x269   :  { %v567_v0 = vmul.f32 %v562_v63, %v5306_v35  ;;  %v213_v63 = vmul.f32 0.083333336, %v212_v60 }
 0x26b   :  { %v570_v1 = vadd.f32 1e-05, %v567_v0  ;;  %v198_v0 = vcvt.s32.f32 %v195_v61 }
 0x26d   :  { %4763 = vrsqrt.f32 %v570_v1  ;;  %vm579_vm14 = vweird.f32 %v570_v1 }
 0x270   :  { %v564_v2 = vpop.xlane.xlu2 %563 }
 0x271   :  { %v568_v3 = vmul.f32 %v564_v2, %v5306_v35  ;;  %v209_v2 = vfloor.f32 %v206_v62 }
 0x273   :  { %v4764_v4 = vpop.eup %4763  ;;  %v571_v5 = vadd.f32 1e-05, %v568_v3  ;;  %v214_v3 = vfloor.f32 %v213_v63 }
 0x274   :  { %v574_v6 = vmul.f32 %v4764_v4, %v570_v1  ;;  %vm580_vm13 = vweird.f32 %v4764_v4 }
 0x275   :  { %4765 = vrsqrt.f32 %v571_v5  ;;  %vm581_vm0 = vmor %vm579_vm14, %vm580_vm13  ;;  %vm589_vm1 = vweird.f32 %v571_v5  ;;  %vm215_vm7 = vcmp.eq.f32.partialorder %v209_v2, %v214_v3 }
 0x276   :  { %v575_v7 = vmul.f32 %v4764_v4, %v574_v6 }
 0x278   :  { %v576_v8 = vmul.f32 0.5, %v575_v7  ;;  %v566_v9 = vpop.xlane.xlu2 %565 }
 0x279   :  { %v569_v10 = vmul.f32 %v566_v9, %v5306_v35 }
 0x27a   :  { %v577_v13 = vsub.f32 1.5, %v576_v8  ;;  %v5186_v8 = vmov -1e+30  }
 0x27b   :  { %v4766_v11 = vpop.eup %4765  ;;  %v572_v12 = vadd.f32 1e-05, %v569_v10  ;;  %v5358_v9 = vsel %vm215_vm7, 0.0, %v5186_v8 }
 0x27c   :  { %v584_v14 = vmul.f32 %v4766_v11, %v571_v5  ;;  %v578_v16 = vmul.f32 %v4764_v4, %v577_v13  ;;  %vm590_vm15 = vweird.f32 %v4766_v11  ;;  %v196_v5 = vadd.s32 16, %v194_v52 }
 0x27d   :  { %4767 = vrsqrt.f32 %v572_v12  ;;  %vm591_vm2 = vmor %vm589_vm1, %vm590_vm15  ;;  %vm599_vm4 = vweird.f32 %v572_v12 }
 0x27e   :  { %v585_v15 = vmul.f32 %v4766_v11, %v584_v14  ;;  %v582_v22 = vsel %vm581_vm0, %v4764_v4, %v578_v16  ;;  %v204_v4 = vadd.f32 0.5, %v198_v0  ;;  %v199_v7 = vcvt.s32.f32 %v196_v5 }
 0x27f   :  { %v603_v28 = vmul.f32 %v582_v22, %v5310_v38 }
 0x280   :  { %v586_v17 = vmul.f32 0.5, %v585_v15  ;;  %v207_v6 = vmul.f32 0.083333336, %v204_v4 }
 0x282   :  { %v587_v18 = vsub.f32 1.5, %v586_v17 }
 0x283   :  { %v4768_v19 = vpop.eup %4767 }
 0x284   :  { %v588_v20 = vmul.f32 %v4766_v11, %v587_v18  ;;  %v594_v21 = vmul.f32 %v4768_v19, %v572_v12  ;;  %vm600_vm3 = vweird.f32 %v4768_v19  ;;  %v205_v12 = vadd.f32 0.5, %v199_v7 }
 0x285   :  { %vm601_vm5 = vmor %vm599_vm4, %vm600_vm3 }
 0x286   :  { %v595_v23 = vmul.f32 %v4768_v19, %v594_v21  ;;  %v592_v24 = vsel %vm591_vm2, %v4766_v11, %v588_v20  ;;  %v210_v11 = vfloor.f32 %v207_v6  ;;  %v208_v16 = vmul.f32 0.083333336, %v205_v12 }
 0x287   :  { %v604_v29 = vmul.f32 %v592_v24, %v5316_v42 }
 0x288   :  { %v596_v30 = vmul.f32 0.5, %v595_v23  ;;  %vm216_vm9 = vcmp.eq.f32.partialorder %v210_v11, %v214_v3  ;;  %v211_v18 = vfloor.f32 %v208_v16 }
 0x289   :  { %v606_v31 = vpack.c.bf16 %v604_v29, %v603_v28  ;;  %v5363_v17 = vsel %vm216_vm9, 0.0, %v5186_v8 }
 0x28a   :  { %v597_v32 = vsub.f32 1.5, %v596_v30  ;;  %vm217_vm10 = vcmp.eq.f32.partialorder %v211_v18, %v214_v3 }
 0x28b   :  { %776 = vmatmul.bf16.vlgmr.msra.gmra.mxu3 %v606_v31  ;;  %794 = vmatmul.bf16.vlgmr.msrb.gmra.mxu0 %v606_v31  ;;  %v5367_v22 = vsel %vm217_vm10, 0.0, %v5186_v8 }
 0x28c   :  { %812 = vmatmul.bf16.vlgmr.msrb.gmra.mxu1 %v606_v31  ;;  %v598_v33 = vmul.f32 %v4768_v19, %v597_v32 }
 0x28e   :  { %v602_v34 = vsel %vm601_vm5, %v4768_v19, %v598_v33 }
 0x28f   :  { %v605_v36 = vmul.f32 %v602_v34, %v5322_v46 }
 0x291   :  { %v607_v37 = vpack.c.bf16 %v605_v36, %v605_v36 }
 0x29b   :  { %781 = vmatmul.bf16.gmra.mxu3 %v607_v37  ;;  %799 = vmatmul.bf16.gmra.mxu0 %v607_v37 }
 0x29c   :  { %817 = vmatmul.bf16.gmra.mxu1 %v607_v37 }
 0x308   :  { %v795_v38 = vpop.f32.mrf.mxu0 }
 0x309   :  { %v5332_v39 = vpop.f32.mrf.mxu1  ;;  %960 = vrot.lane.b32.xlu2 %v795_v38, %s5171_s27 }
 0x30e   :  { %v777_v42 = vpop.f32.mrf.mxu3 }
 0x310   :  { %v797_v40 = vpop.f32.mrf.mxu0 }
 0x311   :  { %v5335_v41 = vpop.f32.mrf.mxu1  ;;  %962 = vrot.lane.b32.xlu1 %v797_v40, %s5171_s27 }
 0x316   :  { %v779_v43 = vpop.f32.mrf.mxu3 }
 0x317   :  { %956 = vrot.lane.b32.xlu2 %v779_v43, %s5171_s27 }
 0x318   :  { %v800_v46 = vpop.f32.mrf.mxu0 }
 0x319   :  { %v5339_v44 = vpop.f32.mrf.mxu1  ;;  %964 = vrot.lane.b32.xlu0 %v800_v46, %s5171_s27  ;;  %3738 = vmatpush.xpose.msk.msrb.mxu2 %vm838_vm6, %v800_v46 }
 0x31a   :  { %939 = vmatpush.msrb.mxu3 %v5339_v44 }
 0x31c   :  { %940 = vmatpush.msrb.mxu3 %v5335_v41 }
 0x31d   :  { %3739 = vmatpush.xpose.msk.msrb.mxu2 %vm838_vm6, %v797_v40 }
 0x31e   :  { %941 = vmatpush.msrb.mxu3 %v5332_v39  ;;  %v782_v45 = vpop.f32.mrf.mxu3 }
 0x31f   :  { %958 = vrot.lane.b32.xlu1 %v782_v45, %s5171_s27 }
 0x320   :  { %v802_v47 = vpop.f32.mrf.mxu0 }
 0x321   :  { %v820_v48 = vpop.f32.mrf.mxu1  ;;  %3740 = vmatpush.xpose.msk.msrb.mxu2 %vm838_vm6, %v795_v38  ;;  %954 = vrot.lane.b32.xlu0 %v777_v42, %s5171_s27 }
 0x324   :  { %3741 = vmatmul.msk.f32.vlgmr.msrb.gmra.mxu2 %vm838_vm6, %v777_v42 }
 0x326   :  { %v784_v49 = vpop.f32.mrf.mxu3 }
 0x32c   :  { %3742 = vmatmul.msk.f32.gmra.mxu2 %vm838_vm6, %v779_v43 }
 0x334   :  { %3743 = vmatmul.msk.f32.gmra.mxu2 %vm838_vm6, %v782_v45 }
 0x363   :  { %v961_v57 = vpop.permute.xlu2 %960 }
 0x371   :  { %v957_v1 = vpop.permute.xlu2 %956 }
 0x383   :  { %v963_v54 = vpop.permute.xlu1 %962 }
 0x38b   :  { %v965_v51 = vpop.permute.xlu0 %964 }
 0x38c   :  { %3747 = vmatpush.xpose.msk.msra.mxu2 %vm838_vm6, %v965_v51 }
 0x390   :  { %3748 = vmatpush.xpose.msk.msra.mxu2 %vm838_vm6, %v963_v54 }
 0x391   :  { %v959_v10 = vpop.permute.xlu1 %958 }
 0x393   :  { %v955_v58 = vpop.permute.xlu0 %954 }
 0x394   :  { %3749 = vmatpush.xpose.msk.msra.mxu2 %vm838_vm6, %v961_v57  ;;  %v4739_v57 = vpack.i.bf16 %v5335_v41, %v5339_v44 }
 0x397   :  { %3750 = vmatmul.msk.f32.vlgmr.msra.gmra.mxu2 %vm838_vm6, %v955_v58 }
 0x39f   :  { %3751 = vmatmul.msk.f32.gmra.mxu2 %vm838_vm6, %v957_v1 }
 0x3a7   :  { %v874_v13 = vpop.f32.mrf.mxu2  ;;  %3752 = vmatmul.msk.f32.gmra.mxu2 %vm838_vm6, %v959_v10 }
 0x3a8   :  { %v875_v14 = vadd.f32 %v874_v13, %v5358_v9 }
 0x3aa   :  { %v884_v15 = vsel %vm883_vm8, %v875_v14, -inf }
 0x3ab   :  { %885 = vmax.xlane.f32.xlu0 %v884_v15 }
 0x3af   :  { %v877_v19 = vpop.f32.mrf.mxu2 }
 0x3b0   :  { %v878_v20 = vadd.f32 %v877_v19, %v5363_v17 }
 0x3b2   :  { %v887_v21 = vsel %vm883_vm8, %v878_v20, -inf }
 0x3b3   :  { %888 = vmax.xlane.f32.xlu2 %v887_v21  ;;  %v4537_v21 = vld [vmem:[#allocation13 + $0x18] sm:$0xff] }
 0x3b4   :  { %1168 = vmatpush.bf16.msra.mxu1 %v4537_v21  ;;  %v4573_v21 = vld [vmem:[#allocation14 + $0xf4] sm:$0xf0] }
 0x3b7   :  { %v880_v23 = vpop.f32.mrf.mxu2 }
 0x3b8   :  { %v881_v24 = vadd.f32 %v880_v23, %v5367_v22  ;;  %v4536_v23 = vld [vmem:[#allocation13 + $0x10] sm:$0xff] }
 0x3b9   :  { %1169 = vmatpush.bf16.msra.mxu1 %v4536_v23 }
 0x3ba   :  { %v890_v28 = vsel %vm883_vm8, %v881_v24, -inf }
 0x3bb   :  { %891 = vmax.xlane.f32.xlu1 %v890_v28  ;;  %v4534_v28 = vld [vmem:[#allocation13] sm:$0xff] }
 0x41a   :  { %v995_v29 = vpop.f32.mrf.mxu2 }
 0x41b   :  { %v996_v30 = vadd.f32 %v995_v29, %v5358_v9 }
 0x41d   :  { %v1004_v31 = vsel %vm883_vm8, %v996_v30, -inf }
 0x41e   :  { %1005 = vmax.xlane.f32.xlu0 %v1004_v31  ;;  %v886_v32 = vpop.xlane.xlu0 %885 }
 0x41f   :  { %v893_v33 = vsub.f32 %v875_v14, %v886_v32 }
 0x421   :  { %v896_v34 = vmul.f32 1.442695, %v893_v33  ;;  %v4541_v33 = vld [vmem:[#allocation13 + $0x38] sm:$0xff] }
 0x422   :  { %v998_v36 = vpop.f32.mrf.mxu2  ;;  %1120 = vmatpush.bf16.msra.mxu0 %v4541_v33 }
 0x423   :  { %4769 = vpow2.f32 %v896_v34  ;;  %v999_v37 = vadd.f32 %v998_v36, %v5363_v17 }
 0x425   :  { %v1007_v38 = vsel %vm883_vm8, %v999_v37, -inf }
 0x426   :  { %1008 = vmax.xlane.f32.xlu2 %v1007_v38  ;;  %v889_v42 = vpop.xlane.xlu2 %888 }
 0x427   :  { %v894_v40 = vsub.f32 %v878_v20, %v889_v42 }
 0x429   :  { %v4770_v43 = vpop.eup %4769  ;;  %v898_v46 = vmul.f32 1.442695, %v894_v40 }
 0x42a   :  { %v902_v45 = vsel %vm883_vm8, %v4770_v43, 0.0  ;;  %v1001_v47 = vpop.f32.mrf.mxu2 }
 0x42b   :  { %4771 = vpow2.f32 %v898_v46  ;;  %903 = vadd.xlane.f32.xlu1 %v902_v45  ;;  %v1002_v48 = vadd.f32 %v1001_v47, %v5367_v22 }
 0x42d   :  { %v1010_v54 = vsel %vm883_vm8, %v1002_v48, -inf }
 0x42e   :  { %v892_v49 = vpop.xlane.xlu1 %891 }
 0x42f   :  { %v895_v50 = vsub.f32 %v881_v24, %v892_v49  ;;  %v4535_v24 = vld [vmem:[#allocation13 + $0x8] sm:$0xff] }
 0x430   :  { %1170 = vmatpush.bf16.msra.mxu1 %v4535_v24  ;;  %v4539_v49 = vld [vmem:[#allocation13 + $0x28] sm:$0xff] }
 0x431   :  { %v4772_v51 = vpop.eup %4771  ;;  %v900_v52 = vmul.f32 1.442695, %v895_v50  ;;  %v4538_v50 = vld [vmem:[#allocation13 + $0x20] sm:$0xff] }
 0x432   :  { %v905_v53 = vsel %vm883_vm8, %v4772_v51, 0.0 }
 0x433   :  { %4773 = vpow2.f32 %v900_v52  ;;  %906 = vadd.xlane.f32.xlu0 %v905_v53  ;;  %1011 = vmax.xlane.f32.xlu1 %v1010_v54 }
 0x434   :  { %1171 = vmatpush.bf16.msra.mxu1 %v4534_v28  ;;  %v4571_v28 = vld [vmem:[#allocation14 + $0xec] sm:$0xf] }
 0x439   :  { %v4774_v55 = vpop.eup %4773 }
 0x43a   :  { %v908_v56 = vsel %vm883_vm8, %v4774_v55, 0.0 }
 0x43b   :  { %909 = vadd.xlane.f32.xlu2 %v908_v56 }
 0x453   :  { %4740 = vrot.lane.b32.xlu2 %v4739_v57, %s5171_s27 }
 0x491   :  { %v1006_v58 = vpop.xlane.xlu0 %1005 }
 0x492   :  { %v1013_v59 = vsub.f32 %v996_v30, %v1006_v58 }
 0x494   :  { %v1016_v60 = vmul.f32 1.442695, %v1013_v59 }
 0x496   :  { %4775 = vpow2.f32 %v1016_v60 }
 0x499   :  { %v1009_v61 = vpop.xlane.xlu2 %1008 }
 0x49a   :  { %v1014_v62 = vsub.f32 %v999_v37, %v1009_v61 }
 0x49c   :  { %v4776_v63 = vpop.eup %4775  ;;  %v1018_v0 = vmul.f32 1.442695, %v1014_v62 }
 0x49d   :  { %v1022_v1 = vsel %vm883_vm8, %v4776_v63, 0.0 }
 0x49e   :  { %4777 = vpow2.f32 %v1018_v0  ;;  %v904_v2 = vpop.xlane.xlu1 %903  ;;  %1023 = vadd.xlane.f32.xlu0 %v1022_v1 }
 0x49f   :  { %4779 = vrcp.f32 %v904_v2 }
 0x4a4   :  { %v4778_v3 = vpop.eup %4777 }
 0x4a5   :  { %v4780_v4 = vpop.eup %4779  ;;  %v1025_v41 = vsel %vm883_vm8, %v4778_v3, 0.0 }
 0x4a6   :  { %1026 = vadd.xlane.f32.xlu1 %v1025_v41  ;;  %v1012_v44 = vpop.xlane.xlu1 %1011  ;;  %v907_v5 = vpop.xlane.xlu0 %906  ;;  %v914_v6 = vmul.f32 %v4780_v4, %v4770_v43 }
 0x4a7   :  { %v1015_v7 = vsub.f32 %v1002_v48, %v1012_v44  ;;  %4781 = vrcp.f32 %v907_v5  ;;  %v4540_v48 = vld [vmem:[#allocation13 + $0x30] sm:$0xff] }
 0x4a8   :  { %3744 = vmatmul.msk.f32.vlgmr.msrb.gmra.mxu3 %vm883_vm8, %v914_v6  ;;  %1121 = vmatpush.bf16.msra.mxu0 %v4540_v48  ;;  %v4562_v48 = vld [vmem:[#allocation14 + $0xa4] sm:$0xf] }
 0x4a9   :  { %v1020_v8 = vmul.f32 1.442695, %v1015_v7 }
 0x4ab   :  { %4783 = vpow2.f32 %v1020_v8 }
 0x4ac   :  { %1122 = vmatpush.bf16.msra.mxu0 %v4539_v49 }
 0x4ad   :  { %v4782_v10 = vpop.eup %4781 }
 0x4ae   :  { %v910_v11 = vpop.xlane.xlu2 %909  ;;  %v915_v12 = vmul.f32 %v4782_v10, %v4772_v51 }
 0x4af   :  { %4785 = vrcp.f32 %v910_v11 }
 0x4b0   :  { %3745 = vmatmul.msk.f32.gmra.mxu3 %vm883_vm8, %v915_v12  ;;  %1123 = vmatpush.bf16.msra.mxu0 %v4538_v50  ;;  %v3876_v50 = vld [vmem:[#allocation14 + $0xb0] sm:$0xf0] }
 0x4b1   :  { %v4784_v13 = vpop.eup %4783 }
 0x4b2   :  { %1040 = vrot.lane.b32.xlu0 %v5332_v39, %s5171_s27  ;;  %v1028_v14 = vsel %vm883_vm8, %v4784_v13, 0.0 }
 0x4b3   :  { %1029 = vadd.xlane.f32.xlu1 %v1028_v14  ;;  %v3906_v14 = vld [vmem:[#allocation14 + $0xe0] sm:$0xf] }
 0x4b5   :  { %v4786_v15 = vpop.eup %4785 }
 0x4b6   :  { %v4741_v16 = vpop.permute.xlu2 %4740  ;;  %v916_v18 = vmul.f32 %v4786_v15, %v4774_v55  ;;  %v4572_v15 = vld [vmem:[#allocation14 + $0xec] sm:$0xf0] }
 0x4b7   :  { %v4742_v19 = vunpack.i.l.bf16 %v4741_v16  ;;  %v4743_v20 = vunpack.i.h.bf16 %v4741_v16  ;;  %v4570_v16 = vld [vmem:[#allocation14 + $0xe4] sm:$0xf] }
 0x4b8   :  { %3746 = vmatmul.msk.f32.gmra.mxu3 %vm883_vm8, %v916_v18  ;;  %v3907_v18 = vor.u32 %v4572_v15, %v3906_v14  ;;  %v4557_v14 = vld [vmem:[#allocation14 + $0x74] sm:$0xf0] }
 0x4b9   :  { %1071 = vmatpush.msra.mxu3 %v4742_v19  ;;  %v3908_v19 = vld [vmem:[#allocation14 + $0xf0] sm:$0xf0] }
 0x4ba   :  { %v3911_v23 = vor.u32 %v4570_v16, %v3908_v19  ;;  %1439 = vmatpush.bf16.msrb.mxu2 %v3907_v18  ;;  %v4555_v18 = vld [vmem:[#allocation14 + $0x6c] sm:$0xf]  ;;  %v3852_v19 = vld [vmem:[#allocation14 + $0x78] sm:$0xf0] }
 0x4bb   :  { %1072 = vmatpush.msra.mxu3 %v4743_v20  ;;  %v3914_v20 = vld [vmem:[#allocation14 + $0xe8] sm:$0xf] }
 0x4bc   :  { %v3915_v24 = vor.u32 %v4573_v21, %v3914_v20  ;;  %v3855_v20 = vor.u32 %v4555_v18, %v3852_v19  ;;  %v3826_v21 = vld [vmem:[#allocation14 + $0x40] sm:$0xf] }
 0x4be   :  { %1475 = vmatpush.bf16.msrb.mxu0 %v3915_v24  ;;  %v4550_v24 = vld [vmem:[#allocation14 + $0x44] sm:$0xf] }
 0x511   :  { %v1024_v39 = vpop.xlane.xlu0 %1023 }
 0x512   :  { %4787 = vrcp.f32 %v1024_v39  ;;  %v3916_v39 = vld [vmem:[#allocation14 + $0xf8] sm:$0xf0] }
 0x518   :  { %v4788_v30 = vpop.eup %4787 }
 0x519   :  { %v1027_v29 = vpop.xlane.xlu1 %1026  ;;  %v1034_v31 = vmul.f32 %v4788_v30, %v4776_v63  ;;  %v3890_v30 = vld [vmem:[#allocation14 + $0xc0] sm:$0xf] }
 0x51a   :  { %4789 = vrcp.f32 %v1027_v29  ;;  %v3919_v29 = vor.u32 %v4571_v28, %v3916_v39  ;;  %v3828_v39 = vld [vmem:[#allocation14 + $0x50] sm:$0xf0] }
 0x51c   :  { %1493 = vmatpush.bf16.msrb.mxu1 %v3919_v29  ;;  %v3834_v29 = vld [vmem:[#allocation14 + $0x48] sm:$0xf] }
 0x520   :  { %v4790_v36 = vpop.eup %4789 }
 0x521   :  { %v1035_v38 = vmul.f32 %v4790_v36, %v4778_v3  ;;  %v3898_v36 = vld [vmem:[#allocation14 + $0xc8] sm:$0xf] }
 0x524   :  { %v1041_v32 = vpop.permute.xlu0 %1040 }
 0x525   :  { %1073 = vmatpush.msra.mxu3 %v1041_v32  ;;  %v4566_v32 = vld [vmem:[#allocation14 + $0xc4] sm:$0xf] }
 0x526   :  { %3753 = vmatmul.msk.f32.vlgmr.msra.gmra.mxu3 %vm883_vm8, %v1034_v31  ;;  %v1030_v34 = vpop.xlane.xlu1 %1029  ;;  %v4568_v31 = vld [vmem:[#allocation14 + $0xcc] sm:$0xf0] }
 0x527   :  { %4791 = vrcp.f32 %v1030_v34  ;;  %1457 = vmatpush.bf16.msrb.mxu3 %v3911_v23  ;;  %v3891_v33 = vor.u32 %v4568_v31, %v3890_v30  ;;  %v3892_v34 = vld [vmem:[#allocation14 + $0xd0] sm:$0xf0]  ;;  %v4552_v23 = vld [vmem:[#allocation14 + $0x4c] sm:$0xf0]  ;;  %v4553_v30 = vld [vmem:[#allocation14 + $0x54] sm:$0xf0]  ;;  %v3831_v31 = vor.u32 %v4550_v24, %v3828_v39 }
 0x528   :  { %v3827_v28 = vor.u32 %v4552_v23, %v3826_v21 }
 0x529   :  { %1440 = vmatpush.bf16.msrb.mxu2 %v3891_v33  ;;  %v4551_v33 = vld [vmem:[#allocation14 + $0x4c] sm:$0xf] }
 0x52b   :  { %v943_v37 = vpop.f32.mrf.mxu3 }
 0x52d   :  { %v4792_v42 = vpop.eup %4791 }
 0x52e   :  { %3754 = vmatmul.msk.f32.gmra.mxu3 %vm883_vm8, %v1035_v38  ;;  %v1036_v46 = vmul.f32 %v4792_v42, %v4784_v13  ;;  %v3895_v38 = vor.u32 %v4566_v32, %v3892_v34  ;;  %v3835_v32 = vor.u32 %v4553_v30, %v3834_v29  ;;  %v3836_v34 = vld [vmem:[#allocation14 + $0x58] sm:$0xf0] }
 0x530   :  { %1458 = vmatpush.bf16.msrb.mxu3 %v3895_v38  ;;  %v4548_v38 = vld [vmem:[#allocation14 + $0x2c] sm:$0xf0] }
 0x533   :  { %v946_v40 = vpop.f32.mrf.mxu3 }
 0x534   :  { %v952_v43 = vpack.c.bf16 %v946_v40, %v943_v37  ;;  %v4569_v37 = vld [vmem:[#allocation14 + $0xd4] sm:$0xf0]  ;;  %v4567_v40 = vld [vmem:[#allocation14 + $0xcc] sm:$0xf] }
 0x535   :  { %v3899_v42 = vor.u32 %v4569_v37, %v3898_v36  ;;  %v3839_v36 = vor.u32 %v4551_v33, %v3836_v34  ;;  %v3810_v37 = vld [vmem:[#allocation14 + $0x20] sm:$0xf] }
 0x536   :  { %3755 = vmatmul.msk.f32.gmra.mxu3 %vm883_vm8, %v1036_v46  ;;  %3790 = vmatmul.msk.bf16.vlgmr.msra.gmra.mxu1 %vm838_vm6, %v952_v43  ;;  %v3900_v43 = vld [vmem:[#allocation14 + $0xd8] sm:$0xf0] }
 0x537   :  { %v3903_v46 = vor.u32 %v4567_v40, %v3900_v43  ;;  %1476 = vmatpush.bf16.msrb.mxu0 %v3899_v42  ;;  %v4546_v42 = vld [vmem:[#allocation14 + $0x24] sm:$0xf]  ;;  %v3811_v40 = vor.u32 %v4548_v38, %v3810_v37  ;;  %v3812_v43 = vld [vmem:[#allocation14 + $0x30] sm:$0xf0] }
 0x539   :  { %1494 = vmatpush.bf16.msrb.mxu1 %v3903_v46  ;;  %v3818_v46 = vld [vmem:[#allocation14 + $0x28] sm:$0xf] }
 0x53b   :  { %v949_v45 = vpop.f32.mrf.mxu3 }
 0x53c   :  { %v953_v47 = vpack.c.bf16 %v949_v45, %v949_v45  ;;  %v3874_v45 = vld [vmem:[#allocation14 + $0xa0] sm:$0xf] }
 0x546   :  { %3791 = vmatmul.msk.bf16.gmra.mxu1 %vm838_vm6, %v953_v47  ;;  %v4564_v47 = vld [vmem:[#allocation14 + $0xac] sm:$0xf0] }
 0x547   :  { %v3875_v49 = vor.u32 %v4564_v47, %v3874_v45  ;;  %v4549_v45 = vld [vmem:[#allocation14 + $0x34] sm:$0xf0]  ;;  %v3815_v47 = vor.u32 %v4546_v42, %v3812_v43 }
 0x549   :  { %1441 = vmatpush.bf16.msrb.mxu2 %v3875_v49  ;;  %v4547_v49 = vld [vmem:[#allocation14 + $0x2c] sm:$0xf] }
 0x5a9   :  { %v1075_v51 = vpop.f32.mrf.mxu3 }
 0x5b1   :  { %v1078_v52 = vpop.f32.mrf.mxu3 }
 0x5b2   :  { %v1084_v53 = vpack.c.bf16 %v1078_v52, %v1075_v51  ;;  %v3882_v51 = vld [vmem:[#allocation14 + $0xa8] sm:$0xf]  ;;  %v4565_v52 = vld [vmem:[#allocation14 + $0xb4] sm:$0xf0] }
 0x5b3   :  { %v1173_v54 = vpop.f32.mrf.mxu1 }
 0x5b4   :  { %3772 = vmatmul.msk.bf16.vlgmr.msra.gmra.mxu0 %vm838_vm6, %v1084_v53  ;;  %v3879_v53 = vor.u32 %v4562_v48, %v3876_v50  ;;  %v3819_v48 = vor.u32 %v4549_v45, %v3818_v46  ;;  %v3820_v50 = vld [vmem:[#allocation14 + $0x38] sm:$0xf0]  ;;  %v4596_v46 = vld [vmem:[#allocation16 + $0xb0] sm:$0xff] }
 0x5b5   :  { %v4604_v45 = vld [vmem:[#allocation16 + $0xf0] sm:$0xff] }
 0x5b6   :  { %1459 = vmatpush.bf16.msrb.mxu3 %v3879_v53  ;;  %v4544_v53 = vld [vmem:[#allocation14 + $0xc] sm:$0xf0] }
 0x5b9   :  { %v1081_v56 = vpop.f32.mrf.mxu3 }
 0x5ba   :  { %v1085_v57 = vpack.c.bf16 %v1081_v56, %v1081_v56  ;;  %v3884_v56 = vld [vmem:[#allocation14 + $0xb8] sm:$0xf0] }
 0x5bb   :  { %v1175_v55 = vpop.f32.mrf.mxu1 }
 0x5c3   :  { %v1178_v58 = vpop.f32.mrf.mxu1 }
 0x5c4   :  { %3773 = vmatmul.msk.bf16.gmra.mxu0 %vm838_vm6, %v1085_v57 }
 0x5cb   :  { %v1180_v59 = vpop.f32.mrf.mxu1 }
 0x5cc   :  { %v4560_v59 = vld [vmem:[#allocation14 + $0x8c] sm:$0xf0] }
 0x631   :  { %v1125_v60 = vpop.f32.mrf.mxu0 }
 0x632   :  { %v1174_v61 = vadd.f32 %v1173_v54, %v1125_v60  ;;  %v3883_v54 = vor.u32 %v4565_v52, %v3882_v51  ;;  %v4558_v60 = vld [vmem:[#allocation14 + $0x84] sm:$0xf]  ;;  %v3823_v51 = vor.u32 %v4547_v49, %v3820_v50  ;;  %v3794_v52 = vld [vmem:[#allocation14] sm:$0xf]  ;;  %v4595_v49 = vld [vmem:[#allocation16 + $0xa8] sm:$0xff] }
 0x633   :  { %v4603_v50 = vld [vmem:[#allocation16 + $0xe8] sm:$0xff] }
 0x634   :  { %v5399_v62 = vadd.f32 %v1174_v61, %v5297_v25  ;;  %1477 = vmatpush.bf16.msrb.mxu0 %v3883_v54  ;;  %v4542_v54 = vld [vmem:[#allocation14 + $0x4] sm:$0xf] }
 0x636   :  { %1185 = vadd.xlane.f32.xlu1 %v5399_v62 }
 0x639   :  { %v1127_v63 = vpop.f32.mrf.mxu0 }
 0x63a   :  { %v1176_v0 = vadd.f32 %v1175_v55, %v1127_v63  ;;  %v4563_v55 = vld [vmem:[#allocation14 + $0xac] sm:$0xf]  ;;  %v3860_v63 = vld [vmem:[#allocation14 + $0x90] sm:$0xf0] }
 0x63b   :  { %v3887_v57 = vor.u32 %v4563_v55, %v3884_v56  ;;  %v3795_v55 = vor.u32 %v4544_v53, %v3794_v52  ;;  %v3796_v56 = vld [vmem:[#allocation14 + $0x10] sm:$0xf0]  ;;  %v4594_v52 = vld [vmem:[#allocation16 + $0xa0] sm:$0xff] }
 0x63c   :  { %v5403_v1 = vadd.f32 %v1176_v0, %v5300_v26  ;;  %v3866_v0 = vld [vmem:[#allocation14 + $0x88] sm:$0xf]  ;;  %v4602_v53 = vld [vmem:[#allocation16 + $0xe0] sm:$0xff] }
 0x63d   :  { %1495 = vmatpush.bf16.msrb.mxu1 %v3887_v57  ;;  %v3802_v57 = vld [vmem:[#allocation14 + $0x8] sm:$0xf] }
 0x63e   :  { %1187 = vadd.xlane.f32.xlu2 %v5403_v1 }
 0x641   :  { %v1130_v2 = vpop.f32.mrf.mxu0 }
 0x642   :  { %v1179_v3 = vadd.f32 %v1178_v58, %v1130_v2  ;;  %v3858_v58 = vld [vmem:[#allocation14 + $0x80] sm:$0xf]  ;;  %v4561_v2 = vld [vmem:[#allocation14 + $0x94] sm:$0xf0] }
 0x643   :  { %v3859_v61 = vor.u32 %v4560_v59, %v3858_v58  ;;  %v4545_v58 = vld [vmem:[#allocation14 + $0x14] sm:$0xf0] }
 0x644   :  { %v5407_v4 = vadd.f32 %v1179_v3, %v5303_v27  ;;  %v3863_v3 = vor.u32 %v4558_v60, %v3860_v63  ;;  %v3799_v60 = vor.u32 %v4542_v54, %v3796_v56  ;;  %v4543_v63 = vld [vmem:[#allocation14 + $0xc] sm:$0xf]  ;;  %v4593_v56 = vld [vmem:[#allocation16 + $0x98] sm:$0xff] }
 0x645   :  { %1442 = vmatpush.bf16.msrb.mxu2 %v3859_v61  ;;  %v3803_v61 = vor.u32 %v4545_v58, %v3802_v57  ;;  %v4579_v54 = vld [vmem:[#allocation16 + $0x28] sm:$0xff]  ;;  %v4601_v57 = vld [vmem:[#allocation16 + $0xd8] sm:$0xff]  ;;  %v4578_v58 = vld [vmem:[#allocation16 + $0x20] sm:$0xff] }
 0x646   :  { %1189 = vadd.xlane.f32.xlu0 %v5407_v4  ;;  %1460 = vmatpush.bf16.msrb.mxu3 %v3863_v3 }
 0x649   :  { %v1132_v41 = vpop.f32.mrf.mxu0 }
 0x64a   :  { %v3867_v41 = vor.u32 %v4561_v2, %v3866_v0  ;;  %v3804_v0 = vld [vmem:[#allocation14 + $0x18] sm:$0xf0] }
 0x64b   :  { %v3807_v3 = vor.u32 %v4543_v63, %v3804_v0  ;;  %v4577_v63 = vld [vmem:[#allocation16 + $0x18] sm:$0xff] }
 0x64c   :  { %1478 = vmatpush.bf16.msrb.mxu0 %v3867_v41  ;;  %v4585_v0 = vld [vmem:[#allocation16 + $0x58] sm:$0xff] }
 0x6a9   :  { %v1186_v44 = vpop.xlane.xlu1 %1185 }
 0x6aa   :  { %v1191_v25 = vmul.f32 %v1186_v44, %v5306_v35  ;;  %v4559_v44 = vld [vmem:[#allocation14 + $0x8c] sm:$0xf] }
 0x6ac   :  { %v5412_v5 = vsub.f32 %v5399_v62, %v1191_v25  ;;  %v3868_v25 = vld [vmem:[#allocation14 + $0x98] sm:$0xf0] }
 0x6ae   :  { %v1197_v26 = vmul.f32 %v5412_v5, %v5412_v5 }
 0x6b0   :  { %1200 = vadd.xlane.f32.xlu1 %v1197_v26  ;;  %v3871_v26 = vor.u32 %v4559_v44, %v3868_v25 }
 0x6b1   :  { %v1188_v6 = vpop.xlane.xlu2 %1187 }
 0x6b2   :  { %v1192_v7 = vmul.f32 %v1188_v6, %v5306_v35  ;;  %v3842_v6 = vld [vmem:[#allocation14 + $0x60] sm:$0xf]  ;;  %1496 = vmatpush.bf16.msrb.mxu1 %v3871_v26 }
 0x6b4   :  { %v5418_v8 = vsub.f32 %v5403_v1, %v1192_v7  ;;  %v4556_v7 = vld [vmem:[#allocation14 + $0x6c] sm:$0xf0] }
 0x6b6   :  { %v1198_v27 = vmul.f32 %v5418_v8, %v5418_v8  ;;  %1497 = vmatpush.bf16.msrb.mxu1 %v3855_v20 }
 0x6b8   :  { %1202 = vadd.xlane.f32.xlu1 %v1198_v27  ;;  %v4554_v27 = vld [vmem:[#allocation14 + $0x64] sm:$0xf] }
 0x6b9   :  { %v1190_v10 = vpop.xlane.xlu0 %1189 }
 0x6ba   :  { %v1193_v11 = vmul.f32 %v1190_v10, %v5306_v35  ;;  %v3843_v10 = vor.u32 %v4556_v7, %v3842_v6  ;;  %1498 = vmatpush.bf16.msrb.mxu1 %v3839_v36 }
 0x6bc   :  { %v5424_v12 = vsub.f32 %v5407_v4, %v1193_v11  ;;  %v3844_v11 = vld [vmem:[#allocation14 + $0x70] sm:$0xf0]  ;;  %1443 = vmatpush.bf16.msrb.mxu2 %v3843_v10 }
 0x6bd   :  { %v3847_v15 = vor.u32 %v4554_v27, %v3844_v11 }
 0x6be   :  { %v1199_v13 = vmul.f32 %v5424_v12, %v5424_v12  ;;  %1499 = vmatpush.bf16.msrb.mxu1 %v3823_v51  ;;  %v4588_v51 = vld [vmem:[#allocation16 + $0x70] sm:$0xff] }
 0x6bf   :  { %1461 = vmatpush.bf16.msrb.mxu3 %v3847_v15 }
 0x6c0   :  { %1204 = vadd.xlane.f32.xlu1 %v1199_v13  ;;  %v3850_v13 = vld [vmem:[#allocation14 + $0x68] sm:$0xf]  ;;  %1444 = vmatpush.bf16.msrb.mxu2 %v3827_v28 }
 0x6c1   :  { %v3851_v16 = vor.u32 %v4557_v14, %v3850_v13 }
 0x6c2   :  { %1500 = vmatpush.bf16.msrb.mxu1 %v3807_v3  ;;  %v4599_v3 = vld [vmem:[#allocation16 + $0xc8] sm:$0xff] }
 0x6c3   :  { %1479 = vmatpush.bf16.msrb.mxu0 %v3851_v16  ;;  %1462 = vmatpush.bf16.msrb.mxu3 %v3831_v31 }
 0x6c4   :  { %1445 = vmatpush.bf16.msrb.mxu2 %v3811_v40 }
 0x6c7   :  { %1480 = vmatpush.bf16.msrb.mxu0 %v3835_v32  ;;  %1463 = vmatpush.bf16.msrb.mxu3 %v3815_v47  ;;  %v4581_v47 = vld [vmem:[#allocation16 + $0x38] sm:$0xff] }
 0x6c8   :  { %1446 = vmatpush.bf16.msrb.mxu2 %v3795_v55  ;;  %v4587_v55 = vld [vmem:[#allocation16 + $0x68] sm:$0xff] }
 0x6cb   :  { %1481 = vmatpush.bf16.msrb.mxu0 %v3819_v48  ;;  %1464 = vmatpush.bf16.msrb.mxu3 %v3799_v60  ;;  %v4589_v48 = vld [vmem:[#allocation16 + $0x78] sm:$0xff]  ;;  %v4592_v60 = vld [vmem:[#allocation16 + $0x90] sm:$0xff] }
 0x6cc   :  { %1883 = vmatpush.bf16.msra.mxu2 %v4581_v47 }
 0x6cf   :  { %1482 = vmatpush.bf16.msrb.mxu0 %v3803_v61  ;;  %1901 = vmatpush.bf16.msra.mxu3 %v4589_v48  ;;  %v4600_v61 = vld [vmem:[#allocation16 + $0xd0] sm:$0xff] }
 0x6d3   :  { %1902 = vmatpush.bf16.msra.mxu3 %v4588_v51 }
 0x6d7   :  { %1903 = vmatpush.bf16.msra.mxu3 %v4587_v55 }
 0x723   :  { %v1201_v59 = vpop.xlane.xlu1 %1200 }
 0x724   :  { %v1206_v2 = vmul.f32 %v1201_v59, %v5306_v35  ;;  %v4586_v59 = vld [vmem:[#allocation16 + $0x60] sm:$0xff] }
 0x725   :  { %1904 = vmatpush.bf16.msra.mxu3 %v4586_v59 }
 0x726   :  { %v1209_v41 = vadd.f32 1e-05, %v1206_v2  ;;  %v4591_v2 = vld [vmem:[#allocation16 + $0x88] sm:$0xff] }
 0x728   :  { %4793 = vrsqrt.f32 %v1209_v41  ;;  %vm1218_vm12 = vweird.f32 %v1209_v41 }
 0x729   :  { %1905 = vmatpush.bf16.msra.mxu3 %v4585_v0 }
 0x72b   :  { %v1203_v44 = vpop.xlane.xlu1 %1202 }
 0x72c   :  { %v1207_v25 = vmul.f32 %v1203_v44, %v5306_v35  ;;  %v4584_v44 = vld [vmem:[#allocation16 + $0x50] sm:$0xff] }
 0x72d   :  { %1906 = vmatpush.bf16.msra.mxu3 %v4584_v44 }
 0x72e   :  { %v4794_v26 = vpop.eup %4793  ;;  %v1210_v6 = vadd.f32 1e-05, %v1207_v25  ;;  %v4590_v25 = vld [vmem:[#allocation16 + $0x80] sm:$0xff] }
 0x72f   :  { %v1213_v7 = vmul.f32 %v4794_v26, %v1209_v41  ;;  %vm1219_vm11 = vweird.f32 %v4794_v26  ;;  %v4576_v41 = vld [vmem:[#allocation16 + $0x10] sm:$0xff] }
 0x730   :  { %4795 = vrsqrt.f32 %v1210_v6  ;;  %vm1220_vm14 = vmor %vm1218_vm12, %vm1219_vm11  ;;  %vm1228_vm15 = vweird.f32 %v1210_v6 }
 0x731   :  { %v1214_v27 = vmul.f32 %v4794_v26, %v1213_v7 }
 0x733   :  { %v1215_v10 = vmul.f32 0.5, %v1214_v27  ;;  %v1205_v11 = vpop.xlane.xlu1 %1204 }
 0x734   :  { %v1208_v13 = vmul.f32 %v1205_v11, %v5306_v35  ;;  %v4575_v11 = vld [vmem:[#allocation16 + $0x8] sm:$0xff] }
 0x735   :  { %v1216_v16 = vsub.f32 1.5, %v1215_v10 }
 0x736   :  { %v4796_v14 = vpop.eup %4795  ;;  %v1211_v15 = vadd.f32 1e-05, %v1208_v13  ;;  %v4583_v13 = vld [vmem:[#allocation16 + $0x48] sm:$0xff] }
 0x737   :  { %v1223_v18 = vmul.f32 %v4796_v14, %v1210_v6  ;;  %v1217_v20 = vmul.f32 %v4794_v26, %v1216_v16  ;;  %vm1229_vm13 = vweird.f32 %v4796_v14  ;;  %1907 = vmatpush.bf16.msra.mxu3 %v4583_v13  ;;  %v4574_v16 = vld [vmem:[#allocation16] sm:$0xff] }
 0x738   :  { %4797 = vrsqrt.f32 %v1211_v15  ;;  %vm1230_vm0 = vmor %vm1228_vm15, %vm1229_vm13  ;;  %vm1238_vm2 = vweird.f32 %v1211_v15 }
 0x739   :  { %v1224_v19 = vmul.f32 %v4796_v14, %v1223_v18  ;;  %v1221_v28 = vsel %vm1220_vm14, %v4794_v26, %v1217_v20  ;;  %v4598_v26 = vld [vmem:[#allocation16 + $0xc0] sm:$0xff] }
 0x73a   :  { %v1242_v32 = vmul.f32 %v1221_v28, %v5412_v5  ;;  %v4597_v5 = vld [vmem:[#allocation16 + $0xb8] sm:$0xff]  ;;  %v4582_v18 = vld [vmem:[#allocation16 + $0x40] sm:$0xff] }
 0x73b   :  { %v1225_v21 = vmul.f32 0.5, %v1224_v19  ;;  %1919 = vmatpush.bf16.msra.mxu0 %v4597_v5  ;;  %1908 = vmatpush.bf16.msra.mxu3 %v4582_v18 }
 0x73d   :  { %v1226_v23 = vsub.f32 1.5, %v1225_v21 }
 0x73e   :  { %v4798_v24 = vpop.eup %4797 }
 0x73f   :  { %v1227_v39 = vmul.f32 %v4796_v14, %v1226_v23  ;;  %v1233_v29 = vmul.f32 %v4798_v24, %v1211_v15  ;;  %vm1239_vm1 = vweird.f32 %v4798_v24  ;;  %1920 = vmatpush.bf16.msra.mxu0 %v4596_v46 }
 0x740   :  { %vm1240_vm3 = vmor %vm1238_vm2, %vm1239_vm1 }
 0x741   :  { %v1231_v30 = vsel %vm1230_vm0, %v4796_v14, %v1227_v39  ;;  %v1234_v31 = vmul.f32 %v4798_v24, %v1233_v29 }
 0x742   :  { %v1243_v33 = vmul.f32 %v1231_v30, %v5418_v8  ;;  %v4605_v8 = vld [vmem:[#allocation16 + $0xf8] sm:$0xff] }
 0x743   :  { %v1235_v34 = vmul.f32 0.5, %v1234_v31  ;;  %1937 = vmatpush.bf16.msra.mxu1 %v4605_v8  ;;  %1921 = vmatpush.bf16.msra.mxu0 %v4595_v49 }
 0x744   :  { %v1245_v36 = vpack.c.bf16 %v1243_v33, %v1242_v32 }
 0x745   :  { %v1236_v37 = vsub.f32 1.5, %v1235_v34 }
 0x746   :  { %1447 = vmatmul.bf16.vlgmr.msrb.gmra.mxu2 %v1245_v36  ;;  %1465 = vmatmul.bf16.vlgmr.msrb.gmra.mxu3 %v1245_v36 }
 0x747   :  { %1483 = vmatmul.bf16.vlgmr.msrb.gmra.mxu0 %v1245_v36  ;;  %1501 = vmatmul.bf16.vlgmr.msrb.gmra.mxu1 %v1245_v36  ;;  %v1237_v38 = vmul.f32 %v4798_v24, %v1236_v37 }
 0x748   :  { %1938 = vmatpush.bf16.msra.mxu1 %v4604_v45  ;;  %1922 = vmatpush.bf16.msra.mxu0 %v4594_v52 }
 0x749   :  { %v1241_v42 = vsel %vm1240_vm3, %v4798_v24, %v1237_v38 }
 0x74a   :  { %v1244_v40 = vmul.f32 %v1241_v42, %v5424_v12  ;;  %v4580_v12 = vld [vmem:[#allocation16 + $0x30] sm:$0xff] }
 0x74b   :  { %1884 = vmatpush.bf16.msra.mxu2 %v4580_v12 }
 0x74c   :  { %v1246_v43 = vpack.c.bf16 %v1244_v40, %v1244_v40  ;;  %1939 = vmatpush.bf16.msra.mxu1 %v4603_v50  ;;  %1923 = vmatpush.bf16.msra.mxu0 %v4593_v56 }
 0x74f   :  { %1885 = vmatpush.bf16.msra.mxu2 %v4579_v54 }
 0x750   :  { %1940 = vmatpush.bf16.msra.mxu1 %v4602_v53  ;;  %1924 = vmatpush.bf16.msra.mxu0 %v4592_v60 }
 0x753   :  { %1886 = vmatpush.bf16.msra.mxu2 %v4578_v58 }
 0x754   :  { %1941 = vmatpush.bf16.msra.mxu1 %v4601_v57  ;;  %1925 = vmatpush.bf16.msra.mxu0 %v4591_v2 }
 0x756   :  { %1452 = vmatmul.bf16.gmra.mxu2 %v1246_v43  ;;  %1470 = vmatmul.bf16.gmra.mxu3 %v1246_v43 }
 0x757   :  { %1488 = vmatmul.bf16.gmra.mxu0 %v1246_v43  ;;  %1506 = vmatmul.bf16.gmra.mxu1 %v1246_v43 }
 0x758   :  { %1942 = vmatpush.bf16.msra.mxu1 %v4600_v61  ;;  %1887 = vmatpush.bf16.msra.mxu2 %v4577_v63 }
 0x759   :  { %1926 = vmatpush.bf16.msra.mxu0 %v4590_v25 }
 0x75c   :  { %1943 = vmatpush.bf16.msra.mxu1 %v4599_v3  ;;  %1888 = vmatpush.bf16.msra.mxu2 %v4576_v41 }
 0x760   :  { %1944 = vmatpush.bf16.msra.mxu1 %v4598_v26  ;;  %1889 = vmatpush.bf16.msra.mxu2 %v4575_v11 }
 0x764   :  { %1890 = vmatpush.bf16.msra.mxu2 %v4574_v16 }
 0x7c4   :  { %v5434_v6 = vpop.f32.mrf.mxu0  ;;  %v5436_v7 = vpop.f32.mrf.mxu1 }
 0x7c5   :  { %v1513_v27 = vmul.f32 %v5434_v6, %v5434_v6  ;;  %v1514_v10 = vmul.f32 %v5436_v7, %v5436_v7 }
 0x7c7   :  { %v1525_v14 = vmul.f32 %v1513_v27, %v5434_v6  ;;  %v1526_v15 = vmul.f32 %v1514_v10, %v5436_v7 }
 0x7c9   :  { %v1537_v19 = vmul.f32 0.044715, %v1525_v14  ;;  %v1538_v20 = vmul.f32 0.044715, %v1526_v15  ;;  %v5444_v21 = vpop.f32.mrf.mxu2  ;;  %v5446_v23 = vpop.f32.mrf.mxu3 }
 0x7ca   :  { %v1511_v24 = vmul.f32 %v5444_v21, %v5444_v21  ;;  %v1512_v28 = vmul.f32 %v5446_v23, %v5446_v23 }
 0x7cb   :  { %v1549_v39 = vadd.f32 %v1537_v19, %v5434_v6  ;;  %v1550_v29 = vadd.f32 %v1538_v20, %v5436_v7 }
 0x7cc   :  { %v1523_v30 = vmul.f32 %v1511_v24, %v5444_v21  ;;  %v1524_v31 = vmul.f32 %v1512_v28, %v5446_v23  ;;  %v5456_v32 = vpop.f32.mrf.mxu0  ;;  %v5458_v33 = vpop.f32.mrf.mxu1 }
 0x7cd   :  { %v1561_v34 = vmul.f32 0.7978846, %v1549_v39  ;;  %v1562_v36 = vmul.f32 0.7978846, %v1550_v29  ;;  %v1517_v37 = vmul.f32 %v5456_v32, %v5456_v32  ;;  %v1518_v38 = vmul.f32 %v5458_v33, %v5458_v33 }
 0x7ce   :  { %v1535_v42 = vmul.f32 0.044715, %v1523_v30  ;;  %v1536_v40 = vmul.f32 0.044715, %v1524_v31 }
 0x7cf   :  { %4799 = vtanh.f32 %v1561_v34  ;;  %v1529_v43 = vmul.f32 %v1517_v37, %v5456_v32  ;;  %v1530_v5 = vmul.f32 %v1518_v38, %v5458_v33 }
 0x7d0   :  { %4801 = vtanh.f32 %v1562_v36  ;;  %v1547_v8 = vadd.f32 %v1535_v42, %v5444_v21  ;;  %v1548_v46 = vadd.f32 %v1536_v40, %v5446_v23 }
 0x7d1   :  { %v1541_v45 = vmul.f32 0.044715, %v1529_v43  ;;  %v1542_v47 = vmul.f32 0.044715, %v1530_v5  ;;  %v5468_v48 = vpop.f32.mrf.mxu2  ;;  %v5470_v49 = vpop.f32.mrf.mxu3 }
 0x7d2   :  { %v1559_v50 = vmul.f32 0.7978846, %v1547_v8  ;;  %v1560_v12 = vmul.f32 0.7978846, %v1548_v46  ;;  %v1515_v51 = vmul.f32 %v5468_v48, %v5468_v48  ;;  %v1516_v52 = vmul.f32 %v5470_v49, %v5470_v49 }
 0x7d3   :  { %v1553_v53 = vadd.f32 %v1541_v45, %v5456_v32  ;;  %v1554_v54 = vadd.f32 %v1542_v47, %v5458_v33 }
 0x7d4   :  { %v1527_v55 = vmul.f32 %v1515_v51, %v5468_v48  ;;  %v1528_v56 = vmul.f32 %v1516_v52, %v5470_v49  ;;  %v5480_v57 = vpop.f32.mrf.mxu0  ;;  %v5482_v58 = vpop.f32.mrf.mxu1  ;;  %4803 = vtanh.f32 %v1559_v50 }
 0x7d5   :  { %v4800_v59 = vpop.eup %4799  ;;  %v1565_v60 = vmul.f32 0.7978846, %v1553_v53  ;;  %v1566_v61 = vmul.f32 0.7978846, %v1554_v54  ;;  %v1521_v63 = vmul.f32 %v5480_v57, %v5480_v57  ;;  %4805 = vtanh.f32 %v1560_v12 }
 0x7d6   :  { %v4802_v0 = vpop.eup %4801  ;;  %v1539_v2 = vmul.f32 0.044715, %v1527_v55  ;;  %v1540_v3 = vmul.f32 0.044715, %v1528_v56  ;;  %v1522_v41 = vmul.f32 %v5482_v58, %v5482_v58  ;;  %v1585_v25 = vadd.f32 1.0, %v4800_v59 }
 0x7d7   :  { %4807 = vtanh.f32 %v1565_v60  ;;  %v1533_v44 = vmul.f32 %v1521_v63, %v5480_v57  ;;  %v1586_v10 = vadd.f32 1.0, %v4802_v0 }
 0x7d8   :  { %4809 = vtanh.f32 %v1566_v61  ;;  %v1551_v26 = vadd.f32 %v1539_v2, %v5468_v48  ;;  %v1552_v27 = vadd.f32 %v1540_v3, %v5470_v49  ;;  %v1534_v13 = vmul.f32 %v1522_v41, %v5482_v58 }
 0x7d9   :  { %v1545_v11 = vmul.f32 0.044715, %v1533_v44  ;;  %v5492_v14 = vpop.f32.mrf.mxu2  ;;  %v5494_v15 = vpop.f32.mrf.mxu3  ;;  %v1597_v29 = vmul.f32 0.5, %v1585_v25  ;;  %v1598_v38 = vmul.f32 0.5, %v1586_v10 }
 0x7da   :  { %v1563_v16 = vmul.f32 0.7978846, %v1551_v26  ;;  %v1564_v18 = vmul.f32 0.7978846, %v1552_v27  ;;  %v1519_v19 = vmul.f32 %v5492_v14, %v5492_v14  ;;  %v4804_v20 = vpop.eup %4803  ;;  %v1546_v28 = vmul.f32 0.044715, %v1534_v13 }
 0x7db   :  { %v1557_v24 = vadd.f32 %v1545_v11, %v5480_v57  ;;  %v4806_v39 = vpop.eup %4805  ;;  %v1520_v31 = vmul.f32 %v5494_v15, %v5494_v15  ;;  %v1583_v5 = vadd.f32 1.0, %v4804_v20  ;;  %v1609_v54 = vmul.f32 %v1597_v29, %v5434_v6 }
 0x7dc   :  { %4811 = vtanh.f32 %v1563_v16  ;;  %v1531_v30 = vmul.f32 %v1519_v19, %v5492_v14  ;;  %v1491_v34 = vpop.f32.mrf.mxu0  ;;  %v1509_v36 = vpop.f32.mrf.mxu1  ;;  %v1558_v40 = vadd.f32 %v1546_v28, %v5482_v58  ;;  %v1584_v47 = vadd.f32 1.0, %v4806_v39 }
 0x7dd   :  { %v4808_v37 = vpop.eup %4807  ;;  %4813 = vtanh.f32 %v1564_v18  ;;  %v1569_v42 = vmul.f32 0.7978846, %v1557_v24  ;;  %v1532_v45 = vmul.f32 %v1520_v31, %v5494_v15  ;;  %v1610_v61 = vmul.f32 %v1598_v38, %v5436_v7 }
 0x7de   :  { %v4810_v43 = vpop.eup %4809  ;;  %v1589_v8 = vadd.f32 1.0, %v4808_v37  ;;  %v1543_v46 = vmul.f32 0.044715, %v1531_v30  ;;  %v1570_v12 = vmul.f32 0.7978846, %v1558_v40  ;;  %v1595_v41 = vmul.f32 0.5, %v1583_v5 }
 0x7df   :  { %v1590_v50 = vadd.f32 1.0, %v4810_v43  ;;  %4815 = vtanh.f32 %v1569_v42  ;;  %v1544_v53 = vmul.f32 0.044715, %v1532_v45  ;;  %v1596_v44 = vmul.f32 0.5, %v1584_v47 }
 0x7e0   :  { %v1601_v51 = vmul.f32 0.5, %v1589_v8  ;;  %v1555_v52 = vadd.f32 %v1543_v46, %v5492_v14  ;;  %4817 = vtanh.f32 %v1570_v12 }
 0x7e1   :  { %v1602_v55 = vmul.f32 0.5, %v1590_v50  ;;  %v1455_v56 = vpop.f32.mrf.mxu2  ;;  %v1473_v59 = vpop.f32.mrf.mxu3  ;;  %v1556_v2 = vadd.f32 %v1544_v53, %v5494_v15  ;;  %v1608_v20 = vmul.f32 %v1596_v44, %v5446_v23 }
 0x7e2   :  { %v4812_v60 = vpop.eup %4811  ;;  %v1613_v63 = vmul.f32 %v1601_v51, %v5456_v32  ;;  %v1567_v0 = vmul.f32 0.7978846, %v1555_v52  ;;  %v1607_v32 = vmul.f32 %v1595_v41, %v5444_v21 }
 0x7e3   :  { %v4814_v3 = vpop.eup %4813  ;;  %v1614_v25 = vmul.f32 %v1602_v55, %v5458_v33  ;;  %v1587_v26 = vadd.f32 1.0, %v4812_v60  ;;  %v1568_v6 = vmul.f32 0.7978846, %v1556_v2 }
 0x7e4   :  { %v1588_v27 = vadd.f32 1.0, %v4814_v3  ;;  %v1621_v10 = vpack.c.bf16 %v1613_v63, %v1609_v54  ;;  %4819 = vtanh.f32 %v1567_v0 }
 0x7e5   :  { %v4816_v11 = vpop.eup %4815  ;;  %v1599_v13 = vmul.f32 0.5, %v1587_v26  ;;  %v1622_v16 = vpack.c.bf16 %v1614_v25, %v1610_v61  ;;  %4821 = vtanh.f32 %v1568_v6 }
 0x7e6   :  { %v1600_v18 = vmul.f32 0.5, %v1588_v27  ;;  %1927 = vmatmul.bf16.vlgmr.msra.gmra.mxu0 %v1621_v10  ;;  %v4818_v7 = vpop.eup %4817  ;;  %v1593_v24 = vadd.f32 1.0, %v4816_v11 }
 0x7e7   :  { %v1611_v19 = vmul.f32 %v1599_v13, %v5468_v48  ;;  %1945 = vmatmul.bf16.vlgmr.msra.gmra.mxu1 %v1622_v16  ;;  %v1594_v39 = vadd.f32 1.0, %v4818_v7 }
 0x7e8   :  { %v1612_v33 = vmul.f32 %v1600_v18, %v5470_v49  ;;  %v1605_v34 = vmul.f32 0.5, %v1593_v24  ;;  %v4134_v24 = vld [vmem:[#allocation11 + $0x168] sm:$0xf] }
 0x7e9   :  { %v1619_v28 = vpack.c.bf16 %v1611_v19, %v1607_v32  ;;  %v1606_v36 = vmul.f32 0.5, %v1594_v39  ;;  %v4627_v39 = vld [vmem:[#allocation11 + $0x16c] sm:$0xf] }
 0x7ea   :  { %v4820_v29 = vpop.eup %4819  ;;  %v1620_v30 = vpack.c.bf16 %v1612_v33, %v1608_v20  ;;  %v1617_v21 = vmul.f32 %v1605_v34, %v5480_v57  ;;  %v4629_v34 = vld [vmem:[#allocation11 + $0x178] sm:$0xf0] }
 0x7eb   :  { %1891 = vmatmul.bf16.vlgmr.msra.gmra.mxu2 %v1619_v28  ;;  %v4822_v31 = vpop.eup %4821  ;;  %v1591_v37 = vadd.f32 1.0, %v4820_v29  ;;  %v1618_v48 = vmul.f32 %v1606_v36, %v5482_v58  ;;  %v4628_v28 = vld [vmem:[#allocation11 + $0x170] sm:$0xf0] }
 0x7ec   :  { %1909 = vmatmul.bf16.vlgmr.msra.gmra.mxu3 %v1620_v30  ;;  %v1592_v38 = vadd.f32 1.0, %v4822_v31  ;;  %v1625_v40 = vpack.c.bf16 %v1617_v21, %v1617_v21  ;;  %v4135_v29 = vor.u32 %v4628_v28, %v4134_v24  ;;  %v4136_v30 = vld [vmem:[#allocation11 + $0x174] sm:$0xf0]  ;;  %v4142_v31 = vld [vmem:[#allocation11 + $0x170] sm:$0xf] }
 0x7ed   :  { %v1603_v42 = vmul.f32 0.5, %v1591_v37  ;;  %v1626_v49 = vpack.c.bf16 %v1618_v48, %v1618_v48  ;;  %v4139_v36 = vor.u32 %v4627_v39, %v4136_v30  ;;  %v4143_v37 = vor.u32 %v4629_v34, %v4142_v31  ;;  %v4625_v21 = vld [vmem:[#allocation11 + $0x158] sm:$0xf0]  ;;  %v4624_v48 = vld [vmem:[#allocation11 + $0x154] sm:$0xf] }
 0x7ee   :  { %v1604_v23 = vmul.f32 0.5, %v1592_v38  ;;  %2181 = vmatpush.bf16.msrb.mxu2 %v4135_v29  ;;  %v4122_v38 = vld [vmem:[#allocation11 + $0x150] sm:$0xf]  ;;  %v4062_v24 = vld [vmem:[#allocation11 + $0xd8] sm:$0xf] }
 0x7ef   :  { %v1615_v43 = vmul.f32 %v1603_v42, %v5492_v14  ;;  %2199 = vmatpush.bf16.msrb.mxu3 %v4139_v36  ;;  %2217 = vmatpush.bf16.msrb.mxu0 %v4143_v37  ;;  %v4123_v42 = vor.u32 %v4625_v21, %v4122_v38  ;;  %v4610_v28 = vld [vmem:[#allocation11 + $0xe0] sm:$0xf0]  ;;  %v4609_v39 = vld [vmem:[#allocation11 + $0xdc] sm:$0xf]  ;;  %v4064_v30 = vld [vmem:[#allocation11 + $0xe4] sm:$0xf0] }
 0x7f0   :  { %v1616_v5 = vmul.f32 %v1604_v23, %v5494_v15  ;;  %v4124_v23 = vld [vmem:[#allocation11 + $0x15c] sm:$0xf0]  ;;  %v4063_v29 = vor.u32 %v4610_v28, %v4062_v24  ;;  %v4611_v34 = vld [vmem:[#allocation11 + $0xe8] sm:$0xf0]  ;;  %v4067_v36 = vor.u32 %v4609_v39, %v4064_v30 }
 0x7f1   :  { %v1623_v8 = vpack.c.bf16 %v1615_v43, %v1615_v43  ;;  %v4127_v43 = vor.u32 %v4624_v48, %v4124_v23  ;;  %v4070_v31 = vld [vmem:[#allocation11 + $0xe0] sm:$0xf]  ;;  %v4607_v21 = vld [vmem:[#allocation11 + $0xc8] sm:$0xf0]  ;;  %v4606_v48 = vld [vmem:[#allocation11 + $0xc4] sm:$0xf] }
 0x7f2   :  { %v1624_v46 = vpack.c.bf16 %v1616_v5, %v1616_v5  ;;  %2182 = vmatpush.bf16.msrb.mxu2 %v4123_v42  ;;  %v4071_v37 = vor.u32 %v4611_v34, %v4070_v31  ;;  %v4050_v38 = vld [vmem:[#allocation11 + $0xc0] sm:$0xf] }
 0x7f3   :  { %2200 = vmatpush.bf16.msrb.mxu3 %v4127_v43  ;;  %v4051_v23 = vor.u32 %v4607_v21, %v4050_v38  ;;  %v4608_v43 = vld [vmem:[#allocation11 + $0xd0] sm:$0xf0] }
 0x7f6   :  { %1932 = vmatmul.bf16.gmra.mxu0 %v1625_v40  ;;  %v4130_v40 = vld [vmem:[#allocation11 + $0x158] sm:$0xf] }
 0x7f7   :  { %1950 = vmatmul.bf16.gmra.mxu1 %v1626_v49  ;;  %v4626_v49 = vld [vmem:[#allocation11 + $0x160] sm:$0xf0] }
 0x7f8   :  { %v4131_v5 = vor.u32 %v4626_v49, %v4130_v40  ;;  %v4052_v40 = vld [vmem:[#allocation11 + $0xcc] sm:$0xf0]  ;;  %v4058_v49 = vld [vmem:[#allocation11 + $0xc8] sm:$0xf] }
 0x7fa   :  { %2218 = vmatpush.bf16.msrb.mxu0 %v4131_v5 }
 0x7fb   :  { %1896 = vmatmul.bf16.gmra.mxu2 %v1623_v8  ;;  %v4110_v8 = vld [vmem:[#allocation11 + $0x138] sm:$0xf] }
 0x7fc   :  { %1914 = vmatmul.bf16.gmra.mxu3 %v1624_v46  ;;  %v4622_v46 = vld [vmem:[#allocation11 + $0x140] sm:$0xf0] }
 0x863   :  { %v1928_v45 = vpop.f32.mrf.mxu0 }
 0x864   :  { %v1946_v47 = vpop.f32.mrf.mxu1 }
 0x86b   :  { %v1930_v50 = vpop.f32.mrf.mxu0 }
 0x86c   :  { %v1948_v57 = vpop.f32.mrf.mxu1 }
 0x86e   :  { %v1892_v12 = vpop.f32.mrf.mxu2 }
 0x86f   :  { %v1910_v58 = vpop.f32.mrf.mxu3 }
 0x870   :  { %v1911_v51 = vadd.f32 %v1910_v58, %v1892_v12  ;;  %v4623_v12 = vld [vmem:[#allocation11 + $0x148] sm:$0xf0] }
 0x872   :  { %v1929_v52 = vadd.f32 %v1928_v45, %v1911_v51  ;;  %v4621_v45 = vld [vmem:[#allocation11 + $0x13c] sm:$0xf] }
 0x873   :  { %v1933_v53 = vpop.f32.mrf.mxu0 }
 0x874   :  { %v1947_v54 = vadd.f32 %v1946_v47, %v1929_v52  ;;  %v1951_v55 = vpop.f32.mrf.mxu1  ;;  %v4111_v47 = vor.u32 %v4622_v46, %v4110_v8  ;;  %v4098_v52 = vld [vmem:[#allocation11 + $0x120] sm:$0xf]  ;;  %v4055_v8 = vor.u32 %v4606_v48, %v4052_v40  ;;  %v4059_v46 = vor.u32 %v4608_v43, %v4058_v49 }
 0x876   :  { %v1894_v14 = vpop.f32.mrf.mxu2  ;;  %v5519_v56 = vadd.f32 %v1947_v54, %v5399_v62  ;;  %2183 = vmatpush.bf16.msrb.mxu2 %v4111_v47  ;;  %v4618_v54 = vld [vmem:[#allocation11 + $0x124] sm:$0xf] }
 0x877   :  { %v1912_v15 = vpop.f32.mrf.mxu3 }
 0x878   :  { %v1913_v59 = vadd.f32 %v1912_v15, %v1894_v14  ;;  %1958 = vadd.xlane.f32.xlu1 %v5519_v56  ;;  %v4100_v14 = vld [vmem:[#allocation11 + $0x12c] sm:$0xf0]  ;;  %v4106_v15 = vld [vmem:[#allocation11 + $0x128] sm:$0xf] }
 0x87a   :  { %v1931_v60 = vadd.f32 %v1930_v50, %v1913_v59  ;;  %v4112_v50 = vld [vmem:[#allocation11 + $0x144] sm:$0xf0]  ;;  %v4620_v59 = vld [vmem:[#allocation11 + $0x130] sm:$0xf0] }
 0x87b   :  { %v1935_v61 = vpop.f32.mrf.mxu0  ;;  %v4115_v58 = vor.u32 %v4621_v45, %v4112_v50 }
 0x87c   :  { %v1949_v63 = vadd.f32 %v1948_v57, %v1931_v60  ;;  %v1953_v0 = vpop.f32.mrf.mxu1  ;;  %v4118_v57 = vld [vmem:[#allocation11 + $0x140] sm:$0xf]  ;;  %v4103_v60 = vor.u32 %v4618_v54, %v4100_v14  ;;  %v4107_v61 = vor.u32 %v4620_v59, %v4106_v15 }
 0x87d   :  { %v4119_v51 = vor.u32 %v4623_v12, %v4118_v57  ;;  %2201 = vmatpush.bf16.msrb.mxu3 %v4115_v58  ;;  %v4616_v0 = vld [vmem:[#allocation11 + $0x110] sm:$0xf0] }
 0x87e   :  { %v1897_v2 = vpop.f32.mrf.mxu2  ;;  %v5523_v3 = vadd.f32 %v1949_v63, %v5403_v1  ;;  %v4086_v63 = vld [vmem:[#allocation11 + $0x108] sm:$0xf] }
 0x87f   :  { %v1915_v41 = vpop.f32.mrf.mxu3  ;;  %2219 = vmatpush.bf16.msrb.mxu0 %v4119_v51 }
 0x880   :  { %v1916_v44 = vadd.f32 %v1915_v41, %v1897_v2  ;;  %1960 = vadd.xlane.f32.xlu1 %v5523_v3  ;;  %v4615_v2 = vld [vmem:[#allocation11 + $0x10c] sm:$0xf]  ;;  %v4087_v41 = vor.u32 %v4616_v0, %v4086_v63 }
 0x881   :  { %2202 = vmatpush.bf16.msrb.mxu3 %v4103_v60 }
 0x882   :  { %v1934_v25 = vadd.f32 %v1933_v53, %v1916_v44  ;;  %v4619_v53 = vld [vmem:[#allocation11 + $0x128] sm:$0xf0]  ;;  %v4088_v44 = vld [vmem:[#allocation11 + $0x114] sm:$0xf0] }
 0x883   :  { %2220 = vmatpush.bf16.msrb.mxu0 %v4107_v61 }
 0x884   :  { %v1952_v26 = vadd.f32 %v1951_v55, %v1934_v25  ;;  %v4099_v55 = vor.u32 %v4619_v53, %v4098_v52  ;;  %v4094_v25 = vld [vmem:[#allocation11 + $0x110] sm:$0xf] }
 0x886   :  { %v1899_v62 = vpop.f32.mrf.mxu2  ;;  %v5527_v27 = vadd.f32 %v1952_v26, %v5407_v4  ;;  %2184 = vmatpush.bf16.msrb.mxu2 %v4099_v55  ;;  %v4617_v26 = vld [vmem:[#allocation11 + $0x118] sm:$0xf0] }
 0x887   :  { %v1917_v6 = vpop.f32.mrf.mxu3  ;;  %v4091_v62 = vor.u32 %v4615_v2, %v4088_v44 }
 0x888   :  { %1962 = vadd.xlane.f32.xlu2 %v5527_v27  ;;  %v4095_v6 = vor.u32 %v4617_v26, %v4094_v25 }
 0x889   :  { %2203 = vmatpush.bf16.msrb.mxu3 %v4091_v62 }
 0x88a   :  { %2185 = vmatpush.bf16.msrb.mxu2 %v4087_v41  ;;  %2221 = vmatpush.bf16.msrb.mxu0 %v4095_v6 }
 0x8eb   :  { %v1959_v10 = vpop.xlane.xlu1 %1958 }
 0x8ec   :  { %v1964_v11 = vmul.f32 %v1959_v10, %v5306_v35  ;;  %v4074_v10 = vld [vmem:[#allocation11 + $0xf0] sm:$0xf] }
 0x8ee   :  { %v5532_v13 = vsub.f32 %v5519_v56, %v1964_v11  ;;  %v4613_v11 = vld [vmem:[#allocation11 + $0xf8] sm:$0xf0] }
 0x8f0   :  { %v1970_v1 = vmul.f32 %v5532_v13, %v5532_v13 }
 0x8f2   :  { %1973 = vadd.xlane.f32.xlu1 %v1970_v1  ;;  %v4612_v1 = vld [vmem:[#allocation11 + $0xf4] sm:$0xf] }
 0x8f3   :  { %v1961_v16 = vpop.xlane.xlu1 %1960 }
 0x8f4   :  { %v1965_v18 = vmul.f32 %v1961_v16, %v5306_v35  ;;  %v4075_v16 = vor.u32 %v4613_v11, %v4074_v10 }
 0x8f6   :  { %v5538_v7 = vsub.f32 %v5523_v3, %v1965_v18  ;;  %v4076_v18 = vld [vmem:[#allocation11 + $0xfc] sm:$0xf0]  ;;  %2186 = vmatpush.bf16.msrb.mxu2 %v4075_v16 }
 0x8f8   :  { %v1971_v4 = vmul.f32 %v5538_v7, %v5538_v7 }
 0x8fa   :  { %1975 = vadd.xlane.f32.xlu0 %v1971_v4  ;;  %v4082_v4 = vld [vmem:[#allocation11 + $0xf8] sm:$0xf]  ;;  %2187 = vmatpush.bf16.msrb.mxu2 %v4063_v29 }
 0x8fb   :  { %v1963_v32 = vpop.xlane.xlu2 %1962 }
 0x8fc   :  { %v1966_v19 = vmul.f32 %v1963_v32, %v5306_v35  ;;  %v4614_v32 = vld [vmem:[#allocation11 + $0x100] sm:$0xf0] }
 0x8fe   :  { %v5544_v20 = vsub.f32 %v5527_v27, %v1966_v19  ;;  %v4079_v19 = vor.u32 %v4612_v1, %v4076_v18  ;;  %2188 = vmatpush.bf16.msrb.mxu2 %v4051_v23 }
 0x900   :  { %v1972_v33 = vmul.f32 %v5544_v20, %v5544_v20  ;;  %2204 = vmatpush.bf16.msrb.mxu3 %v4079_v19 }
 0x902   :  { %1977 = vadd.xlane.f32.xlu2 %v1972_v33  ;;  %v4083_v33 = vor.u32 %v4614_v32, %v4082_v4 }
 0x904   :  { %2222 = vmatpush.bf16.msrb.mxu0 %v4083_v33  ;;  %2205 = vmatpush.bf16.msrb.mxu3 %v4067_v36 }
 0x908   :  { %2223 = vmatpush.bf16.msrb.mxu0 %v4071_v37  ;;  %2206 = vmatpush.bf16.msrb.mxu3 %v4055_v8 }
 0x90c   :  { %2224 = vmatpush.bf16.msrb.mxu0 %v4059_v46 }
 0x965   :  { %v1974_v42 = vpop.xlane.xlu1 %1973 }
 0x966   :  { %v1979_v5 = vmul.f32 %v1974_v42, %v5306_v35 }
 0x968   :  { %v1982_v45 = vadd.f32 1e-05, %v1979_v5 }
 0x96a   :  { %4823 = vrsqrt.f32 %v1982_v45  ;;  %vm1991_vm5 = vweird.f32 %v1982_v45 }
 0x96d   :  { %v1976_v47 = vpop.xlane.xlu0 %1975 }
 0x96e   :  { %v1980_v50 = vmul.f32 %v1976_v47, %v5306_v35 }
 0x970   :  { %v4824_v57 = vpop.eup %4823  ;;  %v1983_v12 = vadd.f32 1e-05, %v1980_v50 }
 0x971   :  { %v1986_v58 = vmul.f32 %v4824_v57, %v1982_v45  ;;  %vm1992_vm4 = vweird.f32 %v4824_v57 }
 0x972   :  { %4825 = vrsqrt.f32 %v1983_v12  ;;  %vm1993_vm9 = vmor %vm1991_vm5, %vm1992_vm4  ;;  %vm2001_vm10 = vweird.f32 %v1983_v12 }
 0x973   :  { %v1987_v51 = vmul.f32 %v4824_v57, %v1986_v58 }
 0x975   :  { %v1988_v52 = vmul.f32 0.5, %v1987_v51  ;;  %v1978_v53 = vpop.xlane.xlu2 %1977 }
 0x976   :  { %v1981_v54 = vmul.f32 %v1978_v53, %v5306_v35 }
 0x977   :  { %v1989_v15 = vsub.f32 1.5, %v1988_v52 }
 0x978   :  { %v4826_v55 = vpop.eup %4825  ;;  %v1984_v14 = vadd.f32 1e-05, %v1981_v54 }
 0x979   :  { %v1996_v59 = vmul.f32 %v4826_v55, %v1983_v12  ;;  %v1990_v61 = vmul.f32 %v4824_v57, %v1989_v15  ;;  %vm2002_vm7 = vweird.f32 %v4826_v55 }
 0x97a   :  { %4827 = vrsqrt.f32 %v1984_v14  ;;  %vm2003_vm11 = vmor %vm2001_vm10, %vm2002_vm7  ;;  %vm2011_vm13 = vweird.f32 %v1984_v14 }
 0x97b   :  { %v1997_v60 = vmul.f32 %v4826_v55, %v1996_v59  ;;  %v1994_v41 = vsel %vm1993_vm9, %v4824_v57, %v1990_v61 }
 0x97c   :  { %v2015_v6 = vmul.f32 %v1994_v41, %v5532_v13 }
 0x97d   :  { %v1998_v63 = vmul.f32 0.5, %v1997_v60 }
 0x97f   :  { %v1999_v0 = vsub.f32 1.5, %v1998_v63 }
 0x980   :  { %v4828_v2 = vpop.eup %4827 }
 0x981   :  { %v2000_v44 = vmul.f32 %v4826_v55, %v1999_v0  ;;  %v2006_v25 = vmul.f32 %v4828_v2, %v1984_v14  ;;  %vm2012_vm12 = vweird.f32 %v4828_v2 }
 0x982   :  { %vm2013_vm14 = vmor %vm2011_vm13, %vm2012_vm12 }
 0x983   :  { %v2004_v26 = vsel %vm2003_vm11, %v4826_v55, %v2000_v44  ;;  %v2007_v62 = vmul.f32 %v4828_v2, %v2006_v25 }
 0x984   :  { %v2016_v10 = vmul.f32 %v2004_v26, %v5538_v7 }
 0x985   :  { %v2008_v11 = vmul.f32 0.5, %v2007_v62 }
 0x986   :  { %v2018_v1 = vpack.c.bf16 %v2016_v10, %v2015_v6 }
 0x987   :  { %v2009_v16 = vsub.f32 1.5, %v2008_v11 }
 0x988   :  { %2189 = vmatmul.bf16.vlgmr.msrb.gmra.mxu2 %v2018_v1  ;;  %2207 = vmatmul.bf16.vlgmr.msrb.gmra.mxu3 %v2018_v1 }
 0x989   :  { %2225 = vmatmul.bf16.vlgmr.msrb.gmra.mxu0 %v2018_v1  ;;  %v2010_v18 = vmul.f32 %v4828_v2, %v2009_v16 }
 0x98b   :  { %v2014_v4 = vsel %vm2013_vm14, %v4828_v2, %v2010_v18 }
 0x98c   :  { %v2017_v32 = vmul.f32 %v2014_v4, %v5544_v20 }
 0x98e   :  { %v2019_v19 = vpack.c.bf16 %v2017_v32, %v2017_v32 }
 0x998   :  { %2194 = vmatmul.bf16.gmra.mxu2 %v2019_v19  ;;  %2212 = vmatmul.bf16.gmra.mxu3 %v2019_v19 }
 0x999   :  { %2230 = vmatmul.bf16.gmra.mxu0 %v2019_v19 }
 0xa06   :  { %v5554_v13 = vpop.f32.mrf.mxu0 }
 0xa0b   :  { %v2190_v7 = vpop.f32.mrf.mxu2  ;;  %v2208_v33 = vpop.f32.mrf.mxu3 }
 0xa0c   :  { %2372 = vrot.lane.b32.xlu2 %v2208_v33, %s5171_s27 }
 0xa0e   :  { %v5557_v24 = vpop.f32.mrf.mxu0 }
 0xa13   :  { %v2192_v28 = vpop.f32.mrf.mxu2  ;;  %v2210_v39 = vpop.f32.mrf.mxu3 }
 0xa14   :  { %2374 = vrot.lane.b32.xlu0 %v2210_v39, %s5171_s27 }
 0xa16   :  { %v5560_v29 = vpop.f32.mrf.mxu0 }
 0xa17   :  { %v4744_v20 = vpack.i.bf16 %v5557_v24, %v5560_v29 }
 0xa1b   :  { %v2195_v30 = vpop.f32.mrf.mxu2  ;;  %v2213_v31 = vpop.f32.mrf.mxu3 }
 0xa1c   :  { %2376 = vrot.lane.b32.xlu1 %v2213_v31, %s5171_s27  ;;  %4144 = vmatpush.xpose.msk.msrb.mxu1 %vm838_vm6, %v2213_v31 }
 0xa1d   :  { %2366 = vrot.lane.b32.xlu0 %v2190_v7, %s5171_s27 }
 0xa1e   :  { %v2233_v34 = vpop.f32.mrf.mxu0 }
 0xa20   :  { %4145 = vmatpush.xpose.msk.msrb.mxu1 %vm838_vm6, %v2210_v39 }
 0xa23   :  { %v2197_v36 = vpop.f32.mrf.mxu2  ;;  %v2215_v37 = vpop.f32.mrf.mxu3 }
 0xa24   :  { %4146 = vmatpush.xpose.msk.msrb.mxu1 %vm838_vm6, %v2208_v33  ;;  %2368 = vrot.lane.b32.xlu1 %v2192_v28, %s5171_s27 }
 0xa25   :  { %2370 = vrot.lane.b32.xlu0 %v2195_v30, %s5171_s27 }
 0xa27   :  { %4147 = vmatmul.msk.f32.vlgmr.msrb.gmra.mxu1 %vm838_vm6, %v2190_v7 }
 0xa28   :  { %2351 = vmatpush.msra.mxu1 %v5560_v29 }
 0xa2a   :  { %2352 = vmatpush.msra.mxu1 %v5557_v24 }
 0xa2c   :  { %2353 = vmatpush.msra.mxu1 %v5554_v13 }
 0xa2f   :  { %4148 = vmatmul.msk.f32.gmra.mxu1 %vm838_vm6, %v2192_v28 }
 0xa37   :  { %4149 = vmatmul.msk.f32.gmra.mxu1 %vm838_vm6, %v2195_v30 }
 0xa66   :  { %v2373_v48 = vpop.permute.xlu2 %2372 }
 0xa86   :  { %v2375_v21 = vpop.permute.xlu0 %2374 }
 0xa8e   :  { %v2377_v38 = vpop.permute.xlu1 %2376 }
 0xa8f   :  { %4153 = vmatpush.xpose.msk.msra.mxu2 %vm838_vm6, %v2377_v38  ;;  %v2367_v42 = vpop.permute.xlu0 %2366 }
 0xa93   :  { %4154 = vmatpush.xpose.msk.msra.mxu2 %vm838_vm6, %v2375_v21 }
 0xa96   :  { %v2369_v23 = vpop.permute.xlu1 %2368 }
 0xa97   :  { %4155 = vmatpush.xpose.msk.msra.mxu2 %vm838_vm6, %v2373_v48  ;;  %v2371_v5 = vpop.permute.xlu0 %2370  ;;  %v4637_v48 = vld [vmem:[#allocation13 + $0x78] sm:$0xff] }
 0xa98   :  { %2532 = vmatpush.bf16.msra.mxu0 %v4637_v48  ;;  %v4320_v48 = vld [vmem:[#allocation14 + $0x1e8] sm:$0xf] }
 0xa9a   :  { %4156 = vmatmul.msk.f32.vlgmr.msra.gmra.mxu2 %vm838_vm6, %v2367_v42  ;;  %v4633_v42 = vld [vmem:[#allocation13 + $0x58] sm:$0xff] }
 0xa9b   :  { %2580 = vmatpush.bf16.msrb.mxu1 %v4633_v42  ;;  %v4669_v42 = vld [vmem:[#allocation14 + $0x1f4] sm:$0xf0] }
 0xaa2   :  { %4157 = vmatmul.msk.f32.gmra.mxu2 %vm838_vm6, %v2369_v23 }
 0xaa4   :  { %v2287_v40 = vpop.f32.mrf.mxu1 }
 0xaa5   :  { %v2288_v49 = vadd.f32 %v2287_v40, %v5358_v9 }
 0xaa7   :  { %v2296_v43 = vsel %vm883_vm8, %v2288_v49, -inf }
 0xaa8   :  { %2297 = vmax.xlane.f32.xlu1 %v2296_v43 }
 0xaaa   :  { %4158 = vmatmul.msk.f32.gmra.mxu2 %vm838_vm6, %v2371_v5 }
 0xaac   :  { %v2290_v45 = vpop.f32.mrf.mxu1 }
 0xaad   :  { %v2291_v50 = vadd.f32 %v2290_v45, %v5363_v17 }
 0xaaf   :  { %v2299_v53 = vsel %vm883_vm8, %v2291_v50, -inf }
 0xab4   :  { %v2293_v54 = vpop.f32.mrf.mxu1 }
 0xb1b   :  { %v2298_v57 = vpop.xlane.xlu1 %2297 }
 0xb1c   :  { %v2305_v51 = vsub.f32 %v2288_v49, %v2298_v57 }
 0xb1d   :  { %v2407_v8 = vpop.f32.mrf.mxu2 }
 0xb1e   :  { %v2408_v46 = vadd.f32 %v2407_v8, %v5358_v9  ;;  %v2308_v55 = vmul.f32 1.442695, %v2305_v51  ;;  %v2294_v9 = vadd.f32 %v2293_v54, %v5367_v22  ;;  %v4635_v54 = vld [vmem:[#allocation13 + $0x68] sm:$0xff] }
 0xb20   :  { %v2416_v47 = vsel %vm883_vm8, %v2408_v46, -inf  ;;  %4829 = vpow2.f32 %v2308_v55  ;;  %v2302_v60 = vsel %vm883_vm8, %v2294_v9, -inf  ;;  %v4631_v55 = vld [vmem:[#allocation13 + $0x48] sm:$0xff] }
 0xb21   :  { %2417 = vmax.xlane.f32.xlu2 %v2416_v47 }
 0xb25   :  { %v2410_v12 = vpop.f32.mrf.mxu2 }
 0xb26   :  { %v2411_v58 = vadd.f32 %v2410_v12, %v5363_v17  ;;  %v4830_v17 = vpop.eup %4829 }
 0xb27   :  { %v2314_v61 = vsel %vm883_vm8, %v4830_v17, 0.0 }
 0xb28   :  { %v2419_v52 = vsel %vm883_vm8, %v2411_v58, -inf }
 0xb29   :  { %2420 = vmax.xlane.f32.xlu0 %v2419_v52  ;;  %2300 = vmax.xlane.f32.xlu2 %v2299_v53  ;;  %v4636_v52 = vld [vmem:[#allocation13 + $0x70] sm:$0xff] }
 0xb2a   :  { %v4632_v53 = vld [vmem:[#allocation13 + $0x50] sm:$0xff]  ;;  %2533 = vmatpush.bf16.msra.mxu0 %v4636_v52  ;;  %v4663_v52 = vld [vmem:[#allocation14 + $0x1cc] sm:$0xf] }
 0xb2b   :  { %2581 = vmatpush.bf16.msrb.mxu1 %v4632_v53  ;;  %v4306_v53 = vld [vmem:[#allocation14 + $0x1d8] sm:$0xf0] }
 0xb2d   :  { %v2413_v14 = vpop.f32.mrf.mxu2 }
 0xb2e   :  { %v2414_v15 = vadd.f32 %v2413_v14, %v5367_v22  ;;  %2534 = vmatpush.bf16.msra.mxu0 %v4635_v54  ;;  %v4630_v14 = vld [vmem:[#allocation13 + $0x40] sm:$0xff]  ;;  %v4309_v54 = vor.u32 %v4663_v52, %v4306_v53  ;;  %v4645_v52 = vld [vmem:[#allocation14 + $0x134] sm:$0xf0] }
 0xb2f   :  { %2582 = vmatpush.bf16.msrb.mxu1 %v4631_v55  ;;  %v4280_v55 = vld [vmem:[#allocation14 + $0x1a0] sm:$0xf] }
 0xb30   :  { %v2422_v59 = vsel %vm883_vm8, %v2414_v15, -inf }
 0xb31   :  { %2423 = vmax.xlane.f32.xlu1 %v2422_v59  ;;  %2303 = vmax.xlane.f32.xlu0 %v2302_v60 }
 0xb33   :  { %2583 = vmatpush.bf16.msrb.mxu1 %v4630_v14  ;;  %v4658_v14 = vld [vmem:[#allocation14 + $0x1a4] sm:$0xf] }
 0xb39   :  { %2315 = vadd.xlane.f32.xlu0 %v2314_v61 }
 0xb4a   :  { %4745 = vrot.lane.b32.xlu1 %v4744_v20, %s5171_s27 }
 0xb4d   :  { %2452 = vrot.lane.b32.xlu0 %v5554_v13, %s5171_s27  ;;  %s3523_s27 = sshll.u32 %s5187_s9, 4  ;;  %s3524_s27 = int_to_ptr.vmem [resolvable:$true] %s3523_s27 }
 0xb94   :  { %v2418_v63 = vpop.xlane.xlu2 %2417 }
 0xb95   :  { %v2425_v0 = vsub.f32 %v2408_v46, %v2418_v63 }
 0xb97   :  { %v2428_v2 = vmul.f32 1.442695, %v2425_v0 }
 0xb99   :  { %4831 = vpow2.f32 %v2428_v2 }
 0xb9c   :  { %v2421_v22 = vpop.xlane.xlu0 %2420  ;;  %v2301_v41 = vpop.xlane.xlu2 %2300 }
 0xb9d   :  { %v2426_v44 = vsub.f32 %v2411_v58, %v2421_v22  ;;  %v2306_v62 = vsub.f32 %v2291_v50, %v2301_v41 }
 0xb9f   :  { %v4832_v25 = vpop.eup %4831  ;;  %v2430_v26 = vmul.f32 1.442695, %v2426_v44  ;;  %v2310_v10 = vmul.f32 1.442695, %v2306_v62 }
 0xba0   :  { %v2434_v6 = vsel %vm883_vm8, %v4832_v25, 0.0 }
 0xba1   :  { %4833 = vpow2.f32 %v2430_v26  ;;  %2435 = vadd.xlane.f32.xlu2 %v2434_v6 }
 0xba2   :  { %4835 = vpow2.f32 %v2310_v10 }
 0xba4   :  { %v2424_v11 = vpop.xlane.xlu1 %2423  ;;  %v2304_v1 = vpop.xlane.xlu0 %2303 }
 0xba5   :  { %v2307_v16 = vsub.f32 %v2294_v9, %v2304_v1  ;;  %v2427_v4 = vsub.f32 %v2414_v15, %v2424_v11  ;;  %v4634_v9 = vld [vmem:[#allocation13 + $0x60] sm:$0xff] }
 0xba6   :  { %2535 = vmatpush.bf16.msra.mxu0 %v4634_v9  ;;  %v4660_v9 = vld [vmem:[#allocation14 + $0x1ac] sm:$0xf0] }
 0xba7   :  { %v4834_v18 = vpop.eup %4833  ;;  %v2312_v32 = vmul.f32 1.442695, %v2307_v16  ;;  %v2432_v13 = vmul.f32 1.442695, %v2427_v4 }
 0xba8   :  { %v2437_v19 = vsel %vm883_vm8, %v4834_v18, 0.0  ;;  %v4836_v33 = vpop.eup %4835 }
 0xba9   :  { %2438 = vadd.xlane.f32.xlu2 %v2437_v19  ;;  %4837 = vpow2.f32 %v2312_v32  ;;  %v2317_v28 = vsel %vm883_vm8, %v4836_v33, 0.0 }
 0xbac   :  { %v2316_v7 = vpop.xlane.xlu0 %2315 }
 0xbad   :  { %4839 = vrcp.f32 %v2316_v7 }
 0xbae   :  { %4841 = vpow2.f32 %v2432_v13 }
 0xbaf   :  { %v4838_v24 = vpop.eup %4837 }
 0xbb0   :  { %v2320_v39 = vsel %vm883_vm8, %v4838_v24, 0.0 }
 0xbb1   :  { %2318 = vadd.xlane.f32.xlu2 %v2317_v28  ;;  %2321 = vadd.xlane.f32.xlu1 %v2320_v39 }
 0xbb3   :  { %v4840_v29 = vpop.eup %4839 }
 0xbb4   :  { %v2326_v20 = vmul.f32 %v4840_v29, %v4830_v17  ;;  %v4842_v30 = vpop.eup %4841 }
 0xbb5   :  { %v2440_v31 = vsel %vm883_vm8, %v4842_v30, 0.0 }
 0xbb6   :  { %4150 = vmatmul.msk.f32.vlgmr.msra.gmra.mxu1 %vm883_vm8, %v2326_v20 }
 0xbb9   :  { %2441 = vadd.xlane.f32.xlu2 %v2440_v31 }
 0xbbc   :  { %v4746_v34 = vpop.permute.xlu1 %4745 }
 0xbbd   :  { %v4747_v36 = vunpack.i.l.bf16 %v4746_v34  ;;  %v4748_v37 = vunpack.i.h.bf16 %v4746_v34  ;;  %v4312_v34 = vld [vmem:[#allocation14 + $0x1e0] sm:$0xf] }
 0xbbf   :  { %2483 = vmatpush.msra.mxu3 %v4747_v36  ;;  %v2453_v38 = vpop.permute.xlu0 %2452  ;;  %v4668_v36 = vld [vmem:[#allocation14 + $0x1ec] sm:$0xf0] }
 0xbc1   :  { %2484 = vmatpush.msra.mxu3 %v4748_v37  ;;  %v4666_v37 = vld [vmem:[#allocation14 + $0x1e4] sm:$0xf] }
 0xbc3   :  { %2485 = vmatpush.msra.mxu3 %v2453_v38  ;;  %v4313_v38 = vor.u32 %v4668_v36, %v4312_v34  ;;  %v4651_v34 = vld [vmem:[#allocation14 + $0x16c] sm:$0xf]  ;;  %v4258_v36 = vld [vmem:[#allocation14 + $0x178] sm:$0xf0] }
 0xbc5   :  { %2852 = vmatpush.bf16.msrb.mxu2 %v4313_v38  ;;  %v4232_v38 = vld [vmem:[#allocation14 + $0x140] sm:$0xf] }
 0xc14   :  { %v2436_v21 = vpop.xlane.xlu2 %2435 }
 0xc15   :  { %4843 = vrcp.f32 %v2436_v21  ;;  %v4314_v21 = vld [vmem:[#allocation14 + $0x1f0] sm:$0xf0] }
 0xc1b   :  { %v4844_v23 = vpop.eup %4843 }
 0xc1c   :  { %v2446_v40 = vmul.f32 %v4844_v23, %v4832_v25  ;;  %v2439_v49 = vpop.xlane.xlu2 %2438  ;;  %v4317_v23 = vor.u32 %v4666_v37, %v4314_v21  ;;  %v4261_v37 = vor.u32 %v4651_v34, %v4258_v36  ;;  %v4648_v21 = vld [vmem:[#allocation14 + $0x14c] sm:$0xf0] }
 0xc1d   :  { %4845 = vrcp.f32 %v2439_v49  ;;  %v4667_v49 = vld [vmem:[#allocation14 + $0x1ec] sm:$0xf] }
 0xc1e   :  { %4159 = vmatmul.msk.f32.vlgmr.msra.gmra.mxu3 %vm883_vm8, %v2446_v40  ;;  %v4321_v40 = vor.u32 %v4669_v42, %v4320_v48  ;;  %v4646_v48 = vld [vmem:[#allocation14 + $0x144] sm:$0xf]  ;;  %v4233_v42 = vor.u32 %v4648_v21, %v4232_v38 }
 0xc1f   :  { %2870 = vmatpush.bf16.msrb.mxu3 %v4317_v23  ;;  %v4234_v23 = vld [vmem:[#allocation14 + $0x150] sm:$0xf0] }
 0xc20   :  { %2888 = vmatpush.bf16.msrb.mxu0 %v4321_v40  ;;  %v4240_v40 = vld [vmem:[#allocation14 + $0x148] sm:$0xf] }
 0xc23   :  { %v4846_v43 = vpop.eup %4845 }
 0xc24   :  { %v2319_v5 = vpop.xlane.xlu2 %2318  ;;  %v2447_v8 = vmul.f32 %v4846_v43, %v4834_v18  ;;  %v2322_v46 = vpop.xlane.xlu1 %2321  ;;  %v4322_v43 = vld [vmem:[#allocation14 + $0x1f8] sm:$0xf0] }
 0xc25   :  { %4847 = vrcp.f32 %v2319_v5  ;;  %v4325_v5 = vor.u32 %v4667_v49, %v4322_v43  ;;  %v4649_v49 = vld [vmem:[#allocation14 + $0x154] sm:$0xf0]  ;;  %v4237_v43 = vor.u32 %v4646_v48, %v4234_v23 }
 0xc26   :  { %4160 = vmatmul.msk.f32.gmra.mxu3 %vm883_vm8, %v2447_v8  ;;  %4849 = vrcp.f32 %v2322_v46  ;;  %v4296_v8 = vld [vmem:[#allocation14 + $0x1c0] sm:$0xf]  ;;  %v4664_v46 = vld [vmem:[#allocation14 + $0x1cc] sm:$0xf0] }
 0xc27   :  { %2906 = vmatpush.bf16.msra.mxu1 %v4325_v5  ;;  %v4241_v5 = vor.u32 %v4649_v49, %v4240_v40 }
 0xc2b   :  { %v4848_v45 = vpop.eup %4847  ;;  %2907 = vmatpush.bf16.msra.mxu1 %v4309_v54 }
 0xc2c   :  { %v2442_v47 = vpop.xlane.xlu2 %2441  ;;  %v2327_v50 = vmul.f32 %v4848_v45, %v4836_v33  ;;  %v4850_v57 = vpop.eup %4849  ;;  %v4662_v45 = vld [vmem:[#allocation14 + $0x1c4] sm:$0xf] }
 0xc2d   :  { %4851 = vrcp.f32 %v2442_v47  ;;  %v2328_v58 = vmul.f32 %v4850_v57, %v4838_v24  ;;  %v4297_v47 = vor.u32 %v4664_v46, %v4296_v8  ;;  %v4304_v57 = vld [vmem:[#allocation14 + $0x1c8] sm:$0xf]  ;;  %v4647_v8 = vld [vmem:[#allocation14 + $0x14c] sm:$0xf]  ;;  %v4242_v46 = vld [vmem:[#allocation14 + $0x158] sm:$0xf0] }
 0xc2e   :  { %4151 = vmatmul.msk.f32.gmra.mxu1 %vm883_vm8, %v2327_v50  ;;  %v4298_v50 = vld [vmem:[#allocation14 + $0x1d0] sm:$0xf0] }
 0xc2f   :  { %2853 = vmatpush.bf16.msrb.mxu2 %v4297_v47  ;;  %v4216_v47 = vld [vmem:[#allocation14 + $0x120] sm:$0xf] }
 0xc33   :  { %v4852_v12 = vpop.eup %4851  ;;  %v2355_v59 = vpop.f32.mrf.mxu1 }
 0xc34   :  { %v2448_v51 = vmul.f32 %v4852_v12, %v4842_v30  ;;  %v4665_v12 = vld [vmem:[#allocation14 + $0x1d4] sm:$0xf0] }
 0xc36   :  { %4152 = vmatmul.msk.f32.gmra.mxu1 %vm883_vm8, %v2328_v58  ;;  %4161 = vmatmul.msk.f32.gmra.mxu3 %vm883_vm8, %v2448_v51  ;;  %v4301_v58 = vor.u32 %v4662_v45, %v4298_v50  ;;  %v4305_v51 = vor.u32 %v4665_v12, %v4304_v57  ;;  %v4245_v45 = vor.u32 %v4647_v8, %v4242_v46  ;;  %v4644_v50 = vld [vmem:[#allocation14 + $0x12c] sm:$0xf0]  ;;  %v4642_v57 = vld [vmem:[#allocation14 + $0x124] sm:$0xf] }
 0xc37   :  { %v4217_v12 = vor.u32 %v4644_v50, %v4216_v47 }
 0xc38   :  { %2871 = vmatpush.bf16.msrb.mxu3 %v4301_v58  ;;  %2889 = vmatpush.bf16.msrb.mxu0 %v4305_v51  ;;  %v4218_v58 = vld [vmem:[#allocation14 + $0x130] sm:$0xf0]  ;;  %v4224_v51 = vld [vmem:[#allocation14 + $0x128] sm:$0xf] }
 0xc39   :  { %v4221_v53 = vor.u32 %v4642_v57, %v4218_v58  ;;  %v4225_v54 = vor.u32 %v4645_v52, %v4224_v51  ;;  %v4692_v57 = vld [vmem:[#allocation16 + $0x1b0] sm:$0xff]  ;;  %v4677_v58 = vld [vmem:[#allocation16 + $0x138] sm:$0xff]  ;;  %v4691_v52 = vld [vmem:[#allocation16 + $0x1a8] sm:$0xff] }
 0xc3a   :  { %v4685_v51 = vld [vmem:[#allocation16 + $0x178] sm:$0xff] }
 0xca1   :  { %v2487_v15 = vpop.f32.mrf.mxu3 }
 0xca9   :  { %v2490_v60 = vpop.f32.mrf.mxu3 }
 0xcaa   :  { %v2496_v17 = vpack.c.bf16 %v2490_v60, %v2487_v15  ;;  %v4281_v15 = vor.u32 %v4660_v9, %v4280_v55  ;;  %v4288_v60 = vld [vmem:[#allocation14 + $0x1a8] sm:$0xf]  ;;  %v4643_v55 = vld [vmem:[#allocation14 + $0x12c] sm:$0xf]  ;;  %v4226_v9 = vld [vmem:[#allocation14 + $0x138] sm:$0xf0] }
 0xcab   :  { %v2358_v61 = vpop.f32.mrf.mxu1 }
 0xcac   :  { %v2364_v63 = vpack.c.bf16 %v2358_v61, %v2355_v59  ;;  %4178 = vmatmul.msk.bf16.vlgmr.msra.gmra.mxu0 %vm838_vm6, %v2496_v17  ;;  %v4282_v59 = vld [vmem:[#allocation14 + $0x1b0] sm:$0xf0]  ;;  %v4661_v17 = vld [vmem:[#allocation14 + $0x1b4] sm:$0xf0]  ;;  %2854 = vmatpush.bf16.msrb.mxu2 %v4281_v15  ;;  %v4200_v15 = vld [vmem:[#allocation14 + $0x100] sm:$0xf] }
 0xcad   :  { %v4285_v61 = vor.u32 %v4658_v14, %v4282_v59  ;;  %v4229_v14 = vor.u32 %v4643_v55, %v4226_v9  ;;  %v4640_v59 = vld [vmem:[#allocation14 + $0x10c] sm:$0xf0]  ;;  %v4690_v55 = vld [vmem:[#allocation16 + $0x1a0] sm:$0xff] }
 0xcae   :  { %4196 = vmatmul.msk.bf16.vlgmr.msrb.gmra.mxu1 %vm838_vm6, %v2364_v63  ;;  %v4289_v63 = vor.u32 %v4661_v17, %v4288_v60  ;;  %v4638_v60 = vld [vmem:[#allocation14 + $0x104] sm:$0xf] }
 0xcaf   :  { %2872 = vmatpush.bf16.msrb.mxu3 %v4285_v61  ;;  %v4201_v61 = vor.u32 %v4640_v59, %v4200_v15  ;;  %v4698_v9 = vld [vmem:[#allocation16 + $0x1e0] sm:$0xff]  ;;  %v4683_v15 = vld [vmem:[#allocation16 + $0x168] sm:$0xff]  ;;  %v4689_v59 = vld [vmem:[#allocation16 + $0x198] sm:$0xff] }
 0xcb0   :  { %2890 = vmatpush.bf16.msrb.mxu0 %v4289_v63  ;;  %v4202_v63 = vld [vmem:[#allocation14 + $0x110] sm:$0xf0] }
 0xcb3   :  { %v2361_v0 = vpop.f32.mrf.mxu1 }
 0xcb4   :  { %v2365_v41 = vpack.c.bf16 %v2361_v0, %v2361_v0  ;;  %v4659_v0 = vld [vmem:[#allocation14 + $0x1ac] sm:$0xf] }
 0xcb9   :  { %v2493_v2 = vpop.f32.mrf.mxu3 }
 0xcba   :  { %v2497_v22 = vpack.c.bf16 %v2493_v2, %v2493_v2  ;;  %v4290_v2 = vld [vmem:[#allocation14 + $0x1b8] sm:$0xf0] }
 0xcbc   :  { %4179 = vmatmul.msk.bf16.gmra.mxu0 %vm838_vm6, %v2497_v22  ;;  %v4293_v22 = vor.u32 %v4659_v0, %v4290_v2  ;;  %v4208_v0 = vld [vmem:[#allocation14 + $0x108] sm:$0xf]  ;;  %v4641_v2 = vld [vmem:[#allocation14 + $0x114] sm:$0xf0] }
 0xcbe   :  { %4197 = vmatmul.msk.bf16.gmra.mxu1 %vm838_vm6, %v2365_v41  ;;  %v4264_v41 = vld [vmem:[#allocation14 + $0x180] sm:$0xf] }
 0xcbf   :  { %2908 = vmatpush.bf16.msra.mxu1 %v4293_v22 }
 0xd29   :  { %v2537_v44 = vpop.f32.mrf.mxu0 }
 0xd2b   :  { %v2585_v25 = vpop.f32.mrf.mxu1 }
 0xd2c   :  { %v2586_v26 = vadd.f32 %v2585_v25, %v2537_v44  ;;  %v4656_v44 = vld [vmem:[#allocation14 + $0x18c] sm:$0xf0]  ;;  %v4654_v25 = vld [vmem:[#allocation14 + $0x184] sm:$0xf] }
 0xd2e   :  { %v5615_v62 = vadd.f32 %v2586_v26, %v5519_v56  ;;  %v4265_v26 = vor.u32 %v4656_v44, %v4264_v41  ;;  %v4205_v41 = vor.u32 %v4638_v60, %v4202_v63  ;;  %v4209_v44 = vor.u32 %v4641_v2, %v4208_v0  ;;  %v4697_v60 = vld [vmem:[#allocation16 + $0x1d8] sm:$0xff]  ;;  %v4688_v63 = vld [vmem:[#allocation16 + $0x190] sm:$0xff] }
 0xd2f   :  { %v4696_v0 = vld [vmem:[#allocation16 + $0x1d0] sm:$0xff]  ;;  %v4673_v2 = vld [vmem:[#allocation16 + $0x118] sm:$0xff] }
 0xd30   :  { %2597 = vadd.xlane.f32.xlu2 %v5615_v62  ;;  %2855 = vmatpush.bf16.msrb.mxu2 %v4265_v26  ;;  %v4210_v26 = vld [vmem:[#allocation14 + $0x118] sm:$0xf0] }
 0xd31   :  { %v2539_v6 = vpop.f32.mrf.mxu0 }
 0xd33   :  { %v2587_v10 = vpop.f32.mrf.mxu1 }
 0xd34   :  { %v2588_v11 = vadd.f32 %v2587_v10, %v2539_v6  ;;  %v4266_v6 = vld [vmem:[#allocation14 + $0x190] sm:$0xf0]  ;;  %v4272_v10 = vld [vmem:[#allocation14 + $0x188] sm:$0xf] }
 0xd36   :  { %v5619_v1 = vadd.f32 %v2588_v11, %v5523_v3  ;;  %v4657_v11 = vld [vmem:[#allocation14 + $0x194] sm:$0xf0] }
 0xd38   :  { %2599 = vadd.xlane.f32.xlu0 %v5619_v1 }
 0xd39   :  { %v2542_v16 = vpop.f32.mrf.mxu0 }
 0xd3b   :  { %v2590_v18 = vpop.f32.mrf.mxu1 }
 0xd3c   :  { %v2591_v4 = vadd.f32 %v2590_v18, %v2542_v16  ;;  %v4269_v16 = vor.u32 %v4654_v25, %v4266_v6  ;;  %v4273_v18 = vor.u32 %v4657_v11, %v4272_v10  ;;  %v4639_v25 = vld [vmem:[#allocation14 + $0x10c] sm:$0xf] }
 0xd3d   :  { %v4213_v6 = vor.u32 %v4639_v25, %v4210_v26  ;;  %v4672_v25 = vld [vmem:[#allocation16 + $0x110] sm:$0xff] }
 0xd3e   :  { %v5623_v32 = vadd.f32 %v2591_v4, %v5527_v27  ;;  %v4655_v4 = vld [vmem:[#allocation14 + $0x18c] sm:$0xf]  ;;  %2873 = vmatpush.bf16.msrb.mxu3 %v4269_v16  ;;  %2891 = vmatpush.bf16.msrb.mxu0 %v4273_v18  ;;  %v4680_v26 = vld [vmem:[#allocation16 + $0x150] sm:$0xff] }
 0xd40   :  { %2601 = vadd.xlane.f32.xlu2 %v5623_v32 }
 0xd41   :  { %v2544_v56 = vpop.f32.mrf.mxu0 }
 0xd42   :  { %v4274_v56 = vld [vmem:[#allocation14 + $0x198] sm:$0xf0] }
 0xd43   :  { %v2592_v19 = vpop.f32.mrf.mxu1 }
 0xd44   :  { %v4277_v19 = vor.u32 %v4655_v4, %v4274_v56 }
 0xd46   :  { %2909 = vmatpush.bf16.msra.mxu1 %v4277_v19 }
 0xd4a   :  { %2910 = vmatpush.bf16.msra.mxu1 %v4261_v37 }
 0xd4e   :  { %2911 = vmatpush.bf16.msra.mxu1 %v4245_v45 }
 0xd52   :  { %2912 = vmatpush.bf16.msra.mxu1 %v4229_v14  ;;  %v4675_v14 = vld [vmem:[#allocation16 + $0x128] sm:$0xff] }
 0xd56   :  { %2913 = vmatpush.bf16.msra.mxu1 %v4213_v6  ;;  %v4686_v6 = vld [vmem:[#allocation16 + $0x180] sm:$0xff] }
 0xda3   :  { %v2598_v13 = vpop.xlane.xlu2 %2597 }
 0xda4   :  { %v2603_v7 = vmul.f32 %v2598_v13, %v5306_v35  ;;  %v4248_v13 = vld [vmem:[#allocation14 + $0x160] sm:$0xf] }
 0xda6   :  { %v5628_v33 = vsub.f32 %v5615_v62, %v2603_v7  ;;  %v4652_v7 = vld [vmem:[#allocation14 + $0x16c] sm:$0xf0] }
 0xda8   :  { %v2609_v3 = vmul.f32 %v5628_v33, %v5628_v33 }
 0xdaa   :  { %2612 = vadd.xlane.f32.xlu2 %v2609_v3  ;;  %v4650_v3 = vld [vmem:[#allocation14 + $0x164] sm:$0xf] }
 0xdab   :  { %v2600_v24 = vpop.xlane.xlu0 %2599 }
 0xdac   :  { %v2604_v28 = vmul.f32 %v2600_v24, %v5306_v35  ;;  %v4249_v24 = vor.u32 %v4652_v7, %v4248_v13 }
 0xdae   :  { %v5634_v27 = vsub.f32 %v5619_v1, %v2604_v28  ;;  %v4250_v28 = vld [vmem:[#allocation14 + $0x170] sm:$0xf0]  ;;  %2856 = vmatpush.bf16.msrb.mxu2 %v4249_v24 }
 0xdb0   :  { %v2610_v39 = vmul.f32 %v5634_v27, %v5634_v27 }
 0xdb2   :  { %2614 = vadd.xlane.f32.xlu2 %v2610_v39  ;;  %v4256_v39 = vld [vmem:[#allocation14 + $0x168] sm:$0xf]  ;;  %2857 = vmatpush.bf16.msrb.mxu2 %v4233_v42 }
 0xdb3   :  { %v2602_v29 = vpop.xlane.xlu2 %2601 }
 0xdb4   :  { %v2605_v20 = vmul.f32 %v2602_v29, %v5306_v35  ;;  %v4653_v29 = vld [vmem:[#allocation14 + $0x174] sm:$0xf0] }
 0xdb6   :  { %v5640_v30 = vsub.f32 %v5623_v32, %v2605_v20  ;;  %v4253_v20 = vor.u32 %v4650_v3, %v4250_v28  ;;  %2858 = vmatpush.bf16.msrb.mxu2 %v4217_v12  ;;  %v4700_v12 = vld [vmem:[#allocation16 + $0x1f0] sm:$0xff] }
 0xdb8   :  { %v2611_v31 = vmul.f32 %v5640_v30, %v5640_v30  ;;  %2874 = vmatpush.bf16.msrb.mxu3 %v4253_v20 }
 0xdba   :  { %2616 = vadd.xlane.f32.xlu2 %v2611_v31  ;;  %v4257_v31 = vor.u32 %v4653_v29, %v4256_v39  ;;  %2859 = vmatpush.bf16.msrb.mxu2 %v4201_v61  ;;  %v4682_v61 = vld [vmem:[#allocation16 + $0x160] sm:$0xff] }
 0xdbc   :  { %2892 = vmatpush.bf16.msrb.mxu0 %v4257_v31  ;;  %2875 = vmatpush.bf16.msrb.mxu3 %v4237_v43 }
 0xdbe   :  { %3297 = vmatpush.bf16.msra.mxu2 %v4677_v58 }
 0xdc0   :  { %2893 = vmatpush.bf16.msrb.mxu0 %v4241_v5  ;;  %2876 = vmatpush.bf16.msrb.mxu3 %v4221_v53  ;;  %v4699_v53 = vld [vmem:[#allocation16 + $0x1e8] sm:$0xff] }
 0xdc4   :  { %2894 = vmatpush.bf16.msrb.mxu0 %v4225_v54  ;;  %2877 = vmatpush.bf16.msrb.mxu3 %v4205_v41  ;;  %v4684_v54 = vld [vmem:[#allocation16 + $0x170] sm:$0xff]  ;;  %v4687_v41 = vld [vmem:[#allocation16 + $0x188] sm:$0xff] }
 0xdc8   :  { %2895 = vmatpush.bf16.msrb.mxu0 %v4209_v44  ;;  %3315 = vmatpush.bf16.msra.mxu3 %v4685_v51  ;;  %v4695_v44 = vld [vmem:[#allocation16 + $0x1c8] sm:$0xff] }
 0xdcc   :  { %3316 = vmatpush.bf16.msra.mxu3 %v4684_v54 }
 0xdd0   :  { %3317 = vmatpush.bf16.msra.mxu3 %v4683_v15 }
 0xdd4   :  { %3318 = vmatpush.bf16.msra.mxu3 %v4682_v61 }
 0xe1d   :  { %v2613_v17 = vpop.xlane.xlu2 %2612 }
 0xe1e   :  { %v2618_v22 = vmul.f32 %v2613_v17, %v5306_v35  ;;  %v4674_v17 = vld [vmem:[#allocation16 + $0x120] sm:$0xff] }
 0xe20   :  { %v2621_v10 = vadd.f32 1e-05, %v2618_v22  ;;  %v4681_v22 = vld [vmem:[#allocation16 + $0x158] sm:$0xff] }
 0xe21   :  { %3319 = vmatpush.bf16.msra.mxu3 %v4681_v22 }
 0xe22   :  { %4853 = vrsqrt.f32 %v2621_v10  ;;  %vm2630_vm8 = vweird.f32 %v2621_v10 }
 0xe25   :  { %v2615_v11 = vpop.xlane.xlu2 %2614  ;;  %3320 = vmatpush.bf16.msra.mxu3 %v4680_v26 }
 0xe26   :  { %v2619_v16 = vmul.f32 %v2615_v11, %v5306_v35 }
 0xe28   :  { %v4854_v18 = vpop.eup %4853  ;;  %v2622_v4 = vadd.f32 1e-05, %v2619_v16 }
 0xe29   :  { %v2625_v56 = vmul.f32 %v4854_v18, %v2621_v10  ;;  %vm2631_vm6 = vweird.f32 %v4854_v18  ;;  %v4694_v10 = vld [vmem:[#allocation16 + $0x1c0] sm:$0xff] }
 0xe2a   :  { %4855 = vrsqrt.f32 %v2622_v4  ;;  %vm2632_vm0 = vmor %vm2630_vm8, %vm2631_vm6  ;;  %vm2640_vm1 = vweird.f32 %v2622_v4 }
 0xe2b   :  { %v2626_v19 = vmul.f32 %v4854_v18, %v2625_v56  ;;  %v4671_v56 = vld [vmem:[#allocation16 + $0x108] sm:$0xff] }
 0xe2d   :  { %v2627_v13 = vmul.f32 0.5, %v2626_v19  ;;  %v2617_v7 = vpop.xlane.xlu2 %2616  ;;  %v4679_v19 = vld [vmem:[#allocation16 + $0x148] sm:$0xff] }
 0xe2e   :  { %v2620_v3 = vmul.f32 %v2617_v7, %v5306_v35  ;;  %3321 = vmatpush.bf16.msra.mxu3 %v4679_v19 }
 0xe2f   :  { %v2628_v39 = vsub.f32 1.5, %v2627_v13 }
 0xe30   :  { %v4856_v24 = vpop.eup %4855  ;;  %v2623_v28 = vadd.f32 1e-05, %v2620_v3 }
 0xe31   :  { %v2635_v29 = vmul.f32 %v4856_v24, %v2622_v4  ;;  %v2629_v31 = vmul.f32 %v4854_v18, %v2628_v39  ;;  %vm2641_vm15 = vweird.f32 %v4856_v24 }
 0xe32   :  { %4857 = vrsqrt.f32 %v2623_v28  ;;  %vm2642_vm2 = vmor %vm2640_vm1, %vm2641_vm15  ;;  %vm2650_vm4 = vweird.f32 %v2623_v28 }
 0xe33   :  { %v2636_v20 = vmul.f32 %v4856_v24, %v2635_v29  ;;  %v2633_v38 = vsel %vm2632_vm0, %v4854_v18, %v2629_v31  ;;  %v4670_v29 = vld [vmem:[#allocation16 + $0x100] sm:$0xff] }
 0xe34   :  { %v2654_v40 = vmul.f32 %v2633_v38, %v5628_v33  ;;  %v4693_v33 = vld [vmem:[#allocation16 + $0x1b8] sm:$0xff] }
 0xe35   :  { %v2637_v34 = vmul.f32 0.5, %v2636_v20  ;;  %3333 = vmatpush.bf16.msra.mxu0 %v4693_v33  ;;  %v4678_v20 = vld [vmem:[#allocation16 + $0x140] sm:$0xff] }
 0xe36   :  { %3322 = vmatpush.bf16.msra.mxu3 %v4678_v20 }
 0xe37   :  { %v2638_v36 = vsub.f32 1.5, %v2637_v34 }
 0xe38   :  { %v4858_v37 = vpop.eup %4857 }
 0xe39   :  { %v2639_v21 = vmul.f32 %v4856_v24, %v2638_v36  ;;  %v2645_v48 = vmul.f32 %v4858_v37, %v2623_v28  ;;  %vm2651_vm3 = vweird.f32 %v4858_v37  ;;  %3334 = vmatpush.bf16.msra.mxu0 %v4692_v57 }
 0xe3a   :  { %vm2652_vm5 = vmor %vm2650_vm4, %vm2651_vm3 }
 0xe3b   :  { %v2643_v42 = vsel %vm2642_vm2, %v4856_v24, %v2639_v21  ;;  %v2646_v23 = vmul.f32 %v4858_v37, %v2645_v48 }
 0xe3c   :  { %v2655_v49 = vmul.f32 %v2643_v42, %v5634_v27  ;;  %v4701_v27 = vld [vmem:[#allocation16 + $0x1f8] sm:$0xff] }
 0xe3d   :  { %v2647_v43 = vmul.f32 0.5, %v2646_v23  ;;  %3351 = vmatpush.bf16.msrb.mxu1 %v4701_v27  ;;  %3335 = vmatpush.bf16.msra.mxu0 %v4691_v52 }
 0xe3e   :  { %v2657_v5 = vpack.c.bf16 %v2655_v49, %v2654_v40 }
 0xe3f   :  { %v2648_v8 = vsub.f32 1.5, %v2647_v43 }
 0xe40   :  { %2860 = vmatmul.bf16.vlgmr.msrb.gmra.mxu2 %v2657_v5  ;;  %2878 = vmatmul.bf16.vlgmr.msrb.gmra.mxu3 %v2657_v5 }
 0xe41   :  { %2896 = vmatmul.bf16.vlgmr.msrb.gmra.mxu0 %v2657_v5  ;;  %2914 = vmatmul.bf16.vlgmr.msra.gmra.mxu1 %v2657_v5  ;;  %v2649_v46 = vmul.f32 %v4858_v37, %v2648_v8 }
 0xe42   :  { %3352 = vmatpush.bf16.msrb.mxu1 %v4700_v12  ;;  %3336 = vmatpush.bf16.msra.mxu0 %v4690_v55 }
 0xe43   :  { %v2653_v45 = vsel %vm2652_vm5, %v4858_v37, %v2649_v46 }
 0xe44   :  { %v2656_v47 = vmul.f32 %v2653_v45, %v5640_v30  ;;  %v4676_v30 = vld [vmem:[#allocation16 + $0x130] sm:$0xff] }
 0xe45   :  { %3298 = vmatpush.bf16.msra.mxu2 %v4676_v30 }
 0xe46   :  { %v2658_v50 = vpack.c.bf16 %v2656_v47, %v2656_v47  ;;  %3353 = vmatpush.bf16.msrb.mxu1 %v4699_v53  ;;  %3337 = vmatpush.bf16.msra.mxu0 %v4689_v59 }
 0xe49   :  { %3299 = vmatpush.bf16.msra.mxu2 %v4675_v14 }
 0xe4a   :  { %3354 = vmatpush.bf16.msrb.mxu1 %v4698_v9  ;;  %3338 = vmatpush.bf16.msra.mxu0 %v4688_v63 }
 0xe4d   :  { %3300 = vmatpush.bf16.msra.mxu2 %v4674_v17 }
 0xe4e   :  { %3355 = vmatpush.bf16.msrb.mxu1 %v4697_v60  ;;  %3339 = vmatpush.bf16.msra.mxu0 %v4687_v41 }
 0xe50   :  { %2865 = vmatmul.bf16.gmra.mxu2 %v2658_v50  ;;  %2883 = vmatmul.bf16.gmra.mxu3 %v2658_v50 }
 0xe51   :  { %2901 = vmatmul.bf16.gmra.mxu0 %v2658_v50  ;;  %2919 = vmatmul.bf16.gmra.mxu1 %v2658_v50 }
 0xe52   :  { %3356 = vmatpush.bf16.msrb.mxu1 %v4696_v0  ;;  %3301 = vmatpush.bf16.msra.mxu2 %v4673_v2 }
 0xe53   :  { %3340 = vmatpush.bf16.msra.mxu0 %v4686_v6 }
 0xe56   :  { %3357 = vmatpush.bf16.msrb.mxu1 %v4695_v44  ;;  %3302 = vmatpush.bf16.msra.mxu2 %v4672_v25 }
 0xe5a   :  { %3358 = vmatpush.bf16.msrb.mxu1 %v4694_v10  ;;  %3303 = vmatpush.bf16.msra.mxu2 %v4671_v56 }
 0xe5e   :  { %3304 = vmatpush.bf16.msra.mxu2 %v4670_v29 }
 0xebe   :  { %v5650_v11 = vpop.f32.mrf.mxu0  ;;  %v5652_v16 = vpop.f32.mrf.mxu1 }
 0xebf   :  { %v2926_v18 = vmul.f32 %v5650_v11, %v5650_v11  ;;  %v2927_v4 = vmul.f32 %v5652_v16, %v5652_v16 }
 0xec1   :  { %v2938_v13 = vmul.f32 %v2926_v18, %v5650_v11  ;;  %v2939_v7 = vmul.f32 %v2927_v4, %v5652_v16 }
 0xec3   :  { %v2950_v3 = vmul.f32 0.044715, %v2938_v13  ;;  %v2951_v24 = vmul.f32 0.044715, %v2939_v7  ;;  %v5660_v28 = vpop.f32.mrf.mxu2  ;;  %v5662_v39 = vpop.f32.mrf.mxu3 }
 0xec4   :  { %v2924_v31 = vmul.f32 %v5660_v28, %v5660_v28  ;;  %v2925_v34 = vmul.f32 %v5662_v39, %v5662_v39 }
 0xec5   :  { %v2962_v36 = vadd.f32 %v2950_v3, %v5650_v11  ;;  %v2963_v37 = vadd.f32 %v2951_v24, %v5652_v16 }
 0xec6   :  { %v2936_v38 = vmul.f32 %v2924_v31, %v5660_v28  ;;  %v2937_v21 = vmul.f32 %v2925_v34, %v5662_v39  ;;  %v5672_v48 = vpop.f32.mrf.mxu0  ;;  %v5674_v42 = vpop.f32.mrf.mxu1 }
 0xec7   :  { %v2974_v23 = vmul.f32 0.7978846, %v2962_v36  ;;  %v2975_v40 = vmul.f32 0.7978846, %v2963_v37  ;;  %v2930_v49 = vmul.f32 %v5672_v48, %v5672_v48  ;;  %v2931_v43 = vmul.f32 %v5674_v42, %v5674_v42 }
 0xec8   :  { %v2948_v5 = vmul.f32 0.044715, %v2936_v38  ;;  %v2949_v8 = vmul.f32 0.044715, %v2937_v21 }
 0xec9   :  { %4859 = vtanh.f32 %v2974_v23  ;;  %v2942_v46 = vmul.f32 %v2930_v49, %v5672_v48  ;;  %v2943_v45 = vmul.f32 %v2931_v43, %v5674_v42 }
 0xeca   :  { %4861 = vtanh.f32 %v2975_v40  ;;  %v2960_v47 = vadd.f32 %v2948_v5, %v5660_v28  ;;  %v2961_v50 = vadd.f32 %v2949_v8, %v5662_v39 }
 0xecb   :  { %v2954_v33 = vmul.f32 0.044715, %v2942_v46  ;;  %v2955_v27 = vmul.f32 0.044715, %v2943_v45  ;;  %v5684_v57 = vpop.f32.mrf.mxu2  ;;  %v5686_v12 = vpop.f32.mrf.mxu3 }
 0xecc   :  { %v2972_v58 = vmul.f32 0.7978846, %v2960_v47  ;;  %v2973_v51 = vmul.f32 0.7978846, %v2961_v50  ;;  %v2928_v52 = vmul.f32 %v5684_v57, %v5684_v57  ;;  %v2929_v53 = vmul.f32 %v5686_v12, %v5686_v12 }
 0xecd   :  { %v2966_v30 = vadd.f32 %v2954_v33, %v5672_v48  ;;  %v2967_v54 = vadd.f32 %v2955_v27, %v5674_v42 }
 0xece   :  { %v2940_v55 = vmul.f32 %v2928_v52, %v5684_v57  ;;  %v2941_v9 = vmul.f32 %v2929_v53, %v5686_v12  ;;  %v5696_v14 = vpop.f32.mrf.mxu0  ;;  %v5698_v15 = vpop.f32.mrf.mxu1  ;;  %4863 = vtanh.f32 %v2972_v58 }
 0xecf   :  { %v4860_v59 = vpop.eup %4859  ;;  %v2978_v60 = vmul.f32 0.7978846, %v2966_v30  ;;  %v2979_v17 = vmul.f32 0.7978846, %v2967_v54  ;;  %v2934_v61 = vmul.f32 %v5696_v14, %v5696_v14  ;;  %4865 = vtanh.f32 %v2973_v51 }
 0xed0   :  { %v4862_v63 = vpop.eup %4861  ;;  %v2952_v0 = vmul.f32 0.044715, %v2940_v55  ;;  %v2953_v2 = vmul.f32 0.044715, %v2941_v9  ;;  %v2935_v22 = vmul.f32 %v5698_v15, %v5698_v15  ;;  %v2998_v44 = vadd.f32 1.0, %v4860_v59 }
 0xed1   :  { %4867 = vtanh.f32 %v2978_v60  ;;  %v2946_v41 = vmul.f32 %v2934_v61, %v5696_v14  ;;  %v2999_v6 = vadd.f32 1.0, %v4862_v63 }
 0xed2   :  { %4869 = vtanh.f32 %v2979_v17  ;;  %v2964_v25 = vadd.f32 %v2952_v0, %v5684_v57  ;;  %v2965_v26 = vadd.f32 %v2953_v2, %v5686_v12  ;;  %v2947_v18 = vmul.f32 %v2935_v22, %v5698_v15 }
 0xed3   :  { %v2958_v10 = vmul.f32 0.044715, %v2946_v41  ;;  %v5708_v4 = vpop.f32.mrf.mxu2  ;;  %v5710_v56 = vpop.f32.mrf.mxu3  ;;  %v3010_v31 = vmul.f32 0.5, %v2998_v44  ;;  %v3011_v23 = vmul.f32 0.5, %v2999_v6 }
 0xed4   :  { %v2976_v19 = vmul.f32 0.7978846, %v2964_v25  ;;  %v2977_v13 = vmul.f32 0.7978846, %v2965_v26  ;;  %v2932_v7 = vmul.f32 %v5708_v4, %v5708_v4  ;;  %v4864_v3 = vpop.eup %4863  ;;  %v2959_v29 = vmul.f32 0.044715, %v2947_v18 }
 0xed5   :  { %v2970_v24 = vadd.f32 %v2958_v10, %v5696_v14  ;;  %v4866_v20 = vpop.eup %4865  ;;  %v2933_v36 = vmul.f32 %v5710_v56, %v5710_v56  ;;  %v2996_v5 = vadd.f32 1.0, %v4864_v3  ;;  %v3022_v52 = vmul.f32 %v3010_v31, %v5650_v11 }
 0xed6   :  { %4871 = vtanh.f32 %v2976_v19  ;;  %v2944_v34 = vmul.f32 %v2932_v7, %v5708_v4  ;;  %v2904_v37 = vpop.f32.mrf.mxu0  ;;  %v2922_v38 = vpop.f32.mrf.mxu1  ;;  %v2971_v49 = vadd.f32 %v2959_v29, %v5698_v15  ;;  %v2997_v47 = vadd.f32 1.0, %v4866_v20 }
 0xed7   :  { %v4868_v21 = vpop.eup %4867  ;;  %4873 = vtanh.f32 %v2977_v13  ;;  %v2982_v40 = vmul.f32 0.7978846, %v2970_v24  ;;  %v2945_v45 = vmul.f32 %v2933_v36, %v5710_v56  ;;  %v3023_v9 = vmul.f32 %v3011_v23, %v5652_v16 }
 0xed8   :  { %v4870_v43 = vpop.eup %4869  ;;  %v3002_v8 = vadd.f32 1.0, %v4868_v21  ;;  %v2956_v46 = vmul.f32 0.044715, %v2944_v34  ;;  %v2983_v33 = vmul.f32 0.7978846, %v2971_v49  ;;  %v3008_v63 = vmul.f32 0.5, %v2996_v5 }
 0xed9   :  { %v3003_v50 = vadd.f32 1.0, %v4870_v43  ;;  %4875 = vtanh.f32 %v2982_v40  ;;  %v2957_v51 = vmul.f32 0.044715, %v2945_v45  ;;  %v3009_v0 = vmul.f32 0.5, %v2997_v47 }
 0xeda   :  { %v3014_v27 = vmul.f32 0.5, %v3002_v8  ;;  %v2968_v58 = vadd.f32 %v2956_v46, %v5708_v4  ;;  %4877 = vtanh.f32 %v2983_v33 }
 0xedb   :  { %v3015_v53 = vmul.f32 0.5, %v3003_v50  ;;  %v2868_v30 = vpop.f32.mrf.mxu2  ;;  %v2886_v54 = vpop.f32.mrf.mxu3  ;;  %v2969_v17 = vadd.f32 %v2957_v51, %v5710_v56  ;;  %v3021_v19 = vmul.f32 %v3009_v0, %v5662_v39 }
 0xedc   :  { %v4872_v55 = vpop.eup %4871  ;;  %v3026_v59 = vmul.f32 %v3014_v27, %v5672_v48  ;;  %v2980_v60 = vmul.f32 0.7978846, %v2968_v58  ;;  %v3020_v48 = vmul.f32 %v3008_v63, %v5660_v28 }
 0xedd   :  { %v4874_v61 = vpop.eup %4873  ;;  %v3027_v2 = vmul.f32 %v3015_v53, %v5674_v42  ;;  %v3000_v22 = vadd.f32 1.0, %v4872_v55  ;;  %v2981_v44 = vmul.f32 0.7978846, %v2969_v17 }
 0xede   :  { %v3034_v41 = vpack.c.bf16 %v3026_v59, %v3022_v52  ;;  %v3001_v11 = vadd.f32 1.0, %v4874_v61  ;;  %4879 = vtanh.f32 %v2980_v60 }
 0xedf   :  { %v4876_v25 = vpop.eup %4875  ;;  %v3035_v26 = vpack.c.bf16 %v3027_v2, %v3023_v9  ;;  %v3012_v6 = vmul.f32 0.5, %v3000_v22  ;;  %4881 = vtanh.f32 %v2981_v44 }
 0xee0   :  { %v3013_v10 = vmul.f32 0.5, %v3001_v11  ;;  %3341 = vmatmul.bf16.vlgmr.msra.gmra.mxu0 %v3034_v41  ;;  %v4878_v16 = vpop.eup %4877  ;;  %v3006_v13 = vadd.f32 1.0, %v4876_v25 }
 0xee1   :  { %v3024_v18 = vmul.f32 %v3012_v6, %v5684_v57  ;;  %3359 = vmatmul.bf16.vlgmr.msrb.gmra.mxu1 %v3035_v26  ;;  %v3007_v3 = vadd.f32 1.0, %v4878_v16 }
 0xee2   :  { %v3025_v42 = vmul.f32 %v3013_v10, %v5686_v12  ;;  %v3018_v31 = vmul.f32 0.5, %v3006_v13  ;;  %v4706_v13 = vld [vmem:[#allocation17 + $0x20] sm:$0xff] }
 0xee3   :  { %v3032_v7 = vpack.c.bf16 %v3024_v18, %v3020_v48  ;;  %v3019_v34 = vmul.f32 0.5, %v3007_v3  ;;  %v4709_v18 = vld [vmem:[#allocation17 + $0x38] sm:$0xff]  ;;  %v4704_v3 = vld [vmem:[#allocation17 + $0x10] sm:$0xff] }
 0xee4   :  { %v4880_v24 = vpop.eup %4879  ;;  %v3033_v29 = vpack.c.bf16 %v3025_v42, %v3021_v19  ;;  %v3030_v28 = vmul.f32 %v3018_v31, %v5696_v14  ;;  %3498 = vmatpush.bf16.msrb.mxu2 %v4709_v18  ;;  %4710 = vmatpush.bf16.msrb.mxu3 %v4709_v18  ;;  %v4708_v19 = vld [vmem:[#allocation17 + $0x30] sm:$0xff]  ;;  %v4707_v42 = vld [vmem:[#allocation17 + $0x28] sm:$0xff] }
 0xee5   :  { %3305 = vmatmul.bf16.vlgmr.msra.gmra.mxu2 %v3032_v7  ;;  %v4882_v20 = vpop.eup %4881  ;;  %v3004_v36 = vadd.f32 1.0, %v4880_v24  ;;  %v3031_v57 = vmul.f32 %v3019_v34, %v5698_v15  ;;  %v4705_v7 = vld [vmem:[#allocation17 + $0x18] sm:$0xff]  ;;  %v4703_v24 = vld [vmem:[#allocation17 + $0x8] sm:$0xff] }
 0xee6   :  { %3323 = vmatmul.bf16.vlgmr.msra.gmra.mxu3 %v3033_v29  ;;  %v3005_v37 = vadd.f32 1.0, %v4882_v20  ;;  %v3038_v21 = vpack.c.bf16 %v3030_v28, %v3030_v28  ;;  %v4702_v20 = vld [vmem:[#allocation17] sm:$0xff] }
 0xee7   :  { %v3016_v38 = vmul.f32 0.5, %v3004_v36  ;;  %v3039_v12 = vpack.c.bf16 %v3031_v57, %v3031_v57 }
 0xee8   :  { %v3017_v39 = vmul.f32 0.5, %v3005_v37  ;;  %3499 = vmatpush.bf16.msrb.mxu2 %v4708_v19  ;;  %4711 = vmatpush.bf16.msrb.mxu3 %v4708_v19 }
 0xee9   :  { %v3028_v23 = vmul.f32 %v3016_v38, %v5708_v4 }
 0xeea   :  { %v3029_v40 = vmul.f32 %v3017_v39, %v5710_v56 }
 0xeeb   :  { %v3036_v49 = vpack.c.bf16 %v3028_v23, %v3028_v23 }
 0xeec   :  { %v3037_v43 = vpack.c.bf16 %v3029_v40, %v3029_v40  ;;  %3500 = vmatpush.bf16.msrb.mxu2 %v4707_v42  ;;  %4712 = vmatpush.bf16.msrb.mxu3 %v4707_v42 }
 0xef0   :  { %3346 = vmatmul.bf16.gmra.mxu0 %v3038_v21  ;;  %3501 = vmatpush.bf16.msrb.mxu2 %v4706_v13 }
 0xef1   :  { %3364 = vmatmul.bf16.gmra.mxu1 %v3039_v12  ;;  %4713 = vmatpush.bf16.msrb.mxu3 %v4706_v13 }
 0xef4   :  { %3502 = vmatpush.bf16.msrb.mxu2 %v4705_v7 }
 0xef5   :  { %3310 = vmatmul.bf16.gmra.mxu2 %v3036_v49  ;;  %4714 = vmatpush.bf16.msrb.mxu3 %v4705_v7 }
 0xef6   :  { %3328 = vmatmul.bf16.gmra.mxu3 %v3037_v43 }
 0xef8   :  { %3503 = vmatpush.bf16.msrb.mxu2 %v4704_v3 }
 0xef9   :  { %4715 = vmatpush.bf16.msrb.mxu3 %v4704_v3 }
 0xefc   :  { %3504 = vmatpush.bf16.msrb.mxu2 %v4703_v24 }
 0xefd   :  { %4716 = vmatpush.bf16.msrb.mxu3 %v4703_v24 }
 0xf00   :  { %3505 = vmatpush.bf16.msrb.mxu2 %v4702_v20 }
 0xf01   :  { %4717 = vmatpush.bf16.msrb.mxu3 %v4702_v20 }
 0xf5d   :  { %v3342_v5 = vpop.f32.mrf.mxu0 }
 0xf5e   :  { %v3360_v8 = vpop.f32.mrf.mxu1 }
 0xf65   :  { %v3344_v46 = vpop.f32.mrf.mxu0 }
 0xf66   :  { %v3362_v14 = vpop.f32.mrf.mxu1 }
 0xf68   :  { %v3306_v45 = vpop.f32.mrf.mxu2 }
 0xf69   :  { %v3324_v15 = vpop.f32.mrf.mxu3 }
 0xf6a   :  { %v3325_v47 = vadd.f32 %v3324_v15, %v3306_v45 }
 0xf6c   :  { %v3343_v50 = vadd.f32 %v3342_v5, %v3325_v47 }
 0xf6d   :  { %v3347_v33 = vpop.f32.mrf.mxu0 }
 0xf6e   :  { %v3365_v27 = vpop.f32.mrf.mxu1  ;;  %v3361_v58 = vadd.f32 %v3360_v8, %v3343_v50 }
 0xf70   :  { %v3308_v4 = vpop.f32.mrf.mxu2  ;;  %v3369_v51 = vadd.f32 %v3361_v58, %v5615_v62 }
 0xf71   :  { %v3326_v56 = vpop.f32.mrf.mxu3 }
 0xf72   :  { %v3327_v52 = vadd.f32 %v3326_v56, %v3308_v4  ;;  %3372 = vadd.xlane.f32.xlu1 %v3369_v51 }
 0xf74   :  { %v3345_v53 = vadd.f32 %v3344_v46, %v3327_v52 }
 0xf75   :  { %v3349_v30 = vpop.f32.mrf.mxu0 }
 0xf76   :  { %v3367_v54 = vpop.f32.mrf.mxu1  ;;  %v3363_v55 = vadd.f32 %v3362_v14, %v3345_v53 }
 0xf78   :  { %v3311_v9 = vpop.f32.mrf.mxu2  ;;  %v3370_v59 = vadd.f32 %v3363_v55, %v5619_v1 }
 0xf79   :  { %v3329_v60 = vpop.f32.mrf.mxu3 }
 0xf7a   :  { %v3330_v17 = vadd.f32 %v3329_v60, %v3311_v9  ;;  %3374 = vadd.xlane.f32.xlu2 %v3370_v59 }
 0xf7c   :  { %v3348_v61 = vadd.f32 %v3347_v33, %v3330_v17 }
 0xf7e   :  { %v3366_v63 = vadd.f32 %v3365_v27, %v3348_v61 }
 0xf80   :  { %v3313_v0 = vpop.f32.mrf.mxu2  ;;  %v3371_v2 = vadd.f32 %v3366_v63, %v5623_v32 }
 0xf81   :  { %v3331_v22 = vpop.f32.mrf.mxu3 }
 0xf82   :  { %3376 = vadd.xlane.f32.xlu0 %v3371_v2 }
 0xfe5   :  { %v3373_v62 = vpop.xlane.xlu1 %3372 }
 0xfe6   :  { %v3378_v41 = vmul.f32 %v3373_v62, %v5306_v35 }
 0xfe8   :  { %v5738_v11 = vsub.f32 %v3369_v51, %v3378_v41 }
 0xfea   :  { %v3384_v44 = vmul.f32 %v5738_v11, %v5738_v11 }
 0xfec   :  { %3387 = vadd.xlane.f32.xlu1 %v3384_v44 }
 0xfed   :  { %v3375_v1 = vpop.xlane.xlu2 %3374 }
 0xfee   :  { %v3379_v25 = vmul.f32 %v3375_v1, %v5306_v35 }
 0xff0   :  { %v5743_v26 = vsub.f32 %v3370_v59, %v3379_v25 }
 0xff2   :  { %v3385_v6 = vmul.f32 %v5743_v26, %v5743_v26 }
 0xff4   :  { %3389 = vadd.xlane.f32.xlu2 %v3385_v6 }
 0xff5   :  { %v3377_v32 = vpop.xlane.xlu0 %3376 }
 0xff6   :  { %v3380_v10 = vmul.f32 %v3377_v32, %v5306_v35 }
 0xff8   :  { %v5748_v16 = vsub.f32 %v3371_v2, %v3380_v10 }
 0xffa   :  { %v3386_v48 = vmul.f32 %v5748_v16, %v5748_v16 }
 0xffc   :  { %3391 = vadd.xlane.f32.xlu0 %v3386_v48 }
0x105f   :  { %v3388_v29 = vpop.xlane.xlu1 %3387 }
0x1060   :  { %v3393_v31 = vmul.f32 %v3388_v29, %v5306_v35 }
0x1062   :  { %v3396_v34 = vadd.f32 1e-05, %v3393_v31 }
0x1064   :  { %4883 = vrsqrt.f32 %v3396_v34  ;;  %vm3405_vm9 = vweird.f32 %v3396_v34 }
0x1067   :  { %v3390_v36 = vpop.xlane.xlu2 %3389 }
0x1068   :  { %v3394_v37 = vmul.f32 %v3390_v36, %v5306_v35 }
0x106a   :  { %v4884_v28 = vpop.eup %4883  ;;  %v3397_v57 = vadd.f32 1e-05, %v3394_v37 }
0x106b   :  { %v3400_v38 = vmul.f32 %v4884_v28, %v3396_v34  ;;  %vm3406_vm7 = vweird.f32 %v4884_v28 }
0x106c   :  { %4885 = vrsqrt.f32 %v3397_v57  ;;  %vm3407_vm11 = vmor %vm3405_vm9, %vm3406_vm7  ;;  %vm3415_vm12 = vweird.f32 %v3397_v57 }
0x106d   :  { %v3401_v39 = vmul.f32 %v4884_v28, %v3400_v38 }
0x106f   :  { %v3402_v21 = vmul.f32 0.5, %v3401_v39  ;;  %v3392_v12 = vpop.xlane.xlu0 %3391 }
0x1070   :  { %v3395_v23 = vmul.f32 %v3392_v12, %v5306_v35 }
0x1071   :  { %v3403_v43 = vsub.f32 1.5, %v3402_v21 }
0x1072   :  { %v4886_v40 = vpop.eup %4885  ;;  %v3398_v49 = vadd.f32 1e-05, %v3395_v23 }
0x1073   :  { %v3410_v5 = vmul.f32 %v4886_v40, %v3397_v57  ;;  %v3404_v46 = vmul.f32 %v4884_v28, %v3403_v43  ;;  %vm3416_vm10 = vweird.f32 %v4886_v40 }
0x1074   :  { %4887 = vrsqrt.f32 %v3398_v49  ;;  %vm3417_vm13 = vmor %vm3415_vm12, %vm3416_vm10  ;;  %vm3425_vm6 = vweird.f32 %v3398_v49 }
0x1075   :  { %v3411_v8 = vmul.f32 %v4886_v40, %v3410_v5  ;;  %v3408_v47 = vsel %vm3407_vm11, %v4884_v28, %v3404_v46 }
0x1076   :  { %v3429_v58 = vmul.f32 %v3408_v47, %v5738_v11 }
0x1077   :  { %v3412_v14 = vmul.f32 0.5, %v3411_v8 }
0x1079   :  { %v3413_v45 = vsub.f32 1.5, %v3412_v14 }
0x107a   :  { %v4888_v15 = vpop.eup %4887 }
0x107b   :  { %v3414_v50 = vmul.f32 %v4886_v40, %v3413_v45  ;;  %v3420_v33 = vmul.f32 %v4888_v15, %v3398_v49  ;;  %vm3426_vm14 = vweird.f32 %v4888_v15 }
0x107c   :  { %vm3427_vm8 = vmor %vm3425_vm6, %vm3426_vm14 }
0x107d   :  { %v3418_v35 = vsel %vm3417_vm13, %v4886_v40, %v3414_v50  ;;  %v3421_v27 = vmul.f32 %v4888_v15, %v3420_v33 }
0x107e   :  { %v3430_v4 = vmul.f32 %v3418_v35, %v5743_v26 }
0x107f   :  { %v3422_v51 = vmul.f32 0.5, %v3421_v27 }
0x1080   :  { %v3432_v56 = vpack.c.bf16 %v3430_v4, %v3429_v58 }
0x1081   :  { %v3423_v52 = vsub.f32 1.5, %v3422_v51 }
0x1082   :  { %3506 = vmatmul.bf16.vlgmr.msrb.gmra.mxu2 %v3432_v56 }
0x1083   :  { %v3424_v53 = vmul.f32 %v4888_v15, %v3423_v52 }
0x1085   :  { %v3428_v30 = vsel %vm3427_vm8, %v4888_v15, %v3424_v53 }
0x1086   :  { %v3431_v54 = vmul.f32 %v3428_v30, %v5748_v16 }
0x1088   :  { %v3433_v55 = vpack.c.bf16 %v3431_v54, %v3431_v54 }
0x108a   :  { %3511 = vmatmul.bf16.vlgmr.msrb.gmra.mxu3 %v3433_v55 }
0x1105   :  { %v3507_v9 = vpop.f32.mrf.mxu2 }
0x1106   :  { %3516 = vst [vmem:[#allocation19] sm:$0xff] %v3507_v9 }
0x110d   :  { %v3509_v59 = vpop.f32.mrf.mxu2  ;;  %v3512_v60 = vpop.f32.mrf.mxu3 }
0x110e   :  { %3517 = vst [vmem:[#allocation19 + $0x8] sm:$0xff] %v3509_v59 }
0x110f   :  { %3518 = vst [vmem:[#allocation19 + $0x10] sm:$0xff] %v3512_v60 }
0x1110   :  { %3531 = dma.vmem_to_hbm [thread:$0]  %s3524_s27, 384, %s3526_s7, [#allocation4], %s5168_s18, %s5168_s18, %s5169_s19  }
0x1115   :  { %v3514_v17 = vpop.f32.mrf.mxu3 }
0x1116   :  { %5165 = dma.done.wait [#allocation4], 384  }
0x1117   :  { %5166 = vsyncadd [#allocation4], 4294966912 }
0x1118   :  { %3536 = vsyncpa [#allocation3], 1 }
0x1119   :  { %3537 = vsyncpa [#allocation6], 1 }
0x111a   :  { %3538 = vsyncpa [#allocation9], 1 }
0x111b   :  { %3539 = vsyncpa [#allocation12], 1 }
0x111c   :  { %3540 = vsyncpa [#allocation15], 1 }
0x111d   :  { %3541 = vsyncpa [#allocation18], 1 }
0x111e   :  { %3542 = vsyncpa [#allocation4], 1 }

</bundles_post_ra>
